<compile_context>
chip_gen: v5e
topology: v5e:2x2
jax: 0.10.0
libtpu: 0.0.40
codegen_flags: <defaults>
</compile_context>

<pallas_src>
import jax
import jax.numpy as jnp
from jax.experimental import pallas as pl
from jax.experimental.pallas import tpu as pltpu


def _round_up(x, m):
    return (x + m - 1) // m * m


def _upconv_kernel(x_ref, w_ref, shift_ref, o_ref):
    # x_ref    : (TH+2, W+2, Cin_p)    bf16  zero-padded original-resolution row tile (halo'd)
    # w_ref    : (4, 4*Cin_p, Cout_p)  bf16  per-parity folded 2x2 weights (BN scale folded in)
    # shift_ref: (1, Cout_p)           f32   folded conv-bias + BN shift
    # o_ref    : (4, TH, W, Cout_p)    f32   parity-plane output
    _, TH, W, Cp = o_ref.shape
    Cin_p = x_ref.shape[-1]
    shift = shift_ref[...]                                       # (1, Cp)

    for ab in range(4):                                          # output parity (oy%2, ox%2)
        a, b = ab // 2, ab % 2
        # Gather the four 2x2 taps of this parity into the contraction axis (deep K).
        # Ref slicing (pl.ds) -> cheap addressing; Cin_p is a multiple of 128 so the lane
        # concat is aligned.
        patches = jnp.concatenate(
            [x_ref[pl.ds(a + r, TH), pl.ds(b + s, W), :]
             for r in (0, 1) for s in (0, 1)],
            axis=-1,
        ).reshape(TH * W, 4 * Cin_p)                             # bf16, K = 4*Cin_p
        acc = jnp.dot(patches, w_ref[ab],
                      preferred_element_type=jnp.float32)        # (TH*W, Cp), one MXU matmul
        y = jnp.maximum(acc + shift, 0.0)                        # folded bias/BN + ReLU
        o_ref[ab] = y.reshape(TH, W, Cp)


def _choose_tile_rows(H, W, cin_p, cout_p, budget_bytes):
    """Largest row-tile TH whose (double-buffered) VMEM footprint fits the budget."""
    w_sub = _round_up(W, 8)

    def cost(th):
        in_t = (th + 2) * _round_up(W + 2, 16) * cin_p * 2      # bf16 input tile
        out_t = 4 * th * w_sub * cout_p * 4                     # f32 output tile (4 parities)
        patches = th * w_sub * 4 * cin_p * 2                    # bf16 im2col temp (1 parity)
        acc = th * w_sub * cout_p * 4                           # f32 matmul result temp
        return 2 * (in_t + out_t) + patches + acc               # x2 = pipeline double buffer

    fitting = [th for th in range(1, min(H, 1024) + 1) if cost(th) <= budget_bytes]
    if not fitting:
        return 1   # TODO(synk): also tile W / Cout for extreme shapes
    divisors = [th for th in fitting if H % th == 0]
    return max(divisors) if divisors else max(fitting)


def up_conv_forward(x_nchw, weight, bias, gamma, beta, run_mean, run_var, eps=1e-5):
    """x_nchw: (N, Cin, H, W); weight: (Cout, Cin, 3, 3).  Returns (N, Cout, 2H, 2W) f32."""
    N, Cin, H, W = x_nchw.shape
    Cout = weight.shape[0]
    cin_p = _round_up(Cin, 128)     # lane-aligned channels (keeps the K-concat aligned too)
    cout_p = _round_up(Cout, 128)   # lane-dense output stores

    # ---- per-generation VMEM budget -> row-tile height ----------------------------------
    try:
        vmem_cap = int(pltpu.get_tpu_info().vmem_capacity_bytes)
    except Exception:
        vmem_cap = 64 * 1024 * 1024                     # conservative (v7x-sized) fallback
    vmem_limit = min(vmem_cap * 3 // 4, 100 * 1024 * 1024)
    w_bytes = 4 * (4 * cin_p) * cout_p * 2
    tile_budget = max(vmem_limit - 2 * w_bytes - 2 * 1024 * 1024, 2 * 1024 * 1024)
    # TODO(synk): for very large Cin*Cout the folded weights (double-buffered) should be
    # K/Cout-tiled via an extra grid axis instead of held whole in VMEM.
    TH = _choose_tile_rows(H, W, cin_p, cout_p, tile_budget)
    nH = pl.cdiv(H, TH)
    H_pad = nH * TH

    # ---- weights: sub-pixel 2x2-per-parity fold + BN-scale fold, tap-major K ------------
    inv_std = 1.0 / jnp.sqrt(run_var.astype(jnp.float32) + eps)
    scale = gamma.astype(jnp.float32) * inv_std                                  # (Cout,)
    shift = beta.astype(jnp.float32) + scale * (
        bias.astype(jnp.float32) - run_mean.astype(jnp.float32))                 # (Cout,)
    w_hwio = jnp.transpose(weight.astype(jnp.float32), (2, 3, 1, 0))             # (3,3,Cin,Cout)
    w_hwio = w_hwio * scale[None, None, None, :]                                 # fold BN scale
    # R[a, r, k]: which 3x3 row-tap k lands on 2x2 window row r for output row-parity a.
    R = jnp.array([[[1., 0., 0.], [0., 1., 1.]],
                   [[1., 1., 0.], [0., 0., 1.]]], jnp.float32)                   # (2,2,3)
    w_sub = jnp.einsum("ark,bsl,klio->abrsio", R, R, w_hwio)                     # (2,2,2,2,Cin,Cout)
    w_sub = jnp.pad(w_sub, ((0, 0),) * 4 + ((0, cin_p - Cin), (0, cout_p - Cout)))
    w_fold = w_sub.reshape(4, 4 * cin_p, cout_p).astype(jnp.bfloat16)            # (parity, K, Cp)
    shift_p = jnp.pad(shift, (0, cout_p - Cout)).reshape(1, cout_p)              # f32

    # ---- input: NCHW -> NHWC, bf16, conv halo + channel pad, overlapping row tiles -------
    x = jnp.transpose(x_nchw, (0, 2, 3, 1)).astype(jnp.bfloat16)                 # (N,H,W,Cin)
    x = jnp.pad(x, ((0, 0), (1, 1 + H_pad - H), (1, 1), (0, cin_p - Cin)))       # (N,H_pad+2,W+2,cin_p)
    # Halo'd row tiles, materialized in the same re-layout pass as the transpose above
    # (~(TH+2)/TH extra input bytes -- original resolution only, never the 4x upsample).
    # TODO(synk): express the 2-row halo directly in the BlockSpec (pl.Element) or with a
    # manual double-buffered DMA to remove even this small re-materialization.
    x_tiles = jnp.stack([x[:, t * TH: t * TH + TH + 2] for t in range(nH)], axis=1)
    # (N, nH, TH+2, W+2, cin_p)

    # ---- fused (4-parity 2x2 conv) + shift + ReLU Pallas kernel ---------------------------
    out = pl.pallas_call(
        _upconv_kernel,
        out_shape=jax.ShapeDtypeStruct((N, 4, H_pad, W, cout_p), jnp.float32),
        grid_spec=pltpu.PrefetchScalarGridSpec(
            num_scalar_prefetch=0,
            grid=(N, nH),
            in_specs=[
                pl.BlockSpec((None, None, TH + 2, W + 2, cin_p),
                             lambda n, h: (n, h, 0, 0, 0)),
                pl.BlockSpec((4, 4 * cin_p, cout_p), lambda n, h: (0, 0, 0)),
                pl.BlockSpec((1, cout_p), lambda n, h: (0, 0)),
            ],
            out_specs=pl.BlockSpec((None, 4, TH, W, cout_p),
                                   lambda n, h: (n, 0, h, 0, 0)),
        ),
        compiler_params=pltpu.CompilerParams(
            dimension_semantics=("parallel", "parallel"),
            vmem_limit_bytes=int(vmem_limit),
        ),
    )(x_tiles, w_fold, shift_p)

    # ---- parity planes -> interleaved pixels, merged into the NCHW transpose -------------
    out = out[:, :, :H, :, :Cout]                         # (N, 4, H, W, Cout)
    out = out.reshape(N, 2, 2, H, W, Cout)                # (n, a, b, i, j, c)
    out = jnp.transpose(out, (0, 5, 3, 1, 4, 2))          # (n, c, i, a, j, b)
    return out.reshape(N, Cout, 2 * H, 2 * W)


def _reference(x_nchw, weight, bias, gamma, beta, run_mean, run_var, eps=1e-5):
    """Pure-JAX f32 reference with the exact module semantics."""
    x = jnp.repeat(jnp.repeat(x_nchw, 2, axis=2), 2, axis=3)
    y = jax.lax.conv_general_dilated(
        x, weight, window_strides=(1, 1), padding=((1, 1), (1, 1)),
        dimension_numbers=("NCHW", "OIHW", "NCHW"))
    y = y + bias.reshape(1, -1, 1, 1)
    inv_std = 1.0 / jnp.sqrt(run_var + eps)
    y = (y - run_mean.reshape(1, -1, 1, 1)) * (gamma * inv_std).reshape(1, -1, 1, 1) \
        + beta.reshape(1, -1, 1, 1)
    return jnp.maximum(y, 0.0)


if __name__ == "__main__":
    key = jax.random.PRNGKey(0)
    k_x, k_w, k_b, k_g, k_be, k_m, k_v = jax.random.split(key, 7)

    N, Cin, Cout, H, W = 2, 4, 8, 16, 16

    x = jax.random.normal(k_x, (N, Cin, H, W), jnp.float32)
    weight = jax.random.normal(k_w, (Cout, Cin, 3, 3), jnp.float32) * 0.2
    bias = jax.random.normal(k_b, (Cout,), jnp.float32) * 0.1
    gamma = jax.random.uniform(k_g, (Cout,), jnp.float32, 0.5, 1.5)
    beta = jax.random.normal(k_be, (Cout,), jnp.float32) * 0.1
    run_mean = jax.random.normal(k_m, (Cout,), jnp.float32) * 0.1
    run_var = jax.random.uniform(k_v, (Cout,), jnp.float32, 0.5, 1.5)

    out = jax.block_until_ready(
        jax.jit(up_conv_forward)(x, weight, bias, gamma, beta, run_mean, run_var))
    ref = _reference(x, weight, bias, gamma, beta, run_mean, run_var)

    assert out.shape == (N, Cout, 2 * H, 2 * W), out.shape
    # Tolerance sized for bf16 conv inputs/weights with f32 accumulation.
    assert jnp.allclose(out, ref, atol=5e-2, rtol=5e-2), float(jnp.max(jnp.abs(out - ref)))

    print("KERNEL_OK")
</pallas_src>

<mosaic_0001>
module attributes {stable_mosaic.version = 11 : i64} {
  func.func @_upconv_kernel(%arg0: i32, %arg1: i32, %arg2: memref<1x1x18x18x128xbf16, #tpu.memory_space<vmem>>, %arg3: memref<4x512x128xbf16, #tpu.memory_space<vmem>>, %arg4: memref<1x128xf32, #tpu.memory_space<vmem>>, %arg5: memref<1x4x16x16x128xf32, #tpu.memory_space<vmem>>) attributes {dimension_semantics = [#tpu.dimension_semantics<parallel>, #tpu.dimension_semantics<parallel>], iteration_bounds = array<i64: 2, 1>, scalar_prefetch = 0 : i64, scratch_operands = 0 : i64, tpu.core_type = #tpu.core_type<tc>, window_params = [{transform_indices = @transform_0, window_bounds = array<i64: 1, 1, 18, 18, 128>}, {pipeline_mode = #tpu.pipeline_mode<synchronous>, transform_indices = @transform_1, window_bounds = array<i64: 4, 512, 128>}, {pipeline_mode = #tpu.pipeline_mode<synchronous>, transform_indices = @transform_2, window_bounds = array<i64: 1, 128>}, {transform_indices = @transform_3, window_bounds = array<i64: 1, 4, 16, 16, 128>}]} {
    %c0 = arith.constant 0 : index
    %c0_0 = arith.constant 0 : index
    %0 = vector.load %arg4[%c0, %c0_0] : memref<1x128xf32, #tpu.memory_space<vmem>>, vector<1x128xf32>
    %c0_1 = arith.constant 0 : index
    %c0_2 = arith.constant 0 : index
    %c0_3 = arith.constant 0 : index
    %c0_4 = arith.constant 0 : index
    %c0_5 = arith.constant 0 : index
    %1 = vector.load %arg2[%c0_1, %c0_2, %c0_3, %c0_4, %c0_5] : memref<1x1x18x18x128xbf16, #tpu.memory_space<vmem>>, vector<1x1x16x16x128xbf16>
    %2 = vector.shape_cast %1 : vector<1x1x16x16x128xbf16> to vector<16x16x128xbf16>
    %c0_6 = arith.constant 0 : index
    %c0_7 = arith.constant 0 : index
    %c0_8 = arith.constant 0 : index
    %c1 = arith.constant 1 : index
    %c0_9 = arith.constant 0 : index
    %3 = vector.load %arg2[%c0_6, %c0_7, %c0_8, %c1, %c0_9] : memref<1x1x18x18x128xbf16, #tpu.memory_space<vmem>>, vector<1x1x16x16x128xbf16>
    %4 = vector.shape_cast %3 : vector<1x1x16x16x128xbf16> to vector<16x16x128xbf16>
    %c0_10 = arith.constant 0 : index
    %c0_11 = arith.constant 0 : index
    %c1_12 = arith.constant 1 : index
    %c0_13 = arith.constant 0 : index
    %c0_14 = arith.constant 0 : index
    %5 = vector.load %arg2[%c0_10, %c0_11, %c1_12, %c0_13, %c0_14] : memref<1x1x18x18x128xbf16, #tpu.memory_space<vmem>>, vector<1x1x16x16x128xbf16>
    %6 = vector.shape_cast %5 : vector<1x1x16x16x128xbf16> to vector<16x16x128xbf16>
    %c0_15 = arith.constant 0 : index
    %c0_16 = arith.constant 0 : index
    %c1_17 = arith.constant 1 : index
    %c1_18 = arith.constant 1 : index
    %c0_19 = arith.constant 0 : index
    %7 = vector.load %arg2[%c0_15, %c0_16, %c1_17, %c1_18, %c0_19] : memref<1x1x18x18x128xbf16, #tpu.memory_space<vmem>>, vector<1x1x16x16x128xbf16>
    %8 = vector.shape_cast %7 : vector<1x1x16x16x128xbf16> to vector<16x16x128xbf16>
    %9 = tpu.concatenate %2, %4, %6, %8 in 2 : vector<16x16x128xbf16>, vector<16x16x128xbf16>, vector<16x16x128xbf16>, vector<16x16x128xbf16> -> vector<16x16x512xbf16>
    %10 = vector.shape_cast %9 : vector<16x16x512xbf16> to vector<256x512xbf16>
    %c0_20 = arith.constant 0 : index
    %c0_21 = arith.constant 0 : index
    %c0_22 = arith.constant 0 : index
    %11 = vector.load %arg3[%c0_20, %c0_21, %c0_22] : memref<4x512x128xbf16, #tpu.memory_space<vmem>>, vector<1x512x128xbf16>
    %12 = vector.shape_cast %11 : vector<1x512x128xbf16> to vector<512x128xbf16>
    %cst = arith.constant dense<0.000000e+00> : vector<256x128xf32>
    %13 = tpu.matmul %10, %12, %cst {dimension_numbers = #tpu.dot_dimension_numbers<[1], [0], [0], [1], [0, 0, 1, 1], [], []>} : vector<256x512xbf16>, vector<512x128xbf16>, vector<256x128xf32> -> vector<256x128xf32>
    %14 = vector.broadcast %0 : vector<1x128xf32> to vector<256x128xf32>
    %15 = arith.addf %13, %14 : vector<256x128xf32>
    %cst_23 = arith.constant 0.000000e+00 : f32
    %16 = vector.broadcast %cst_23 : f32 to vector<256x128xf32>
    %17 = arith.maximumf %15, %16 : vector<256x128xf32>
    %18 = vector.shape_cast %17 : vector<256x128xf32> to vector<16x16x128xf32>
    %c0_24 = arith.constant 0 : index
    %c0_25 = arith.constant 0 : index
    %c0_26 = arith.constant 0 : index
    %c0_27 = arith.constant 0 : index
    %c0_28 = arith.constant 0 : index
    %19 = vector.load %arg5[%c0_24, %c0_25, %c0_26, %c0_27, %c0_28] : memref<1x4x16x16x128xf32, #tpu.memory_space<vmem>>, vector<1x1x16x16x128xf32>
    %20 = vector.shape_cast %19 : vector<1x1x16x16x128xf32> to vector<16x16x128xf32>
    %21 = vector.shape_cast %18 : vector<16x16x128xf32> to vector<1x1x16x16x128xf32>
    tpu.vector_store %arg5[%c0_24, %c0_25, %c0_26, %c0_27, %c0_28], %21 {strides = array<i32>} : memref<1x4x16x16x128xf32, #tpu.memory_space<vmem>>, vector<1x1x16x16x128xf32>,
    %c0_29 = arith.constant 0 : index
    %c0_30 = arith.constant 0 : index
    %c0_31 = arith.constant 0 : index
    %c1_32 = arith.constant 1 : index
    %c0_33 = arith.constant 0 : index
    %22 = vector.load %arg2[%c0_29, %c0_30, %c0_31, %c1_32, %c0_33] : memref<1x1x18x18x128xbf16, #tpu.memory_space<vmem>>, vector<1x1x16x16x128xbf16>
    %23 = vector.shape_cast %22 : vector<1x1x16x16x128xbf16> to vector<16x16x128xbf16>
    %c0_34 = arith.constant 0 : index
    %c0_35 = arith.constant 0 : index
    %c0_36 = arith.constant 0 : index
    %c2 = arith.constant 2 : index
    %c0_37 = arith.constant 0 : index
    %24 = vector.load %arg2[%c0_34, %c0_35, %c0_36, %c2, %c0_37] : memref<1x1x18x18x128xbf16, #tpu.memory_space<vmem>>, vector<1x1x16x16x128xbf16>
    %25 = vector.shape_cast %24 : vector<1x1x16x16x128xbf16> to vector<16x16x128xbf16>
    %c0_38 = arith.constant 0 : index
    %c0_39 = arith.constant 0 : index
    %c1_40 = arith.constant 1 : index
    %c1_41 = arith.constant 1 : index
    %c0_42 = arith.constant 0 : index
    %26 = vector.load %arg2[%c0_38, %c0_39, %c1_40, %c1_41, %c0_42] : memref<1x1x18x18x128xbf16, #tpu.memory_space<vmem>>, vector<1x1x16x16x128xbf16>
    %27 = vector.shape_cast %26 : vector<1x1x16x16x128xbf16> to vector<16x16x128xbf16>
    %c0_43 = arith.constant 0 : index
    %c0_44 = arith.constant 0 : index
    %c1_45 = arith.constant 1 : index
    %c2_46 = arith.constant 2 : index
    %c0_47 = arith.constant 0 : index
    %28 = vector.load %arg2[%c0_43, %c0_44, %c1_45, %c2_46, %c0_47] : memref<1x1x18x18x128xbf16, #tpu.memory_space<vmem>>, vector<1x1x16x16x128xbf16>
    %29 = vector.shape_cast %28 : vector<1x1x16x16x128xbf16> to vector<16x16x128xbf16>
    %30 = tpu.concatenate %23, %25, %27, %29 in 2 : vector<16x16x128xbf16>, vector<16x16x128xbf16>, vector<16x16x128xbf16>, vector<16x16x128xbf16> -> vector<16x16x512xbf16>
    %31 = vector.shape_cast %30 : vector<16x16x512xbf16> to vector<256x512xbf16>
    %c1_48 = arith.constant 1 : index
    %c0_49 = arith.constant 0 : index
    %c0_50 = arith.constant 0 : index
    %32 = vector.load %arg3[%c1_48, %c0_49, %c0_50] : memref<4x512x128xbf16, #tpu.memory_space<vmem>>, vector<1x512x128xbf16>
    %33 = vector.shape_cast %32 : vector<1x512x128xbf16> to vector<512x128xbf16>
    %cst_51 = arith.constant dense<0.000000e+00> : vector<256x128xf32>
    %34 = tpu.matmul %31, %33, %cst_51 {dimension_numbers = #tpu.dot_dimension_numbers<[1], [0], [0], [1], [0, 0, 1, 1], [], []>} : vector<256x512xbf16>, vector<512x128xbf16>, vector<256x128xf32> -> vector<256x128xf32>
    %35 = vector.broadcast %0 : vector<1x128xf32> to vector<256x128xf32>
    %36 = arith.addf %34, %35 : vector<256x128xf32>
    %cst_52 = arith.constant 0.000000e+00 : f32
    %37 = vector.broadcast %cst_52 : f32 to vector<256x128xf32>
    %38 = arith.maximumf %36, %37 : vector<256x128xf32>
    %39 = vector.shape_cast %38 : vector<256x128xf32> to vector<16x16x128xf32>
    %c0_53 = arith.constant 0 : index
    %c1_54 = arith.constant 1 : index
    %c0_55 = arith.constant 0 : index
    %c0_56 = arith.constant 0 : index
    %c0_57 = arith.constant 0 : index
    %40 = vector.load %arg5[%c0_53, %c1_54, %c0_55, %c0_56, %c0_57] : memref<1x4x16x16x128xf32, #tpu.memory_space<vmem>>, vector<1x1x16x16x128xf32>
    %41 = vector.shape_cast %40 : vector<1x1x16x16x128xf32> to vector<16x16x128xf32>
    %42 = vector.shape_cast %39 : vector<16x16x128xf32> to vector<1x1x16x16x128xf32>
    tpu.vector_store %arg5[%c0_53, %c1_54, %c0_55, %c0_56, %c0_57], %42 {strides = array<i32>} : memref<1x4x16x16x128xf32, #tpu.memory_space<vmem>>, vector<1x1x16x16x128xf32>,
    %c0_58 = arith.constant 0 : index
    %c0_59 = arith.constant 0 : index
    %c1_60 = arith.constant 1 : index
    %c0_61 = arith.constant 0 : index
    %c0_62 = arith.constant 0 : index
    %43 = vector.load %arg2[%c0_58, %c0_59, %c1_60, %c0_61, %c0_62] : memref<1x1x18x18x128xbf16, #tpu.memory_space<vmem>>, vector<1x1x16x16x128xbf16>
    %44 = vector.shape_cast %43 : vector<1x1x16x16x128xbf16> to vector<16x16x128xbf16>
    %c0_63 = arith.constant 0 : index
    %c0_64 = arith.constant 0 : index
    %c1_65 = arith.constant 1 : index
    %c1_66 = arith.constant 1 : index
    %c0_67 = arith.constant 0 : index
    %45 = vector.load %arg2[%c0_63, %c0_64, %c1_65, %c1_66, %c0_67] : memref<1x1x18x18x128xbf16, #tpu.memory_space<vmem>>, vector<1x1x16x16x128xbf16>
    %46 = vector.shape_cast %45 : vector<1x1x16x16x128xbf16> to vector<16x16x128xbf16>
    %c0_68 = arith.constant 0 : index
    %c0_69 = arith.constant 0 : index
    %c2_70 = arith.constant 2 : index
    %c0_71 = arith.constant 0 : index
    %c0_72 = arith.constant 0 : index
    %47 = vector.load %arg2[%c0_68, %c0_69, %c2_70, %c0_71, %c0_72] : memref<1x1x18x18x128xbf16, #tpu.memory_space<vmem>>, vector<1x1x16x16x128xbf16>
    %48 = vector.shape_cast %47 : vector<1x1x16x16x128xbf16> to vector<16x16x128xbf16>
    %c0_73 = arith.constant 0 : index
    %c0_74 = arith.constant 0 : index
    %c2_75 = arith.constant 2 : index
    %c1_76 = arith.constant 1 : index
    %c0_77 = arith.constant 0 : index
    %49 = vector.load %arg2[%c0_73, %c0_74, %c2_75, %c1_76, %c0_77] : memref<1x1x18x18x128xbf16, #tpu.memory_space<vmem>>, vector<1x1x16x16x128xbf16>
    %50 = vector.shape_cast %49 : vector<1x1x16x16x128xbf16> to vector<16x16x128xbf16>
    %51 = tpu.concatenate %44, %46, %48, %50 in 2 : vector<16x16x128xbf16>, vector<16x16x128xbf16>, vector<16x16x128xbf16>, vector<16x16x128xbf16> -> vector<16x16x512xbf16>
    %52 = vector.shape_cast %51 : vector<16x16x512xbf16> to vector<256x512xbf16>
    %c2_78 = arith.constant 2 : index
    %c0_79 = arith.constant 0 : index
    %c0_80 = arith.constant 0 : index
    %53 = vector.load %arg3[%c2_78, %c0_79, %c0_80] : memref<4x512x128xbf16, #tpu.memory_space<vmem>>, vector<1x512x128xbf16>
    %54 = vector.shape_cast %53 : vector<1x512x128xbf16> to vector<512x128xbf16>
    %cst_81 = arith.constant dense<0.000000e+00> : vector<256x128xf32>
    %55 = tpu.matmul %52, %54, %cst_81 {dimension_numbers = #tpu.dot_dimension_numbers<[1], [0], [0], [1], [0, 0, 1, 1], [], []>} : vector<256x512xbf16>, vector<512x128xbf16>, vector<256x128xf32> -> vector<256x128xf32>
    %56 = vector.broadcast %0 : vector<1x128xf32> to vector<256x128xf32>
    %57 = arith.addf %55, %56 : vector<256x128xf32>
    %cst_82 = arith.constant 0.000000e+00 : f32
    %58 = vector.broadcast %cst_82 : f32 to vector<256x128xf32>
    %59 = arith.maximumf %57, %58 : vector<256x128xf32>
    %60 = vector.shape_cast %59 : vector<256x128xf32> to vector<16x16x128xf32>
    %c0_83 = arith.constant 0 : index
    %c2_84 = arith.constant 2 : index
    %c0_85 = arith.constant 0 : index
    %c0_86 = arith.constant 0 : index
    %c0_87 = arith.constant 0 : index
    %61 = vector.load %arg5[%c0_83, %c2_84, %c0_85, %c0_86, %c0_87] : memref<1x4x16x16x128xf32, #tpu.memory_space<vmem>>, vector<1x1x16x16x128xf32>
    %62 = vector.shape_cast %61 : vector<1x1x16x16x128xf32> to vector<16x16x128xf32>
    %63 = vector.shape_cast %60 : vector<16x16x128xf32> to vector<1x1x16x16x128xf32>
    tpu.vector_store %arg5[%c0_83, %c2_84, %c0_85, %c0_86, %c0_87], %63 {strides = array<i32>} : memref<1x4x16x16x128xf32, #tpu.memory_space<vmem>>, vector<1x1x16x16x128xf32>,
    %c0_88 = arith.constant 0 : index
    %c0_89 = arith.constant 0 : index
    %c1_90 = arith.constant 1 : index
    %c1_91 = arith.constant 1 : index
    %c0_92 = arith.constant 0 : index
    %64 = vector.load %arg2[%c0_88, %c0_89, %c1_90, %c1_91, %c0_92] : memref<1x1x18x18x128xbf16, #tpu.memory_space<vmem>>, vector<1x1x16x16x128xbf16>
    %65 = vector.shape_cast %64 : vector<1x1x16x16x128xbf16> to vector<16x16x128xbf16>
    %c0_93 = arith.constant 0 : index
    %c0_94 = arith.constant 0 : index
    %c1_95 = arith.constant 1 : index
    %c2_96 = arith.constant 2 : index
    %c0_97 = arith.constant 0 : index
    %66 = vector.load %arg2[%c0_93, %c0_94, %c1_95, %c2_96, %c0_97] : memref<1x1x18x18x128xbf16, #tpu.memory_space<vmem>>, vector<1x1x16x16x128xbf16>
    %67 = vector.shape_cast %66 : vector<1x1x16x16x128xbf16> to vector<16x16x128xbf16>
    %c0_98 = arith.constant 0 : index
    %c0_99 = arith.constant 0 : index
    %c2_100 = arith.constant 2 : index
    %c1_101 = arith.constant 1 : index
    %c0_102 = arith.constant 0 : index
    %68 = vector.load %arg2[%c0_98, %c0_99, %c2_100, %c1_101, %c0_102] : memref<1x1x18x18x128xbf16, #tpu.memory_space<vmem>>, vector<1x1x16x16x128xbf16>
    %69 = vector.shape_cast %68 : vector<1x1x16x16x128xbf16> to vector<16x16x128xbf16>
    %c0_103 = arith.constant 0 : index
    %c0_104 = arith.constant 0 : index
    %c2_105 = arith.constant 2 : index
    %c2_106 = arith.constant 2 : index
    %c0_107 = arith.constant 0 : index
    %70 = vector.load %arg2[%c0_103, %c0_104, %c2_105, %c2_106, %c0_107] : memref<1x1x18x18x128xbf16, #tpu.memory_space<vmem>>, vector<1x1x16x16x128xbf16>
    %71 = vector.shape_cast %70 : vector<1x1x16x16x128xbf16> to vector<16x16x128xbf16>
    %72 = tpu.concatenate %65, %67, %69, %71 in 2 : vector<16x16x128xbf16>, vector<16x16x128xbf16>, vector<16x16x128xbf16>, vector<16x16x128xbf16> -> vector<16x16x512xbf16>
    %73 = vector.shape_cast %72 : vector<16x16x512xbf16> to vector<256x512xbf16>
    %c3 = arith.constant 3 : index
    %c0_108 = arith.constant 0 : index
    %c0_109 = arith.constant 0 : index
    %74 = vector.load %arg3[%c3, %c0_108, %c0_109] : memref<4x512x128xbf16, #tpu.memory_space<vmem>>, vector<1x512x128xbf16>
    %75 = vector.shape_cast %74 : vector<1x512x128xbf16> to vector<512x128xbf16>
    %cst_110 = arith.constant dense<0.000000e+00> : vector<256x128xf32>
    %76 = tpu.matmul %73, %75, %cst_110 {dimension_numbers = #tpu.dot_dimension_numbers<[1], [0], [0], [1], [0, 0, 1, 1], [], []>} : vector<256x512xbf16>, vector<512x128xbf16>, vector<256x128xf32> -> vector<256x128xf32>
    %77 = vector.broadcast %0 : vector<1x128xf32> to vector<256x128xf32>
    %78 = arith.addf %76, %77 : vector<256x128xf32>
    %cst_111 = arith.constant 0.000000e+00 : f32
    %79 = vector.broadcast %cst_111 : f32 to vector<256x128xf32>
    %80 = arith.maximumf %78, %79 : vector<256x128xf32>
    %81 = vector.shape_cast %80 : vector<256x128xf32> to vector<16x16x128xf32>
    %c0_112 = arith.constant 0 : index
    %c3_113 = arith.constant 3 : index
    %c0_114 = arith.constant 0 : index
    %c0_115 = arith.constant 0 : index
    %c0_116 = arith.constant 0 : index
    %82 = vector.load %arg5[%c0_112, %c3_113, %c0_114, %c0_115, %c0_116] : memref<1x4x16x16x128xf32, #tpu.memory_space<vmem>>, vector<1x1x16x16x128xf32>
    %83 = vector.shape_cast %82 : vector<1x1x16x16x128xf32> to vector<16x16x128xf32>
    %84 = vector.shape_cast %81 : vector<16x16x128xf32> to vector<1x1x16x16x128xf32>
    tpu.vector_store %arg5[%c0_112, %c3_113, %c0_114, %c0_115, %c0_116], %84 {strides = array<i32>} : memref<1x4x16x16x128xf32, #tpu.memory_space<vmem>>, vector<1x1x16x16x128xf32>,
    return
  }
  func.func @transform_0(%arg0: i32, %arg1: i32) -> (i32, i32, i32, i32, i32) {
    %c0_i32 = arith.constant 0 : i32
    %c0_i32_0 = arith.constant 0 : i32
    %c0_i32_1 = arith.constant 0 : i32
    %c0_i32_2 = arith.constant 0 : i32
    return %arg0, %arg1, %c0_i32, %c0_i32_0, %c0_i32_1 : i32, i32, i32, i32, i32
  }
  func.func @transform_1(%arg0: i32, %arg1: i32) -> (i32, i32, i32) {
    %c0_i32 = arith.constant 0 : i32
    %c0_i32_0 = arith.constant 0 : i32
    %c0_i32_1 = arith.constant 0 : i32
    %c0_i32_2 = arith.constant 0 : i32
    return %c0_i32, %c0_i32_0, %c0_i32_1 : i32, i32, i32
  }
  func.func @transform_2(%arg0: i32, %arg1: i32) -> (i32, i32) {
    %c0_i32 = arith.constant 0 : i32
    %c0_i32_0 = arith.constant 0 : i32
    %c0_i32_1 = arith.constant 0 : i32
    return %c0_i32, %c0_i32_0 : i32, i32
  }
  func.func @transform_3(%arg0: i32, %arg1: i32) -> (i32, i32, i32, i32, i32) {
    %c0_i32 = arith.constant 0 : i32
    %c0_i32_0 = arith.constant 0 : i32
    %c0_i32_1 = arith.constant 0 : i32
    %c0_i32_2 = arith.constant 0 : i32
    return %arg0, %c0_i32, %arg1, %c0_i32_0, %c0_i32_1 : i32, i32, i32, i32, i32
  }
}

</mosaic_0001>

<bundles_post_ra>
// kernel: up_conv_forward.1
= control target key start
LH: loop header
LB: loop body
LE: loop exit
PB: predicated region body
PF: predicated region fallthrough
CT: control target
= control target key end

     0   :  { %s9910_s12 = smov 0   ;;  %s9912_s13 = smov 0   ;;  %s12086_s0 = inlined_call_operand.vmem [shape: bf16[2,1,18,18,128], index: 0, kind: input, shape index: {}]   ;;  %s12087_s1 = inlined_call_operand.vmem [shape: bf16[4,512,128], index: 1, kind: input, shape index: {}]   ;;  %s12088_s2 = inlined_call_operand.vmem [shape: f32[1,128], index: 2, kind: input, shape index: {}]   ;;  %s12089_s3 = inlined_call_operand.vmem [shape: f32[2,4,16,16,128], index: 3, kind: output, shape index: {}]  }
   0x1   :  { %s9914_s14 = smov 0  }
   0x2 LB: > { %s25_s15 = sadd.s32 1, %s9884_s13  ;;  %p7891_p0 = scmp.ge.s32.totalorder %s9888_s14, 1  ;;  %s9888_s14 = sphi %s9914_s14, %s13_s14   ;;  %s9884_s13 = sphi %s9912_s13, %s12091_s13   ;;  %s9880_s12 = sphi %s9910_s12, %s12090_s12  }
   0x3   : > { %p27_p1 = scmp.ge.s32.totalorder %s25_s15, 2  ;;  %p157_p2 = scmp.lt.s32.totalorder %s9888_s14, 3 }
   0x5   : > { %s12093_s15 = smov (%p27_p1, %s25_s15), 0  ;;  %p158_p3 = pnand %p7891_p0, %p157_p2 }
   0x6   : > { %p190_p4 = scmp.lt.s32.totalorder (!%p158_p3), %s9880_s12, 1 }
   0x7   : > { %161 = sbr.rel (%p158_p3) target bundleno = 1201 (0x4b1), region = 32 }
   0xc   : > { %v9329_v0 = vld [vmem:[%s12087_s1 + $0x38] sm:$0xff]  ;;  %v9328_v4 = vld [vmem:[%s12087_s1 + $0x30] sm:$0xff]  ;;  %s12095_s12 = smov (!%p190_p4, %s9880_s12), 1  ;;  %v9327_v8 = vld [vmem:[%s12087_s1 + $0x28] sm:$0xff]  ;;  %vm452_vm0 = vsmask.f32 7424 }
   0xd   : > { %v9337_v1 = vld [vmem:[%s12087_s1 + $0x78] sm:$0xff]  ;;  %1272 = vmatpush.bf16.msra.mxu0 %v9329_v0  ;;  %v9336_v5 = vld [vmem:[%s12087_s1 + $0x70] sm:$0xff]  ;;  %s9737_s5 = smul.u32 216, %s12095_s12  ;;  %v9335_v9 = vld [vmem:[%s12087_s1 + $0x68] sm:$0xff]  ;;  %s9289_s21 = sshll.u32 %s12095_s12, 10 }
   0xe   : > { %v9345_v2 = vld [vmem:[%s12087_s1 + $0xb8] sm:$0xff]  ;;  %1361 = vmatpush.bf16.msra.mxu1 %v9337_v1  ;;  %v9344_v6 = vld [vmem:[%s12087_s1 + $0xb0] sm:$0xff]  ;;  %v9343_v10 = vld [vmem:[%s12087_s1 + $0xa8] sm:$0xff]  ;;  %s10175_s12 = scalar_lea.vmem %s12089_s3, %s9289_s21 }
   0xf   : > { %v9353_v3 = vld [vmem:[%s12087_s1 + $0xf8] sm:$0xff]  ;;  %1450 = vmatpush.bf16.msra.mxu2 %v9345_v2  ;;  %v9352_v7 = vld [vmem:[%s12087_s1 + $0xf0] sm:$0xff]  ;;  %v9351_v11 = vld [vmem:[%s12087_s1 + $0xe8] sm:$0xff]  ;;  %s9970_s20 = scalar_lea.vmem %s12086_s0, %s9737_s5 }
  0x10   : > { %1539 = vmatpush.bf16.msra.mxu3 %v9353_v3  ;;  %v9326_v12 = vld [vmem:[%s12087_s1 + $0x20] sm:$0xff]  ;;  %v243_v16 = vld [vmem:[%s9970_s20 + $0x8] sm:$0x1]  ;;  %v7927_v17 = vld [vmem:[%s9970_s20 + $0x14] sm:$0x1] }
  0x11   : > { %1273 = vmatpush.bf16.msra.mxu0 %v9328_v4  ;;  %v9334_v13 = vld [vmem:[%s12087_s1 + $0x60] sm:$0xff]  ;;  %v9325_v18 = vld [vmem:[%s12087_s1 + $0x18] sm:$0xff]  ;;  %v420_v21 = vunpack.c.l.b16 %v243_v16  ;;  %v9306_v24 = vld [vmem:[%s9970_s20 + $0xc] sm:$0xff]  ;;  %v773_v25 = vunpack.c.l.b16 %v7927_v17 }
  0x12   : > { %1362 = vmatpush.bf16.msra.mxu1 %v9336_v5  ;;  %v9342_v14 = vld [vmem:[%s12087_s1 + $0xa0] sm:$0xff]  ;;  %v9333_v19 = vld [vmem:[%s12087_s1 + $0x58] sm:$0xff]  ;;  %v9324_v26 = vld [vmem:[%s12087_s1 + $0x10] sm:$0xff]  ;;  %v808_v33 = vshll.u32 %v9306_v24, 16  ;;  %v806_v41 = vshrl.u32 %v9306_v24, 16 }
  0x13   : > { %1451 = vmatpush.bf16.msra.mxu2 %v9344_v6  ;;  %v9350_v15 = vld [vmem:[%s12087_s1 + $0xe0] sm:$0xff]  ;;  %v9341_v22 = vld [vmem:[%s12087_s1 + $0x98] sm:$0xff]  ;;  %v9332_v27 = vld [vmem:[%s12087_s1 + $0x50] sm:$0xff]  ;;  %v436_v28 = vpack.c.b16 %v420_v21, %v420_v21  ;;  %v789_v32 = vpack.c.b16 %v773_v25, %v773_v25 }
  0x14   : > { %1540 = vmatpush.bf16.msra.mxu3 %v9352_v7  ;;  %v9993_v20 = vld [vmem:[%s9970_s20] sm:$0xff]  ;;  %v9349_v23 = vld [vmem:[%s12087_s1 + $0xd8] sm:$0xff]  ;;  %v9340_v30 = vld [vmem:[%s12087_s1 + $0x90] sm:$0xff]  ;;  %v810_v42 = vrot.slane %v808_v33, 1 }
  0x15   : > { %1274 = vmatpush.bf16.msra.mxu0 %v9327_v8  ;;  %v456_v29 = vshll.u32 %v9993_v20, 16  ;;  %v9348_v31 = vld [vmem:[%s12087_s1 + $0xd0] sm:$0xff]  ;;  %v9323_v34 = vld [vmem:[%s12087_s1 + $0x8] sm:$0xff]  ;;  %v454_v36 = vshrl.u32 %v9993_v20, 16  ;;  %v461_v38 = vshll.u32 %v436_v28, 16  ;;  %v813_v43 = vshll.u32 %v789_v32, 16 }
  0x16   : > { %1363 = vmatpush.bf16.msra.mxu1 %v9335_v9  ;;  %v9331_v35 = vld [vmem:[%s12087_s1 + $0x48] sm:$0xff]  ;;  %v9322_v44 = vld [vmem:[%s12087_s1] sm:$0xff]  ;;  %v811_v50 = vor.u32 %v810_v42, %v806_v41  ;;  %v244_v52 = vld [vmem:[%s9970_s20 + $0x14] sm:$0x1] }
  0x17   : > { %1452 = vmatpush.bf16.msra.mxu2 %v9343_v10  ;;  %v458_v37 = vrot.slane %v456_v29, 1  ;;  %v9339_v39 = vld [vmem:[%s12087_s1 + $0x88] sm:$0xff]  ;;  %v9330_v45 = vld [vmem:[%s12087_s1 + $0x40] sm:$0xff]  ;;  %v463_v47 = vrot.slane %v461_v38, 1  ;;  %v815_v51 = vrot.slane %v813_v43, 1  ;;  %v9377_v53 = vld [vmem:[%s12087_s1 + $0x1b8] sm:$0xff]  ;;  %v421_v58 = vunpack.c.l.b16 %v244_v52 }
  0x18   : > { %1541 = vmatpush.bf16.msra.mxu3 %v9351_v11  ;;  %v9347_v40 = vld [vmem:[%s12087_s1 + $0xc8] sm:$0xff]  ;;  %v9338_v48 = vld [vmem:[%s12087_s1 + $0x80] sm:$0xff]  ;;  %v9361_v54 = vld [vmem:[%s12087_s1 + $0x138] sm:$0xff] }
  0x19   : > { %1275 = vmatpush.bf16.msra.mxu0 %v9326_v12  ;;  %v459_v46 = vor.u32 %v458_v37, %v454_v36  ;;  %v9346_v49 = vld [vmem:[%s12087_s1 + $0xc0] sm:$0xff]  ;;  %v9291_v57 = vld [vmem:[%s9970_s20 + $0xc] sm:$0xff]  ;;  %v816_v59 = vsel %vm452_vm0, %v811_v50, %v815_v51  ;;  %v9385_v60 = vld [vmem:[%s12087_s1 + $0x1f8] sm:$0xff]  ;;  %v437_v0 = vpack.c.b16 %v421_v58, %v421_v58 }
  0x1a   : > { %1364 = vmatpush.bf16.msra.mxu1 %v9334_v13  ;;  %v7928_v55 = vld [vmem:[%s9970_s20 + $0x20] sm:$0x1]  ;;  %v9369_v61 = vld [vmem:[%s12087_s1 + $0x178] sm:$0xff]  ;;  %v468_v1 = vshll.u32 %v9291_v57, 16  ;;  %v9376_v2 = vld [vmem:[%s12087_s1 + $0x1b0] sm:$0xff]  ;;  %v466_v8 = vshrl.u32 %v9291_v57, 16 }
  0x1b   : > { %1453 = vmatpush.bf16.msra.mxu2 %v9342_v14  ;;  %v464_v56 = vsel %vm452_vm0, %v459_v46, %v463_v47  ;;  %v9307_v62 = vld [vmem:[%s9970_s20 + $0x18] sm:$0xff]  ;;  %v774_v63 = vunpack.c.l.b16 %v7928_v55  ;;  %v9360_v3 = vld [vmem:[%s12087_s1 + $0x130] sm:$0xff]  ;;  %v473_v10 = vshll.u32 %v437_v0, 16  ;;  %v9293_v43 = vld [vmem:[%s9970_s20 + $0x24] sm:$0xff] }
  0x1c   : > { %1542 = vmatpush.bf16.msra.mxu3 %v9350_v15  ;;  %v820_v5 = vshll.u32 %v9307_v62, 16  ;;  %v9384_v6 = vld [vmem:[%s12087_s1 + $0x1f0] sm:$0xff]  ;;  %v470_v9 = vrot.slane %v468_v1, 1  ;;  %v818_v11 = vshrl.u32 %v9307_v62, 16  ;;  %v9292_v21 = vld [vmem:[%s9970_s20 + $0x18] sm:$0xff]  ;;  %v9375_v50 = vld [vmem:[%s12087_s1 + $0x1a8] sm:$0xff] }
  0x1d   : > { %1276 = vmatpush.bf16.msra.mxu0 %v9325_v18  ;;  %v790_v4 = vpack.c.b16 %v774_v63, %v774_v63  ;;  %v9368_v7 = vld [vmem:[%s12087_s1 + $0x170] sm:$0xff]  ;;  %v475_v15 = vrot.slane %v473_v10, 1  ;;  %v245_v18 = vld [vmem:[%s9970_s20 + $0x20] sm:$0x1]  ;;  %v7930_v41 = vld [vmem:[%s9970_s20 + $0x38] sm:$0x1] }
  0x1e   : > { %1365 = vmatpush.bf16.msra.mxu1 %v9333_v19  ;;  %v822_v12 = vrot.slane %v820_v5, 1  ;;  %v471_v14 = vor.u32 %v470_v9, %v466_v8  ;;  %v7929_v19 = vld [vmem:[%s9970_s20 + $0x2c] sm:$0x1]  ;;  %v9309_v46 = vld [vmem:[%s9970_s20 + $0x30] sm:$0xff]  ;;  %v776_v47 = vunpack.c.l.b16 %v7930_v41  ;;  %v9310_v8 = vld [vmem:[%s9970_s20 + $0x3c] sm:$0xff] }
  0x1f   : > { %1454 = vmatpush.bf16.msra.mxu2 %v9341_v22  ;;  %v825_v13 = vshll.u32 %v790_v4, 16  ;;  %v422_v22 = vunpack.c.l.b16 %v245_v18  ;;  %v775_v25 = vunpack.c.l.b16 %v7929_v19  ;;  %v9359_v51 = vld [vmem:[%s12087_s1 + $0x128] sm:$0xff]  ;;  %v9294_v5 = vld [vmem:[%s9970_s20 + $0x30] sm:$0xff] }
  0x20   : > { %1543 = vmatpush.bf16.msra.mxu3 %v9349_v23  ;;  %v823_v16 = vor.u32 %v822_v12, %v818_v11  ;;  %v9383_v52 = vld [vmem:[%s12087_s1 + $0x1e8] sm:$0xff]  ;;  %v504_v11 = vshll.u32 %v9294_v5, 16 }
  0x21   : > { %1277 = vmatpush.bf16.msra.mxu0 %v9324_v26  ;;  %v827_v17 = vrot.slane %v825_v13, 1  ;;  %v438_v26 = vpack.c.b16 %v422_v22, %v422_v22  ;;  %v791_v28 = vpack.c.b16 %v775_v25, %v775_v25  ;;  %v9367_v55 = vld [vmem:[%s12087_s1 + $0x168] sm:$0xff]  ;;  %v856_v13 = vshll.u32 %v9310_v8, 16  ;;  %v7932_v25 = vld [vmem:[%s9970_s20 + $0x50] sm:$0x1] }
  0x22   : > { %1366 = vmatpush.bf16.msra.mxu1 %v9332_v27  ;;  %v480_v27 = vshll.u32 %v9292_v21, 16 }
  0x23   : > { %1455 = vmatpush.bf16.msra.mxu2 %v9340_v30  ;;  %v828_v23 = vsel %vm452_vm0, %v823_v16, %v827_v17  ;;  %v478_v30 = vshrl.u32 %v9292_v21, 16  ;;  %v485_v32 = vshll.u32 %v438_v26, 16  ;;  %v854_v17 = vshrl.u32 %v9310_v8, 16 }
  0x24   : > { %1544 = vmatpush.bf16.msra.mxu3 %v9348_v31  ;;  %v482_v31 = vrot.slane %v480_v27, 1  ;;  %v858_v18 = vrot.slane %v856_v13, 1  ;;  %v9295_v27 = vld [vmem:[%s9970_s20 + $0x3c] sm:$0xff] }
  0x25   : > { %1278 = vmatpush.bf16.msra.mxu0 %v9323_v34  ;;  %v487_v37 = vrot.slane %v485_v32, 1 }
  0x26   : > { %1367 = vmatpush.bf16.msra.mxu1 %v9331_v35  ;;  %v837_v35 = vshll.u32 %v791_v28, 16  ;;  %v483_v36 = vor.u32 %v482_v31, %v478_v30  ;;  %v859_v22 = vor.u32 %v858_v18, %v854_v17  ;;  %v9311_v30 = vld [vmem:[%s9970_s20 + $0x48] sm:$0xff]  ;;  %v778_v31 = vunpack.c.l.b16 %v7932_v25  ;;  %v9373_v18 = vld [vmem:[%s12087_s1 + $0x198] sm:$0xff] }
  0x27   : > { %1456 = vmatpush.bf16.msra.mxu2 %v9339_v39 }
  0x28   : > { %1545 = vmatpush.bf16.msra.mxu3 %v9347_v40  ;;  %v839_v39 = vrot.slane %v837_v35, 1  ;;  %v246_v40 = vld [vmem:[%s9970_s20 + $0x2c] sm:$0x1]  ;;  %v488_v42 = vsel %vm452_vm0, %v483_v36, %v487_v37  ;;  %v9358_v35 = vld [vmem:[%s12087_s1 + $0x120] sm:$0xff]  ;;  %v794_v37 = vpack.c.b16 %v778_v31, %v778_v31 }
  0x29   : > { %1279 = vmatpush.bf16.msra.mxu0 %v9322_v44  ;;  %v423_v44 = vunpack.c.l.b16 %v246_v40  ;;  %v9382_v36 = vld [vmem:[%s12087_s1 + $0x1e0] sm:$0xff]  ;;  %v514_v40 = vshrl.u32 %v9295_v27, 16 }
  0x2a   : > { %1368 = vmatpush.bf16.msra.mxu1 %v9330_v45 }
  0x2b   : > { %1457 = vmatpush.bf16.msra.mxu2 %v9338_v48  ;;  %v439_v48 = vpack.c.b16 %v423_v44, %v423_v44 }
  0x2c   : > { %1546 = vmatpush.bf16.msra.mxu3 %v9346_v49  ;;  %1280 = vmatmul.bf16.vlgmr.msra.gmra.mxu0 %v9993_v20  ;;  %v476_v20 = vsel %vm452_vm0, %v471_v14, %v475_v15  ;;  %v492_v49 = vshll.u32 %v9293_v43, 16  ;;  %v502_v14 = vshrl.u32 %v9294_v5, 16  ;;  %v506_v15 = vrot.slane %v504_v11, 1  ;;  %v9297_v11 = vld [vmem:[%s9970_s20 + $0x54] sm:$0xff] }
  0x2d   : > { %3581 = vmatpush.bf16.msrb.mxu0 %v9361_v54  ;;  %1369 = vmatmul.bf16.vlgmr.msra.gmra.mxu1 %v464_v56  ;;  %v844_v54 = vshll.u32 %v9309_v46, 16  ;;  %v490_v56 = vshrl.u32 %v9293_v43, 16  ;;  %v497_v58 = vshll.u32 %v439_v48, 16  ;;  %v540_v17 = vshll.u32 %v9297_v11, 16 }
  0x2e   : > { %1458 = vmatmul.bf16.vlgmr.msra.gmra.mxu2 %v9306_v24  ;;  %3670 = vmatpush.bf16.msrb.mxu1 %v9369_v61  ;;  %v9308_v24 = vld [vmem:[%s9970_s20 + $0x24] sm:$0xff] }
  0x2f   : > { %3759 = vmatpush.bf16.msrb.mxu2 %v9377_v53  ;;  %1547 = vmatmul.bf16.vlgmr.msra.gmra.mxu3 %v816_v59  ;;  %v832_v29 = vshll.u32 %v9308_v24, 16  ;;  %v830_v33 = vshrl.u32 %v9308_v24, 16  ;;  %v792_v53 = vpack.c.b16 %v776_v47, %v776_v47  ;;  %v842_v59 = vshrl.u32 %v9309_v46, 16 }
  0x30   : > { %3848 = vmatpush.bf16.msrb.mxu3 %v9385_v60  ;;  %v846_v60 = vrot.slane %v844_v54, 1  ;;  %v499_v63 = vrot.slane %v497_v58, 1 }
  0x31   : > { %3582 = vmatpush.bf16.msrb.mxu0 %v9360_v3  ;;  %v834_v34 = vrot.slane %v832_v29, 1  ;;  %v849_v61 = vshll.u32 %v792_v53, 16  ;;  %v7931_v3 = vld [vmem:[%s9970_s20 + $0x44] sm:$0x1]  ;;  %v9296_v53 = vld [vmem:[%s9970_s20 + $0x48] sm:$0xff] }
  0x32   : > { %3671 = vmatpush.bf16.msrb.mxu1 %v9368_v7  ;;  %v847_v0 = vor.u32 %v846_v60, %v842_v59  ;;  %v777_v9 = vunpack.c.l.b16 %v7931_v3  ;;  %v528_v59 = vshll.u32 %v9296_v53, 16 }
  0x33   : > { %3760 = vmatpush.bf16.msrb.mxu2 %v9376_v2  ;;  %v835_v38 = vor.u32 %v834_v34, %v830_v33  ;;  %v851_v1 = vrot.slane %v849_v61, 1  ;;  %v247_v2 = vld [vmem:[%s9970_s20 + $0x38] sm:$0x1]  ;;  %v516_v33 = vshll.u32 %v9295_v27, 16  ;;  %v9374_v34 = vld [vmem:[%s12087_s1 + $0x1a0] sm:$0xff] }
  0x34   : > { %3849 = vmatpush.bf16.msrb.mxu3 %v9384_v6  ;;  %v424_v6 = vunpack.c.l.b16 %v247_v2  ;;  %v793_v12 = vpack.c.b16 %v777_v9, %v777_v9  ;;  %v7934_v9 = vld [vmem:[%s9970_s20 + $0x68] sm:$0x1] }
  0x35   : > { %v840_v45 = vsel %vm452_vm0, %v835_v38, %v839_v39  ;;  %3583 = vmatpush.bf16.msrb.mxu0 %v9359_v51  ;;  %v852_v7 = vsel %vm452_vm0, %v847_v0, %v851_v1  ;;  %v868_v38 = vshll.u32 %v9311_v30, 16  ;;  %v9366_v39 = vld [vmem:[%s12087_s1 + $0x160] sm:$0xff]  ;;  %v518_v41 = vrot.slane %v516_v33, 1  ;;  %v7933_v51 = vld [vmem:[%s9970_s20 + $0x5c] sm:$0x1] }
  0x36   : > { %3672 = vmatpush.bf16.msrb.mxu1 %v9367_v55  ;;  %v440_v10 = vpack.c.b16 %v424_v6, %v424_v6  ;;  %v861_v19 = vshll.u32 %v793_v12, 16  ;;  %v251_v33 = vld [vmem:[%s9970_s20 + $0x68] sm:$0x1] }
  0x37   : > { %3761 = vmatpush.bf16.msrb.mxu2 %v9375_v50  ;;  %v870_v44 = vrot.slane %v868_v38, 1  ;;  %v249_v50 = vld [vmem:[%s9970_s20 + $0x50] sm:$0x1]  ;;  %v428_v38 = vunpack.c.l.b16 %v251_v33 }
  0x38   : > { %3850 = vmatpush.bf16.msrb.mxu3 %v9383_v52  ;;  %v509_v16 = vshll.u32 %v440_v10, 16  ;;  %v426_v54 = vunpack.c.l.b16 %v249_v50  ;;  %v9364_v33 = vld [vmem:[%s12087_s1 + $0x150] sm:$0xff] }
  0x39   : > { %3584 = vmatpush.bf16.msrb.mxu0 %v9358_v35  ;;  %v9365_v35 = vld [vmem:[%s12087_s1 + $0x158] sm:$0xff] }
  0x3a   : > { %3673 = vmatpush.bf16.msrb.mxu1 %v9366_v39  ;;  %v442_v58 = vpack.c.b16 %v426_v54, %v426_v54  ;;  %v10152_v54 = vld [vmem:[%s12088_s2] ss:$0 sm:$0xff] }
  0x3b   : > { %3762 = vmatpush.bf16.msrb.mxu2 %v9374_v34  ;;  %v7935_v34 = vld [vmem:[%s9970_s20 + $0x74] sm:$0x1] }
  0x3c   : > { %1285 = vmatmul.bf16.gmra.mxu0 %v9291_v57  ;;  %v494_v57 = vrot.slane %v492_v49, 1  ;;  %3851 = vmatpush.bf16.msrb.mxu3 %v9382_v36  ;;  %v533_v0 = vshll.u32 %v442_v58, 16  ;;  %v7936_v58 = vld [vmem:[%s9970_s20 + $0x80] sm:$0x1] }
  0x3d   : > { %1374 = vmatmul.bf16.gmra.mxu1 %v476_v20  ;;  %v507_v20 = vor.u32 %v506_v15, %v502_v14  ;;  %v9313_v14 = vld [vmem:[%s9970_s20 + $0x60] sm:$0xff]  ;;  %v780_v15 = vunpack.c.l.b16 %v7934_v9  ;;  %v9372_v9 = vld [vmem:[%s12087_s1 + $0x190] sm:$0xff] }
  0x3e   : > { %1463 = vmatmul.bf16.gmra.mxu2 %v9307_v62  ;;  %v495_v62 = vor.u32 %v494_v57, %v490_v56  ;;  %v9312_v56 = vld [vmem:[%s9970_s20 + $0x54] sm:$0xff]  ;;  %v779_v57 = vunpack.c.l.b16 %v7933_v51  ;;  %3674 = vmatpush.bf16.msrb.mxu1 %v9365_v35 }
  0x3f   : > { %1552 = vmatmul.bf16.gmra.mxu3 %v828_v23  ;;  %v863_v23 = vrot.slane %v861_v19, 1  ;;  %v880_v61 = vshll.u32 %v9312_v56, 16  ;;  %v878_v1 = vshrl.u32 %v9312_v56, 16  ;;  %v9357_v19 = vld [vmem:[%s12087_s1 + $0x118] sm:$0xff]  ;;  %3763 = vmatpush.bf16.msrb.mxu2 %v9373_v18 }
  0x40   : > { %v500_v4 = vsel %vm452_vm0, %v495_v62, %v499_v63  ;;  %v795_v60 = vpack.c.b16 %v779_v57, %v779_v57  ;;  %v526_v62 = vshrl.u32 %v9296_v53, 16  ;;  %v530_v63 = vrot.slane %v528_v59, 1  ;;  %3585 = vmatpush.bf16.msrb.mxu0 %v9357_v19  ;;  %v252_v57 = vld [vmem:[%s9970_s20 + $0x74] sm:$0x1] }
  0x41   : > { %v864_v29 = vsel %vm452_vm0, %v859_v22, %v863_v23  ;;  %v882_v2 = vrot.slane %v880_v61, 1  ;;  %v892_v22 = vshll.u32 %v9313_v14, 16  ;;  %v538_v23 = vshrl.u32 %v9297_v11, 16 }
  0x42   : > { %v885_v3 = vshll.u32 %v795_v60, 16  ;;  %3675 = vmatpush.bf16.msrb.mxu1 %v9364_v33 }
  0x43   : > { %v883_v6 = vor.u32 %v882_v2, %v878_v1  ;;  %v9315_v2 = vld [vmem:[%s9970_s20 + $0x78] sm:$0xff]  ;;  %3764 = vmatpush.bf16.msrb.mxu2 %v9372_v9 }
  0x4c   : > { %1290 = vmatmul.bf16.gmra.mxu0 %v9292_v21  ;;  %v511_v21 = vrot.slane %v509_v16, 1 }
  0x4d   : > { %1379 = vmatmul.bf16.gmra.mxu1 %v488_v42 }
  0x4e   : > { %1468 = vmatmul.bf16.gmra.mxu2 %v9308_v24  ;;  %v248_v24 = vld [vmem:[%s9970_s20 + $0x44] sm:$0x1]  ;;  %v512_v26 = vsel %vm452_vm0, %v507_v20, %v511_v21  ;;  %v9381_v20 = vld [vmem:[%s12087_s1 + $0x1d8] sm:$0xff]  ;;  %v796_v21 = vpack.c.b16 %v780_v15, %v780_v15 }
  0x4f   : > { %1557 = vmatmul.bf16.gmra.mxu3 %v840_v45  ;;  %v425_v28 = vunpack.c.l.b16 %v248_v24  ;;  %v873_v45 = vshll.u32 %v794_v37, 16  ;;  %v542_v24 = vrot.slane %v540_v17, 1  ;;  %v9298_v37 = vld [vmem:[%s9970_s20 + $0x60] sm:$0xff] }
  0x50   : > { %3852 = vmatpush.bf16.msrb.mxu3 %v9381_v20  ;;  %v914_v20 = vshrl.u32 %v9315_v2, 16 }
  0x51   : > { %v441_v32 = vpack.c.b16 %v425_v28, %v425_v28  ;;  %v875_v49 = vrot.slane %v873_v45, 1  ;;  %v897_v28 = vshll.u32 %v796_v21, 16 }
  0x53   : > { %v521_v42 = vshll.u32 %v441_v32, 16  ;;  %v899_v32 = vrot.slane %v897_v28, 1 }
  0x55   : > { %v523_v47 = vrot.slane %v521_v42, 1  ;;  %v444_v42 = vpack.c.b16 %v428_v38, %v428_v38 }
  0x5c   : > { %1295 = vmatmul.bf16.gmra.mxu0 %v9293_v43  ;;  %v866_v43 = vshrl.u32 %v9311_v30, 16 }
  0x5d   : > { %1384 = vmatmul.bf16.gmra.mxu1 %v500_v4  ;;  %v531_v4 = vor.u32 %v530_v63, %v526_v62  ;;  %v9299_v62 = vld [vmem:[%s9970_s20 + $0x6c] sm:$0xff]  ;;  %v429_v63 = vunpack.c.l.b16 %v252_v57 }
  0x5e   : > { %1473 = vmatmul.bf16.gmra.mxu2 %v9309_v46  ;;  %v519_v46 = vor.u32 %v518_v41, %v514_v40  ;;  %v871_v48 = vor.u32 %v870_v44, %v866_v43  ;;  %v9314_v40 = vld [vmem:[%s9970_s20 + $0x6c] sm:$0xff]  ;;  %v781_v41 = vunpack.c.l.b16 %v7935_v34  ;;  %v552_v43 = vshll.u32 %v9298_v37, 16 }
  0x5f   : > { %1562 = vmatmul.bf16.gmra.mxu3 %v852_v7  ;;  %v887_v7 = vrot.slane %v885_v3, 1  ;;  %v904_v45 = vshll.u32 %v9314_v40, 16  ;;  %v782_v3 = vunpack.c.l.b16 %v7936_v58  ;;  %v562_v17 = vshrl.u32 %v9299_v62, 16 }
  0x60   : > { %v524_v52 = vsel %vm452_vm0, %v519_v46, %v523_v47  ;;  %v876_v55 = vsel %vm452_vm0, %v871_v48, %v875_v49  ;;  %v797_v44 = vpack.c.b16 %v781_v41, %v781_v41  ;;  %v550_v46 = vshrl.u32 %v9298_v37, 16 }
  0x61   : > { %v888_v13 = vsel %vm452_vm0, %v883_v6, %v887_v7  ;;  %v554_v47 = vrot.slane %v552_v43, 1  ;;  %v557_v48 = vshll.u32 %v444_v42, 16  ;;  %v902_v49 = vshrl.u32 %v9314_v40, 16 }
  0x62   : > { %v906_v50 = vrot.slane %v904_v45, 1  ;;  %v909_v51 = vshll.u32 %v797_v44, 16  ;;  %v564_v6 = vshll.u32 %v9299_v62, 16  ;;  %v798_v7 = vpack.c.b16 %v782_v3, %v782_v3  ;;  %v9316_v44 = vld [vmem:[%s9970_s20 + $0x84] sm:$0xff] }
  0x64   : > { %v566_v18 = vrot.slane %v564_v6, 1 }
  0x6c   : > { %1300 = vmatmul.bf16.gmra.mxu0 %v9294_v5  ;;  %v535_v5 = vrot.slane %v533_v0, 1 }
  0x6d   : > { %1389 = vmatmul.bf16.gmra.mxu1 %v512_v26  ;;  %v890_v26 = vshrl.u32 %v9313_v14, 16 }
  0x6e   : > { %1478 = vmatmul.bf16.gmra.mxu2 %v9310_v8  ;;  %v250_v8 = vld [vmem:[%s9970_s20 + $0x5c] sm:$0x1]  ;;  %v536_v10 = vsel %vm452_vm0, %v531_v4, %v535_v5  ;;  %v445_v5 = vpack.c.b16 %v429_v63, %v429_v63 }
  0x6f   : > { %1567 = vmatmul.bf16.gmra.mxu3 %v864_v29  ;;  %v427_v12 = vunpack.c.l.b16 %v250_v8  ;;  %v543_v29 = vor.u32 %v542_v24, %v538_v23  ;;  %v916_v8 = vshll.u32 %v9315_v2, 16 }
  0x70   : > { %v569_v19 = vshll.u32 %v445_v5, 16 }
  0x71   : > { %v443_v16 = vpack.c.b16 %v427_v12, %v427_v12  ;;  %v918_v21 = vrot.slane %v916_v8, 1  ;;  %v254_v8 = vld [vmem:[%s9970_s20 + $0x8c] sm:$0x1] }
  0x73   : > { %v545_v25 = vshll.u32 %v443_v16, 16  ;;  %v919_v28 = vor.u32 %v918_v21, %v914_v20  ;;  %v9317_v21 = vld [vmem:[%s9970_s20 + $0x90] sm:$0xff] }
  0x7c   : > { %1305 = vmatmul.bf16.gmra.mxu0 %v9295_v27  ;;  %v894_v27 = vrot.slane %v892_v22, 1  ;;  %v921_v22 = vshll.u32 %v798_v7, 16 }
  0x7d   : > { %1394 = vmatmul.bf16.gmra.mxu1 %v524_v52  ;;  %v555_v52 = vor.u32 %v554_v47, %v550_v46 }
  0x7e   : > { %1483 = vmatmul.bf16.gmra.mxu2 %v9311_v30  ;;  %v547_v30 = vrot.slane %v545_v25, 1  ;;  %v895_v31 = vor.u32 %v894_v27, %v890_v26  ;;  %v567_v26 = vor.u32 %v566_v18, %v562_v17  ;;  %v571_v27 = vrot.slane %v569_v19, 1  ;;  %v9301_v17 = vld [vmem:[%s9970_s20 + $0x84] sm:$0xff] }
  0x7f   : > { %1572 = vmatmul.bf16.gmra.mxu3 %v876_v55  ;;  %v907_v55 = vor.u32 %v906_v50, %v902_v49  ;;  %v431_v18 = vunpack.c.l.b16 %v254_v8 }
  0x80   : > { %v548_v36 = vsel %vm452_vm0, %v543_v29, %v547_v30  ;;  %v900_v39 = vsel %vm452_vm0, %v895_v31, %v899_v32  ;;  %v923_v29 = vrot.slane %v921_v22, 1  ;;  %v253_v30 = vld [vmem:[%s9970_s20 + $0x80] sm:$0x1]  ;;  %v7937_v32 = vld [vmem:[%s9970_s20 + $0x8c] sm:$0x1] }
  0x81   : > { %v430_v41 = vunpack.c.l.b16 %v253_v30  ;;  %v783_v45 = vunpack.c.l.b16 %v7937_v32  ;;  %v9371_v30 = vld [vmem:[%s12087_s1 + $0x188] sm:$0xff] }
  0x82   : > { %v924_v43 = vsel %vm452_vm0, %v919_v28, %v923_v29  ;;  %v940_v29 = vshll.u32 %v9317_v21, 16  ;;  %v9379_v32 = vld [vmem:[%s12087_s1 + $0x1c8] sm:$0xff]  ;;  %3765 = vmatpush.bf16.msrb.mxu2 %v9371_v30 }
  0x83   : > { %v446_v49 = vpack.c.b16 %v430_v41, %v430_v41  ;;  %v938_v41 = vshrl.u32 %v9317_v21, 16 }
  0x8c   : > { %1310 = vmatmul.bf16.gmra.mxu0 %v9296_v53  ;;  %v559_v53 = vrot.slane %v557_v48, 1 }
  0x8d   : > { %1399 = vmatmul.bf16.gmra.mxu1 %v536_v10  ;;  %v9356_v10 = vld [vmem:[%s12087_s1 + $0x110] sm:$0xff] }
  0x8e   : > { %1488 = vmatmul.bf16.gmra.mxu2 %v9312_v56  ;;  %v911_v56 = vrot.slane %v909_v51, 1  ;;  %v560_v61 = vsel %vm452_vm0, %v555_v52, %v559_v53  ;;  %3586 = vmatpush.bf16.msrb.mxu0 %v9356_v10  ;;  %v799_v51 = vpack.c.b16 %v783_v45, %v783_v45  ;;  %v928_v52 = vshll.u32 %v9316_v44, 16  ;;  %v7938_v10 = vld [vmem:[%s9970_s20 + $0x98] sm:$0x1] }
  0x8f   : > { %1577 = vmatmul.bf16.gmra.mxu3 %v888_v13  ;;  %v784_v22 = vunpack.c.l.b16 %v7938_v10 }
  0x90   : > { %v912_v1 = vsel %vm452_vm0, %v907_v55, %v911_v56  ;;  %v930_v63 = vrot.slane %v928_v52, 1 }
  0x91   : > { %v800_v28 = vpack.c.b16 %v784_v22, %v784_v22 }
  0x9c   : > { %1315 = vmatmul.bf16.gmra.mxu0 %v9297_v11  ;;  %v9380_v11 = vld [vmem:[%s12087_s1 + $0x1d0] sm:$0xff] }
  0x9d   : > { %1404 = vmatmul.bf16.gmra.mxu1 %v548_v36  ;;  %3853 = vmatpush.bf16.msrb.mxu3 %v9380_v11 }
  0x9e   : > { %1493 = vmatmul.bf16.gmra.mxu2 %v9313_v14 }
  0x9f   : > { %1582 = vmatmul.bf16.gmra.mxu3 %v900_v39  ;;  %v572_v39 = vsel %vm452_vm0, %v567_v26, %v571_v27  ;;  %v447_v26 = vpack.c.b16 %v431_v18, %v431_v18  ;;  %v588_v27 = vshll.u32 %v9301_v17, 16 }
  0xa1   : > { %3854 = vmatpush.bf16.msrb.mxu3 %v9379_v32 }
  0xa9   : > { %v1281_v59 = vpop.f32.mrf.mxu0 }
  0xaa   : > { %v1370_v60 = vpop.f32.mrf.mxu1  ;;  %v1282_v0 = vadd.f32 %v10152_v54, %v1281_v59 }
  0xac   : > { %1320 = vmatmul.bf16.gmra.mxu0 %v9298_v37  ;;  %v1371_v4 = vadd.f32 %v1370_v60, %v1282_v0  ;;  %v933_v0 = vshll.u32 %v799_v51, 16  ;;  %v255_v51 = vld [vmem:[%s9970_s20 + $0x98] sm:$0x1] }
  0xad   : > { %1409 = vmatmul.bf16.gmra.mxu1 %v560_v61  ;;  %v581_v61 = vshll.u32 %v446_v49, 16 }
  0xae   : > { %1498 = vmatmul.bf16.gmra.mxu2 %v9314_v40  ;;  %v9300_v40 = vld [vmem:[%s9970_s20 + $0x78] sm:$0xff]  ;;  %v935_v7 = vrot.slane %v933_v0, 1 }
  0xaf   : > { %1587 = vmatmul.bf16.gmra.mxu3 %v912_v1  ;;  %v576_v50 = vshll.u32 %v9300_v40, 16  ;;  %v574_v59 = vshrl.u32 %v9300_v40, 16  ;;  %v583_v5 = vrot.slane %v581_v61, 1 }
  0xb1   : > { %v1459_v12 = vpop.f32.mrf.mxu2  ;;  %v1283_v15 = vpop.f32.mrf.mxu0  ;;  %v578_v60 = vrot.slane %v576_v50, 1 }
  0xb2   : > { %v1548_v13 = vpop.f32.mrf.mxu3  ;;  %v1460_v14 = vadd.f32 %v1459_v12, %v1371_v4  ;;  %v1372_v16 = vpop.f32.mrf.mxu1  ;;  %v1284_v24 = vadd.f32 %v10152_v54, %v1283_v15 }
  0xb3   : > { %v579_v4 = vor.u32 %v578_v60, %v574_v59 }
  0xb4   : > { %v1549_v23 = vadd.f32 %v1548_v13, %v1460_v14  ;;  %v1373_v31 = vadd.f32 %v1372_v16, %v1284_v24 }
  0xb5   : > { %v584_v16 = vsel %vm452_vm0, %v579_v4, %v583_v5 }
  0xb6   : > { %v1628_v25 = vmax.f32 %v1549_v23, 0.0 }
  0xb8   : > { %1660 = vst [vmem:[%s10175_s12] sm:$0xff] %v1628_v25 }
  0xb9   : > { %v1461_v34 = vpop.f32.mrf.mxu2  ;;  %v1286_v37 = vpop.f32.mrf.mxu0 }
  0xba   : > { %v1550_v35 = vpop.f32.mrf.mxu3  ;;  %v1462_v36 = vadd.f32 %v1461_v34, %v1373_v31  ;;  %v1375_v38 = vpop.f32.mrf.mxu1  ;;  %v1287_v42 = vadd.f32 %v10152_v54, %v1286_v37  ;;  %v9355_v31 = vld [vmem:[%s12087_s1 + $0x108] sm:$0xff] }
  0xbb   : > { %3587 = vmatpush.bf16.msrb.mxu0 %v9355_v31  ;;  %v7940_v31 = vld [vmem:[%s9970_s20 + $0xb0] sm:$0x1] }
  0xbc   : > { %v1551_v46 = vadd.f32 %v1550_v35, %v1462_v36  ;;  %1325 = vmatmul.bf16.gmra.mxu0 %v9299_v62  ;;  %v1376_v48 = vadd.f32 %v1375_v38, %v1287_v42  ;;  %v926_v62 = vshrl.u32 %v9316_v44, 16  ;;  %v586_v38 = vshrl.u32 %v9301_v17, 16 }
  0xbd   : > { %1414 = vmatmul.bf16.gmra.mxu1 %v572_v39  ;;  %v590_v39 = vrot.slane %v588_v27, 1  ;;  %v942_v42 = vrot.slane %v940_v29, 1  ;;  %v256_v29 = vld [vmem:[%s9970_s20 + $0xa4] sm:$0x1] }
  0xbe   : > { %v1629_v47 = vmax.f32 %v1551_v46, 0.0  ;;  %1503 = vmatmul.bf16.gmra.mxu2 %v9315_v2  ;;  %v931_v6 = vor.u32 %v930_v63, %v926_v62  ;;  %v9302_v62 = vld [vmem:[%s9970_s20 + $0x90] sm:$0xff]  ;;  %v432_v63 = vunpack.c.l.b16 %v255_v51  ;;  %v9370_v51 = vld [vmem:[%s12087_s1 + $0x180] sm:$0xff] }
  0xbf   : > { %1592 = vmatmul.bf16.gmra.mxu3 %v924_v43  ;;  %v945_v43 = vshll.u32 %v800_v28, 16  ;;  %v943_v49 = vor.u32 %v942_v42, %v938_v41  ;;  %v9319_v42 = vld [vmem:[%s9970_s20 + $0xa8] sm:$0xff]  ;;  %3766 = vmatpush.bf16.msrb.mxu2 %v9370_v51 }
  0xc0   : > { %1661 = vst [vmem:[%s10175_s12 + $0x8] sm:$0xff] %v1629_v47  ;;  %v936_v20 = vsel %vm452_vm0, %v931_v6, %v935_v7  ;;  %v591_v47 = vor.u32 %v590_v39, %v586_v38  ;;  %v600_v7 = vshll.u32 %v9302_v62, 16  ;;  %v448_v8 = vpack.c.b16 %v432_v63, %v432_v63  ;;  %v9303_v38 = vld [vmem:[%s9970_s20 + $0x9c] sm:$0xff] }
  0xc1   : > { %v1464_v53 = vpop.f32.mrf.mxu2  ;;  %v1288_v57 = vpop.f32.mrf.mxu0  ;;  %v947_v50 = vrot.slane %v945_v43, 1  ;;  %v433_v39 = vunpack.c.l.b16 %v256_v29  ;;  %v786_v43 = vunpack.c.l.b16 %v7940_v31  ;;  %v962_v63 = vshrl.u32 %v9319_v42, 16 }
  0xc2   : > { %v1553_v55 = vpop.f32.mrf.mxu3  ;;  %v1465_v56 = vadd.f32 %v1464_v53, %v1376_v48  ;;  %v1377_v58 = vpop.f32.mrf.mxu1  ;;  %v1289_v2 = vadd.f32 %v10152_v54, %v1288_v57  ;;  %v7939_v53 = vld [vmem:[%s9970_s20 + $0xa4] sm:$0x1]  ;;  %v605_v18 = vshll.u32 %v448_v8, 16 }
  0xc4   : > { %v1554_v1 = vadd.f32 %v1553_v55, %v1465_v56  ;;  %v1378_v9 = vadd.f32 %v1377_v58, %v1289_v2  ;;  %v9363_v55 = vld [vmem:[%s12087_s1 + $0x148] sm:$0xff]  ;;  %v9318_v2 = vld [vmem:[%s9970_s20 + $0x9c] sm:$0xff] }
  0xc5   : > { %3676 = vmatpush.bf16.msrb.mxu1 %v9363_v55 }
  0xc6   : > { %v1630_v3 = vmax.f32 %v1554_v1, 0.0  ;;  %v948_v1 = vsel %vm452_vm0, %v943_v49, %v947_v50  ;;  %v964_v49 = vshll.u32 %v9319_v42, 16  ;;  %v802_v50 = vpack.c.b16 %v786_v43, %v786_v43 }
  0xc8   : > { %1662 = vst [vmem:[%s10175_s12 + $0x10] sm:$0xff] %v1630_v3  ;;  %v785_v3 = vunpack.c.l.b16 %v7939_v53  ;;  %v9378_v53 = vld [vmem:[%s12087_s1 + $0x1c0] sm:$0xff] }
  0xc9   : > { %v1466_v11 = vpop.f32.mrf.mxu2  ;;  %v1291_v14 = vpop.f32.mrf.mxu0  ;;  %3855 = vmatpush.bf16.msrb.mxu3 %v9378_v53 }
  0xca   : > { %v1555_v12 = vpop.f32.mrf.mxu3  ;;  %v1467_v13 = vadd.f32 %v1466_v11, %v1378_v9  ;;  %v1380_v15 = vpop.f32.mrf.mxu1  ;;  %v1292_v19 = vadd.f32 %v10152_v54, %v1291_v14  ;;  %v952_v9 = vshll.u32 %v9318_v2, 16  ;;  %v801_v10 = vpack.c.b16 %v785_v3, %v785_v3 }
  0xcc   : > { %v1556_v23 = vadd.f32 %v1555_v12, %v1467_v13  ;;  %1330 = vmatmul.bf16.gmra.mxu0 %v9300_v40  ;;  %v1381_v25 = vadd.f32 %v1380_v15, %v1292_v19  ;;  %v593_v40 = vshll.u32 %v447_v26, 16  ;;  %v950_v19 = vshrl.u32 %v9318_v2, 16 }
  0xcd   : > { %1419 = vmatmul.bf16.gmra.mxu1 %v584_v16  ;;  %v598_v16 = vshrl.u32 %v9302_v62, 16  ;;  %v607_v26 = vrot.slane %v605_v18, 1 }
  0xce   : > { %v1631_v24 = vmax.f32 %v1556_v23, 0.0  ;;  %1508 = vmatmul.bf16.gmra.mxu2 %v9316_v44  ;;  %v595_v48 = vrot.slane %v593_v40, 1 }
  0xcf   : > { %1597 = vmatmul.bf16.gmra.mxu3 %v936_v20  ;;  %v954_v20 = vrot.slane %v952_v9, 1  ;;  %v257_v9 = vld [vmem:[%s9970_s20 + $0xb0] sm:$0x1] }
  0xd0   : > { %1663 = vst [vmem:[%s10175_s12 + $0x18] sm:$0xff] %v1631_v24  ;;  %v596_v61 = vsel %vm452_vm0, %v591_v47, %v595_v48  ;;  %v612_v47 = vshll.u32 %v9303_v38, 16  ;;  %v449_v48 = vpack.c.b16 %v433_v39, %v433_v39 }
  0xd1   : > { %v1469_v33 = vpop.f32.mrf.mxu2  ;;  %v1293_v36 = vpop.f32.mrf.mxu0  ;;  %v955_v27 = vor.u32 %v954_v20, %v950_v19  ;;  %v10249_v19 = vld [vmem:[%s9970_s20 + $0xa8] sm:$0xff]  ;;  %v434_v20 = vunpack.c.l.b16 %v257_v9 }
  0xd2   : > { %v1558_v34 = vpop.f32.mrf.mxu3  ;;  %v1470_v35 = vadd.f32 %v1469_v33, %v1381_v25  ;;  %v1382_v37 = vpop.f32.mrf.mxu1  ;;  %v1294_v45 = vadd.f32 %v10152_v54, %v1293_v36 }
  0xd3   : > { %v450_v29 = vpack.c.b16 %v434_v20, %v434_v20 }
  0xd4   : > { %v1559_v44 = vadd.f32 %v1558_v34, %v1470_v35  ;;  %v1383_v52 = vadd.f32 %v1382_v37, %v1294_v45 }
  0xd5   : > { %v629_v39 = vshll.u32 %v450_v29, 16  ;;  %v9425_v29 = vld [vmem:[%s12087_s1 + $0x238] sm:$0xff] }
  0xd6   : > { %v1632_v46 = vmax.f32 %v1559_v44, 0.0 }
  0xd7   : > { %v631_v53 = vrot.slane %v629_v39, 1 }
  0xd8   : > { %1664 = vst [vmem:[%s10175_s12 + $0x20] sm:$0xff] %v1632_v46 }
  0xd9   : > { %v1471_v56 = vpop.f32.mrf.mxu2  ;;  %v1296_v59 = vpop.f32.mrf.mxu0 }
  0xda   : > { %v1560_v57 = vpop.f32.mrf.mxu3  ;;  %v1472_v58 = vadd.f32 %v1471_v56, %v1383_v52  ;;  %v1385_v60 = vpop.f32.mrf.mxu1  ;;  %v1297_v0 = vadd.f32 %v10152_v54, %v1296_v59  ;;  %v9354_v52 = vld [vmem:[%s12087_s1 + $0x100] sm:$0xff] }
  0xdb   : > { %3588 = vmatpush.bf16.msrb.mxu0 %v9354_v52 }
  0xdc   : > { %v1561_v4 = vadd.f32 %v1560_v57, %v1472_v58  ;;  %1335 = vmatmul.bf16.gmra.mxu0 %v9301_v17  ;;  %v1386_v6 = vadd.f32 %v1385_v60, %v1297_v0  ;;  %v602_v17 = vrot.slane %v600_v7, 1  ;;  %v610_v60 = vshrl.u32 %v9303_v38, 16 }
  0xdd   : > { %1424 = vmatmul.bf16.gmra.mxu1 %v596_v61  ;;  %v614_v61 = vrot.slane %v612_v47, 1  ;;  %v966_v0 = vrot.slane %v964_v49, 1  ;;  %v9625_v49 = vld [vmem:[%s9970_s20] sm:$0xf0] }
  0xde   : > { %v1633_v5 = vmax.f32 %v1561_v4, 0.0  ;;  %1513 = vmatmul.bf16.gmra.mxu2 %v9317_v21  ;;  %v957_v21 = vshll.u32 %v801_v10, 16  ;;  %v603_v25 = vor.u32 %v602_v17, %v598_v16 }
  0xdf   : > { %1602 = vmatmul.bf16.gmra.mxu3 %v948_v1  ;;  %v969_v1 = vshll.u32 %v802_v50, 16  ;;  %v967_v7 = vor.u32 %v966_v0, %v962_v63  ;;  %v9626_v50 = vld [vmem:[%s9970_s20] sm:$0xe]  ;;  %5060 = vmatpush.bf16.msra.mxu0 %v9425_v29 }
  0xe0   : > { %1665 = vst [vmem:[%s10175_s12 + $0x28] sm:$0xff] %v1633_v5  ;;  %v959_v28 = vrot.slane %v957_v21, 1  ;;  %v608_v37 = vsel %vm452_vm0, %v603_v25, %v607_v26  ;;  %v615_v5 = vor.u32 %v614_v61, %v610_v60  ;;  %v7942_v61 = vld [vmem:[%s9970_s20 + $0xc8] sm:$0x1] }
  0xe1   : > { %v1474_v11 = vpop.f32.mrf.mxu2  ;;  %v1298_v14 = vpop.f32.mrf.mxu0  ;;  %v971_v8 = vrot.slane %v969_v1, 1 }
  0xe2   : > { %v1563_v12 = vpop.f32.mrf.mxu3  ;;  %v1475_v13 = vadd.f32 %v1474_v11, %v1386_v6  ;;  %v1387_v15 = vpop.f32.mrf.mxu1  ;;  %v1299_v23 = vadd.f32 %v10152_v54, %v1298_v14  ;;  %v960_v41 = vsel %vm452_vm0, %v955_v27, %v959_v28  ;;  %v7941_v11 = vld [vmem:[%s9970_s20 + $0xbc] sm:$0x1]  ;;  %v624_v28 = vshll.u32 %v10249_v19, 16 }
  0xe4   : > { %v1564_v22 = vadd.f32 %v1563_v12, %v1475_v13  ;;  %v1388_v30 = vadd.f32 %v1387_v15, %v1299_v23  ;;  %v9362_v12 = vld [vmem:[%s12087_s1 + $0x140] sm:$0xff]  ;;  %v10254_v23 = vld [vmem:[%s9970_s20 + $0xb4] sm:$0xff] }
  0xe5   : > { %3677 = vmatpush.bf16.msrb.mxu1 %v9362_v12  ;;  %v974_v43 = vshrl.u32 %v10254_v23, 16  ;;  %v788_v12 = vunpack.c.l.b16 %v7942_v61  ;;  %v9650_v61 = vld [vmem:[%s9970_s20 + $0x18] sm:$0xe] }
  0xe6   : > { %v1634_v24 = vmax.f32 %v1564_v22, 0.0  ;;  %v972_v22 = vsel %vm452_vm0, %v967_v7, %v971_v8  ;;  %v10276_v8 = vld [vmem:[%s9970_s20 + $0xb4] sm:$0xff] }
  0xe7   : > { %v634_v39 = vshrl.u32 %v10276_v8, 16 }
  0xe8   : > { %1666 = vst [vmem:[%s10175_s12 + $0x30] sm:$0xff] %v1634_v24  ;;  %v787_v24 = vunpack.c.l.b16 %v7941_v11  ;;  %v10281_v11 = vld [vmem:[%s9970_s20 + $0xc0] sm:$0xff] }
  0xe9   : > { %v1476_v32 = vpop.f32.mrf.mxu2  ;;  %v1301_v35 = vpop.f32.mrf.mxu0 }
  0xea   : > { %v1565_v33 = vpop.f32.mrf.mxu3  ;;  %v1477_v34 = vadd.f32 %v1476_v32, %v1388_v30  ;;  %v1390_v36 = vpop.f32.mrf.mxu1  ;;  %v1302_v40 = vadd.f32 %v10152_v54, %v1301_v35  ;;  %v976_v30 = vshll.u32 %v10254_v23, 16  ;;  %v803_v31 = vpack.c.b16 %v787_v24, %v787_v24 }
  0xeb   : > { %v988_v24 = vshll.u32 %v10281_v11, 16 }
  0xec   : > { %v1566_v44 = vadd.f32 %v1565_v33, %v1477_v34  ;;  %1340 = vmatmul.bf16.gmra.mxu0 %v9302_v62  ;;  %v1391_v46 = vadd.f32 %v1390_v36, %v1302_v40  ;;  %v617_v62 = vshll.u32 %v449_v48, 16  ;;  %v10261_v40 = vld [vmem:[%s9970_s20 + $0xc] sm:$0xff]   ;;  %v1694_v48 = vld [vmem:[%s9970_s20 + $0x8] sm:$0x1] }
  0xed   : > { %1429 = vmatmul.bf16.gmra.mxu1 %v608_v37  ;;  %v622_v37 = vshrl.u32 %v10249_v19, 16 }
  0xee   : > { %v1635_v45 = vmax.f32 %v1566_v44, 0.0  ;;  %1518 = vmatmul.bf16.gmra.mxu2 %v9318_v2  ;;  %v619_v6 = vrot.slane %v617_v62, 1  ;;  %v978_v44 = vrot.slane %v976_v30, 1  ;;  %v9627_v62 = vor.u32 %v9626_v50, %v9625_v49 }
  0xef   : > { %1607 = vmatmul.bf16.gmra.mxu3 %v960_v41  ;;  %v9782_v41 = vld [vmem:[%s9970_s20 + $0xc] sm:$0xf0] }
  0xf0   : > { %1667 = vst [vmem:[%s10175_s12 + $0x38] sm:$0xff] %v1635_v45  ;;  %v620_v18 = vsel %vm452_vm0, %v615_v5, %v619_v6  ;;  %v981_v45 = vshll.u32 %v803_v31, 16 }
  0xf1   : > { %v1479_v55 = vpop.f32.mrf.mxu2  ;;  %v1303_v58 = vpop.f32.mrf.mxu0 }
  0xf2   : > { %v1568_v56 = vpop.f32.mrf.mxu3  ;;  %v1480_v57 = vadd.f32 %v1479_v55, %v1391_v46  ;;  %v1392_v59 = vpop.f32.mrf.mxu1  ;;  %v1304_v3 = vadd.f32 %v10152_v54, %v1303_v58  ;;  %v258_v55 = vld [vmem:[%s9970_s20 + $0xbc] sm:$0x1]  ;;  %v983_v58 = vrot.slane %v981_v45, 1  ;;  %v10306_v45 = vld [vmem:[%s9970_s20 + $0xc] sm:$0xff]  }
  0xf3   : > { %v435_v1 = vunpack.c.l.b16 %v258_v55 }
  0xf4   : > { %v1569_v2 = vadd.f32 %v1568_v56, %v1480_v57  ;;  %v1393_v10 = vadd.f32 %v1392_v59, %v1304_v3  ;;  %v8201_v56 = vld [vmem:[%s9970_s20 + $0x14] sm:$0x1]  ;;  %v979_v57 = vor.u32 %v978_v44, %v974_v43  ;;  %v1870_v59 = vunpack.c.l.b16 %v1694_v48 }
  0xf5   : > { %v990_v43 = vrot.slane %v988_v24, 1 }
  0xf6   : > { %v1636_v4 = vmax.f32 %v1569_v2, 0.0  ;;  %v2270_v2 = vunpack.c.l.b16 %v8201_v56  ;;  %v8204_v56 = vld [vmem:[%s9970_s20 + $0x20] sm:$0x1] }
  0xf8   : > { %1668 = vst [vmem:[%s10175_s12 + $0x40] sm:$0xff] %v1636_v4 }
  0xf9   : > { %v1481_v13 = vpop.f32.mrf.mxu2  ;;  %v1306_v16 = vpop.f32.mrf.mxu0 }
  0xfa   : > { %v1570_v14 = vpop.f32.mrf.mxu3  ;;  %v1482_v15 = vadd.f32 %v1481_v13, %v1393_v10  ;;  %v1395_v17 = vpop.f32.mrf.mxu1  ;;  %v1307_v21 = vadd.f32 %v10152_v54, %v1306_v16  ;;  %v984_v10 = vsel %vm452_vm0, %v979_v57, %v983_v58  ;;  %v10283_v13 = vpack.c.b16 %v1870_v59, %v1870_v59  ;;  %v10317_v59 = vld [vmem:[%s9970_s20] sm:$0xff]  }
  0xfb   : > { %v451_v16 = vpack.c.b16 %v435_v1, %v435_v1  ;;  %v2621_v29 = vshrl.u32 %v10317_v59, 16 }
  0xfc   : > { %v1571_v25 = vadd.f32 %v1570_v14, %v1482_v15  ;;  %1345 = vmatmul.bf16.gmra.mxu0 %v9303_v38  ;;  %v1396_v27 = vadd.f32 %v1395_v17, %v1307_v21  ;;  %v626_v38 = vrot.slane %v624_v28, 1  ;;  %v1999_v15 = vshll.u32 %v9627_v62, 16  ;;  %v9441_v28 = vld [vmem:[%s12087_s1 + $0x2b8] sm:$0xff] }
  0xfd   : > { %1434 = vmatmul.bf16.gmra.mxu1 %v620_v18  ;;  %v10286_v17 = vpack.c.b16 %v2270_v2, %v2270_v2  ;;  %5238 = vmatpush.bf16.msra.mxu2 %v9441_v28  ;;  %v2008_v24 = vshrl.u32 %v10283_v13, 16 }
  0xfe   : > { %v1637_v26 = vmax.f32 %v1571_v25, 0.0  ;;  %1523 = vmatmul.bf16.gmra.mxu2 %v9319_v42  ;;  %v9783_v42 = vld [vmem:[%s9970_s20 + $0xc] sm:$0xe]  ;;  %v627_v52 = vor.u32 %v626_v38, %v622_v37  ;;  %v804_v25 = vpack.c.b16 %v788_v12, %v788_v12 }
  0xff   : > { %1612 = vmatmul.bf16.gmra.mxu3 %v972_v22  ;;  %v9784_v3 = vor.u32 %v9783_v42, %v9782_v41  ;;  %v636_v22 = vshll.u32 %v10276_v8, 16  ;;  %v986_v42 = vshrl.u32 %v10281_v11, 16 }
 0x100   : > { %1669 = vst [vmem:[%s10175_s12 + $0x48] sm:$0xff] %v1637_v26  ;;  %v632_v7 = vsel %vm452_vm0, %v627_v52, %v631_v53  ;;  %v2004_v26 = vshll.u32 %v10283_v13, 16  ;;  %v993_v44 = vshll.u32 %v804_v25, 16 }
 0x101   : > { %v1484_v32 = vpop.f32.mrf.mxu2  ;;  %v1308_v35 = vpop.f32.mrf.mxu0  ;;  %v2399_v18 = vshll.u32 %v9784_v3, 16  ;;  %v638_v41 = vrot.slane %v636_v22, 1 }
 0x102   : > { %v1573_v33 = vpop.f32.mrf.mxu3  ;;  %v1485_v34 = vadd.f32 %v1484_v32, %v1396_v27  ;;  %v1397_v36 = vpop.f32.mrf.mxu1  ;;  %v1309_v47 = vadd.f32 %v10152_v54, %v1308_v35  ;;  %v1997_v27 = vshrl.u32 %v9627_v62, 16  ;;  %v641_v32 = vshll.u32 %v451_v16, 16 }
 0x103   : > { %v2401_v35 = vrot.slane %v2399_v18, 1  ;;  %v10311_v50 = vrot.slane %v2004_v26, 1  ;;  %v639_v58 = vor.u32 %v638_v41, %v634_v39  ;;  %v991_v62 = vor.u32 %v990_v43, %v986_v42 }
 0x104   : > { %v1574_v46 = vadd.f32 %v1573_v33, %v1485_v34  ;;  %v1398_v60 = vadd.f32 %v1397_v36, %v1309_v47  ;;  %v2404_v33 = vshll.u32 %v10286_v17, 16  ;;  %v2397_v34 = vshrl.u32 %v9784_v3, 16  ;;  %v9786_v47 = vld [vmem:[%s9970_s20 + $0xc] sm:$0xe]  ;;  %v9433_v3 = vld [vmem:[%s12087_s1 + $0x278] sm:$0xff] }
 0x105   : > { %v643_v52 = vrot.slane %v641_v32, 1  ;;  %5149 = vmatpush.bf16.msra.mxu1 %v9433_v3 }
 0x106   : > { %v1638_v51 = vmax.f32 %v1574_v46, 0.0  ;;  %v9785_v46 = vld [vmem:[%s9970_s20 + $0xc] sm:$0xf0]  ;;  %v10313_v53 = vrot.slane %v2404_v33, 1  ;;  %v2402_v55 = vor.u32 %v2401_v35, %v2397_v34 }
 0x107   : > { %v644_v16 = vsel %vm452_vm0, %v639_v58, %v643_v52 }
 0x108   : > { %1670 = vst [vmem:[%s10175_s12 + $0x50] sm:$0xff] %v1638_v51 }
 0x109   : > { %v1486_v63 = vpop.f32.mrf.mxu2  ;;  %v1311_v5 = vpop.f32.mrf.mxu0 }
 0x10a   : > { %v1575_v0 = vpop.f32.mrf.mxu3  ;;  %v1487_v4 = vadd.f32 %v1486_v63, %v1398_v60  ;;  %v1400_v6 = vpop.f32.mrf.mxu1  ;;  %v1312_v9 = vadd.f32 %v10152_v54, %v1311_v5  ;;  %v9649_v60 = vld [vmem:[%s9970_s20 + $0x18] sm:$0xf0]  ;;  %v995_v63 = vrot.slane %v993_v44, 1 }
 0x10c   : > { %v1576_v14 = vadd.f32 %v1575_v0, %v1487_v4  ;;  %1350 = vmatmul.bf16.gmra.mxu0 %v10249_v19  ;;  %v1401_v21 = vadd.f32 %v1400_v6, %v1312_v9  ;;  %v2001_v19 = vrot.slane %v1999_v15, 1  ;;  %v1697_v0 = vld [vmem:[%s9970_s20 + $0x14] sm:$0x1]  ;;  %v2623_v6 = vshll.u32 %v10317_v59, 16 }
 0x10d   : > { %1439 = vmatmul.bf16.gmra.mxu1 %v632_v7  ;;  %v2407_v7 = vsel %vm452_vm0, %v2402_v55, %v10313_v53  ;;  %v2273_v9 = vunpack.c.l.b16 %v8204_v56  ;;  %v1873_v18 = vunpack.c.l.b16 %v1697_v0  ;;  %v996_v22 = vsel %vm452_vm0, %v991_v62, %v995_v63  ;;  %v10350_v62 = vld [vmem:[%s9970_s20 + $0x24] sm:$0xff]  }
 0x10e   : > { %v1639_v20 = vmax.f32 %v1576_v14, 0.0  ;;  %1528 = vmatmul.bf16.gmra.mxu2 %v10254_v23  ;;  %v9449_v23 = vld [vmem:[%s12087_s1 + $0x2f8] sm:$0xff]  ;;  %v2002_v51 = vor.u32 %v2001_v19, %v1997_v27  ;;  %v2643_v27 = vshll.u32 %v10261_v40, 16  ;;  %v2408_v19 = vshrl.u32 %v10286_v17, 16  ;;  %v9788_v63 = vld [vmem:[%s9970_s20 + $0x24] sm:$0xf0] }
 0x10f   : > { %1617 = vmatmul.bf16.gmra.mxu3 %v984_v10  ;;  %v9651_v10 = vor.u32 %v9650_v61, %v9649_v60  ;;  %v2651_v28 = vshll.u32 %v2407_v7, 16  ;;  %v10342_v13 = vpack.c.b16 %v1873_v18, %v1873_v18  ;;  %v9789_v0 = vld [vmem:[%s9970_s20 + $0x24] sm:$0xe] }
 0x110   : > { %1671 = vst [vmem:[%s10175_s12 + $0x58] sm:$0xff] %v1639_v20  ;;  %5327 = vmatpush.bf16.msra.mxu3 %v9449_v23  ;;  %v2007_v2 = vsel %vm452_vm0, %v2002_v51, %v10311_v50  ;;  %v9787_v20 = vor.u32 %v9786_v47, %v9785_v46  ;;  %v2625_v23 = vrot.slane %v2623_v6, 1  ;;  %v2656_v41 = vshll.u32 %v2408_v19, 16 }
 0x111   : > { %v1489_v30 = vpop.f32.mrf.mxu2  ;;  %v1313_v37 = vpop.f32.mrf.mxu0  ;;  %v2631_v25 = vshll.u32 %v2007_v2, 16  ;;  %v2629_v17 = vshrl.u32 %v2007_v2, 16  ;;  %v2653_v39 = vrot.slane %v2651_v28, 1  ;;  %v2018_v51 = vshll.u32 %v10342_v13, 16 }
 0x112   : > { %v1578_v31 = vpop.f32.mrf.mxu3  ;;  %v1490_v36 = vadd.f32 %v1489_v30, %v1401_v21  ;;  %v1402_v38 = vpop.f32.mrf.mxu1  ;;  %v1314_v49 = vadd.f32 %v10152_v54, %v1313_v37  ;;  %v10339_v30 = vpack.c.b16 %v2273_v9, %v2273_v9  ;;  %v2013_v34 = vshll.u32 %v9787_v20, 16  ;;  %v9628_v9 = vld [vmem:[%s9970_s20 + $0x18] sm:$0xf0] }
 0x113   : > { %v2633_v35 = vrot.slane %v2631_v25, 1  ;;  %v2645_v37 = vrot.slane %v2643_v27, 1  ;;  %v2626_v55 = vor.u32 %v2625_v23, %v2621_v29  ;;  %v2658_v61 = vrot.slane %v2656_v41, 1  ;;  %v10371_v25 = vld [vmem:[%s9970_s20 + $0x18] sm:$0xff]  }
 0x114   : > { %v1579_v48 = vadd.f32 %v1578_v31, %v1490_v36  ;;  %v1403_v1 = vadd.f32 %v1402_v38, %v1314_v49  ;;  %v2413_v31 = vshll.u32 %v9651_v10, 16  ;;  %v2636_v36 = vshll.u32 %v2008_v24, 16 }
 0x115   : > { %v2649_v38 = vshrl.u32 %v2407_v7, 16  ;;  %v2418_v44 = vshll.u32 %v10339_v30, 16  ;;  %v2015_v52 = vrot.slane %v2013_v34, 1  ;;  %v2634_v56 = vor.u32 %v2633_v35, %v2629_v17  ;;  %v1700_v7 = vld [vmem:[%s9970_s20 + $0x20] sm:$0x1] }
 0x116   : > { %v1640_v57 = vmax.f32 %v1579_v48, 0.0  ;;  %v2415_v46 = vrot.slane %v2413_v31, 1  ;;  %v2663_v24 = vshll.u32 %v10306_v45, 16  ;;  %v1876_v29 = vunpack.c.l.b16 %v1700_v7 }
 0x117   : > { %v10354_v2 = vrot.slane %v2418_v44, 1  ;;  %v2022_v31 = vshrl.u32 %v10342_v13, 16  ;;  %v2683_v17 = vshll.u32 %v10371_v25, 16  ;;  %v2422_v35 = vshrl.u32 %v10339_v30, 16 }
 0x118   : > { %1672 = vst [vmem:[%s10175_s12 + $0x60] sm:$0xff] %v1640_v57  ;;  %v2638_v57 = vrot.slane %v2636_v36, 1  ;;  %v2661_v36 = vshrl.u32 %v10306_v45, 16  ;;  %v10387_v13 = vpack.c.b16 %v1876_v29, %v1876_v29  ;;  %v2681_v30 = vshrl.u32 %v10371_v25, 16 }
 0x119   : > { %v1491_v4 = vpop.f32.mrf.mxu2  ;;  %v1316_v14 = vpop.f32.mrf.mxu0  ;;  %v2685_v45 = vrot.slane %v2683_v17, 1  ;;  %v9653_v17 = vld [vmem:[%s9970_s20 + $0x30] sm:$0xe] }
 0x11a   : > { %v1580_v5 = vpop.f32.mrf.mxu3  ;;  %v1492_v12 = vadd.f32 %v1491_v4, %v1403_v1  ;;  %v1405_v15 = vpop.f32.mrf.mxu1  ;;  %v1317_v21 = vadd.f32 %v10152_v54, %v1316_v14  ;;  %v2654_v1 = vor.u32 %v2653_v39, %v2649_v38  ;;  %v2627_v14 = vsel %vm452_vm0, %v2626_v55, %v10311_v50 }
 0x11c   : > { %v1581_v26 = vadd.f32 %v1580_v5, %v1492_v12  ;;  %1355 = vmatmul.bf16.gmra.mxu0 %v10276_v8  ;;  %v1406_v33 = vadd.f32 %v1405_v15, %v1317_v21  ;;  %v2641_v8 = vshrl.u32 %v10261_v40, 16  ;;  %v2011_v40 = vshrl.u32 %v9787_v20, 16 }
 0x11d   : > { %1444 = vmatmul.bf16.gmra.mxu1 %v644_v16  ;;  %v10356_v5 = vrot.slane %v2018_v51, 1  ;;  %v2639_v15 = vsel %vm452_vm0, %v2634_v56, %v2638_v57  ;;  %v8207_v16 = vld [vmem:[%s9970_s20 + $0x2c] sm:$0x1]  ;;  %v2696_v56 = vshll.u32 %v2422_v35, 16 }
 0x11e   : > { %v1641_v32 = vmax.f32 %v1581_v26, 0.0  ;;  %1533 = vmatmul.bf16.gmra.mxu2 %v10281_v11  ;;  %v2411_v11 = vshrl.u32 %v9651_v10, 16  ;;  %v2646_v60 = vor.u32 %v2645_v37, %v2641_v8  ;;  %v2016_v6 = vor.u32 %v2015_v52, %v2011_v40  ;;  %v9629_v10 = vld [vmem:[%s9970_s20 + $0x18] sm:$0xe] }
 0x11f   : > { %1622 = vmatmul.bf16.gmra.mxu3 %v996_v22  ;;  %v2659_v22 = vsel %vm452_vm0, %v2654_v1, %v2658_v61  ;;  %v10379_v23 = vor.u32 %v9629_v10, %v9628_v9  ;;  %v2665_v8 = vrot.slane %v2663_v24, 1 }
 0x120   : > { %1673 = vst [vmem:[%s10175_s12 + $0x68] sm:$0xff] %v1641_v32  ;;  %v2416_v3 = vor.u32 %v2415_v46, %v2411_v11  ;;  %v2647_v21 = vsel %vm452_vm0, %v2646_v60, %v10313_v53  ;;  %v2021_v28 = vsel %vm452_vm0, %v2016_v6, %v10356_v5  ;;  %v2276_v32 = vunpack.c.l.b16 %v8207_v16  ;;  %v9440_v46 = vld [vmem:[%s12087_s1 + $0x2b0] sm:$0xff]  ;;  %v10410_v6 = vld [vmem:[%s12088_s2] ss:$0 sm:$0xff] }
 0x121   : > { %v1494_v42 = vpop.f32.mrf.mxu2  ;;  %v1318_v48 = vpop.f32.mrf.mxu0  ;;  %v2671_v37 = vshll.u32 %v2021_v28, 16  ;;  %v2027_v41 = vshll.u32 %v10379_v23, 16  ;;  %v2669_v40 = vshrl.u32 %v2021_v28, 16  ;;  %v2032_v60 = vshll.u32 %v10387_v13, 16  ;;  %5239 = vmatpush.bf16.msra.mxu2 %v9440_v46  ;;  %v1703_v28 = vld [vmem:[%s9970_s20 + $0x2c] sm:$0x1] }
 0x122   : > { %v1583_v43 = vpop.f32.mrf.mxu3  ;;  %v1495_v47 = vadd.f32 %v1494_v42, %v1406_v33  ;;  %v1407_v49 = vpop.f32.mrf.mxu1  ;;  %v1319_v59 = vadd.f32 %v10152_v54, %v1318_v48  ;;  %v10375_v26 = vsel %vm452_vm0, %v2416_v3, %v10354_v2  ;;  %v9790_v33 = vor.u32 %v9789_v0, %v9788_v63  ;;  %v9448_v48 = vld [vmem:[%s12087_s1 + $0x2f0] sm:$0xff] }
 0x123   : > { %v2691_v38 = vshll.u32 %v10375_v26, 16  ;;  %v2676_v42 = vshll.u32 %v2022_v31, 16  ;;  %v2689_v11 = vshrl.u32 %v10375_v26, 16  ;;  %v2673_v52 = vrot.slane %v2671_v37, 1  ;;  %5328 = vmatpush.bf16.msra.mxu3 %v9448_v48 }
 0x124   : > { %v1584_v58 = vadd.f32 %v1583_v43, %v1495_v47  ;;  %v1408_v12 = vadd.f32 %v1407_v49, %v1319_v59  ;;  %v10391_v43 = vpack.c.b16 %v2276_v32, %v2276_v32  ;;  %v2427_v44 = vshll.u32 %v9790_v33, 16  ;;  %v9424_v47 = vld [vmem:[%s12087_s1 + $0x230] sm:$0xff] }
 0x125   : > { %v2693_v55 = vrot.slane %v2691_v38, 1  ;;  %v2025_v61 = vshrl.u32 %v10379_v23, 16  ;;  %v2029_v63 = vrot.slane %v2027_v41, 1  ;;  %5061 = vmatpush.bf16.msra.mxu0 %v9424_v47  ;;  %v2425_v1 = vshrl.u32 %v9790_v33, 16  ;;  %v8210_v33 = vld [vmem:[%s9970_s20 + $0x38] sm:$0x1] }
 0x126   : > { %v1642_v4 = vmax.f32 %v1584_v58, 0.0  ;;  %v2432_v0 = vshll.u32 %v10391_v43, 16  ;;  %v2429_v3 = vrot.slane %v2427_v44, 1  ;;  %v2666_v9 = vor.u32 %v2665_v8, %v2661_v36 }
 0x127   : > { %v2678_v10 = vrot.slane %v2676_v42, 1  ;;  %v2674_v16 = vor.u32 %v2673_v52, %v2669_v40  ;;  %v10420_v24 = vrot.slane %v2032_v60, 1  ;;  %v2030_v25 = vor.u32 %v2029_v63, %v2025_v61 }
 0x128   : > { %1674 = vst [vmem:[%s10175_s12 + $0x70] sm:$0xff] %v1642_v4  ;;  %v10422_v26 = vrot.slane %v2432_v0, 1  ;;  %v2436_v46 = vshrl.u32 %v10391_v43, 16 }
 0x129   : > { %v1496_v18 = vpop.f32.mrf.mxu2  ;;  %v1321_v50 = vpop.f32.mrf.mxu0  ;;  %v2679_v31 = vsel %vm452_vm0, %v2674_v16, %v2678_v10  ;;  %v2035_v38 = vsel %vm452_vm0, %v2030_v25, %v10420_v24  ;;  %v9795_v10 = vld [vmem:[%s9970_s20 + $0x3c] sm:$0xe] }
 0x12a   : > { %v1585_v20 = vpop.f32.mrf.mxu3  ;;  %v1497_v27 = vadd.f32 %v1496_v18, %v1408_v12  ;;  %v1410_v19 = vpop.f32.mrf.mxu1  ;;  %v1322_v53 = vadd.f32 %v10152_v54, %v1321_v50  ;;  %v10414_v12 = vld [vmem:[%s9970_s20 + $0x24] sm:$0xff]   ;;  %v10418_v18 = vor.u32 %v2685_v45, %v2681_v30  ;;  %v2279_v30 = vunpack.c.l.b16 %v8210_v33 }
 0x12b   : > { %v2711_v45 = vshll.u32 %v2035_v38, 16  ;;  %v2709_v52 = vshrl.u32 %v2035_v38, 16  ;;  %v2736_v61 = vshll.u32 %v2436_v46, 16  ;;  %v8213_v33 = vld [vmem:[%s9970_s20 + $0x44] sm:$0x1] }
 0x12c   : > { %v1586_v34 = vadd.f32 %v1585_v20, %v1497_v27  ;;  %3589 = vmatmul.bf16.vlgmr.msrb.gmra.mxu0 %v2627_v14  ;;  %v1411_v54 = vadd.f32 %v1410_v19, %v1322_v53  ;;  %v9791_v14 = vld [vmem:[%s9970_s20 + $0x24] sm:$0xf0]  ;;  %v2698_v20 = vrot.slane %v2696_v56, 1  ;;  %v2430_v27 = vor.u32 %v2429_v3, %v2425_v1  ;;  %v9432_v19 = vld [vmem:[%s12087_s1 + $0x270] sm:$0xff] }
 0x12d   : > { %3678 = vmatmul.bf16.vlgmr.msrb.gmra.mxu1 %v2639_v15  ;;  %v9792_v15 = vld [vmem:[%s9970_s20 + $0x24] sm:$0xe]  ;;  %v2667_v53 = vsel %vm452_vm0, %v2666_v9, %v10356_v5  ;;  %v2687_v32 = vsel %vm452_vm0, %v10418_v18, %v10354_v2  ;;  %v1879_v2 = vunpack.c.l.b16 %v1703_v28  ;;  %v10451_v56 = vpack.c.b16 %v2279_v30, %v2279_v30  ;;  %v10454_v9 = vld [vmem:[%s9970_s20 + $0x3c] sm:$0xff]   ;;  %v9631_v28 = vld [vmem:[%s9970_s20 + $0x30] sm:$0xf0] }
 0x12e   : > { %v1643_v39 = vmax.f32 %v1586_v34, 0.0  ;;  %3767 = vmatmul.bf16.vlgmr.msrb.gmra.mxu2 %v2647_v21  ;;  %v9652_v34 = vld [vmem:[%s9970_s20 + $0x30] sm:$0xf0]  ;;  %5150 = vmatpush.bf16.msra.mxu1 %v9432_v19  ;;  %v9793_v41 = vor.u32 %v9792_v15, %v9791_v14 }
 0x12f   : > { %3856 = vmatmul.bf16.vlgmr.msrb.gmra.mxu3 %v2659_v22  ;;  %v2694_v22 = vor.u32 %v2693_v55, %v2689_v11  ;;  %v9654_v44 = vor.u32 %v9653_v17, %v9652_v34  ;;  %v2723_v11 = vshll.u32 %v10350_v62, 16  ;;  %v2721_v55 = vshrl.u32 %v10350_v62, 16  ;;  %v9794_v62 = vld [vmem:[%s9970_s20 + $0x3c] sm:$0xf0] }
 0x130   : > { %1675 = vst [vmem:[%s10175_s12 + $0x78] sm:$0xff] %v1643_v39  ;;  %v2036_v39 = vshrl.u32 %v10387_v13, 16  ;;  %v2041_v40 = vshll.u32 %v9793_v41, 16  ;;  %v2039_v15 = vshrl.u32 %v9793_v41, 16  ;;  %v2446_v25 = vshll.u32 %v10451_v56, 16 }
 0x131   : > { %v1499_v49 = vpop.f32.mrf.mxu2  ;;  %v1323_v58 = vpop.f32.mrf.mxu0  ;;  %v2699_v37 = vsel %vm452_vm0, %v2694_v22, %v2698_v20  ;;  %v2725_v60 = vrot.slane %v2723_v11, 1  ;;  %v2439_v20 = vshrl.u32 %v9654_v44, 16  ;;  %v2707_v34 = vsel %vm452_vm0, %v10418_v18, %v10420_v24 }
 0x132   : > { %v1588_v51 = vpop.f32.mrf.mxu3  ;;  %v1500_v57 = vadd.f32 %v1499_v49, %v1411_v54  ;;  %v1412_v59 = vpop.f32.mrf.mxu1  ;;  %v1324_v7 = vadd.f32 %v10410_v6, %v1323_v58  ;;  %v2435_v54 = vsel %vm452_vm0, %v2430_v27, %v10422_v26  ;;  %v2716_v48 = vshll.u32 %v2036_v39, 16 }
 0x133   : > { %v2731_v49 = vshll.u32 %v2435_v54, 16  ;;  %v2043_v16 = vrot.slane %v2041_v40, 1  ;;  %v2726_v19 = vor.u32 %v2725_v60, %v2721_v55  ;;  %v10474_v38 = vrot.slane %v2446_v25, 1 }
 0x134   : > { %v1589_v4 = vadd.f32 %v1588_v51, %v1500_v57  ;;  %v1413_v50 = vadd.f32 %v1412_v59, %v1324_v7  ;;  %v10447_v51 = vpack.c.b16 %v1879_v2, %v1879_v2  ;;  %v2441_v57 = vshll.u32 %v9654_v44, 16 }
 0x135   : > { %v2713_v59 = vrot.slane %v2711_v45, 1  ;;  %v2718_v3 = vrot.slane %v2716_v48, 1  ;;  %v2733_v7 = vrot.slane %v2731_v49, 1  ;;  %v2727_v41 = vsel %vm452_vm0, %v2726_v19, %v10422_v26 }
 0x136   : > { %v1644_v21 = vmax.f32 %v1589_v4, 0.0  ;;  %v2729_v4 = vshrl.u32 %v2435_v54, 16  ;;  %v2046_v14 = vshll.u32 %v10447_v51, 16  ;;  %v2443_v27 = vrot.slane %v2441_v57, 1 }
 0x137   : > { %v2743_v18 = vshll.u32 %v10414_v12, 16  ;;  %v2282_v24 = vunpack.c.l.b16 %v8213_v33  ;;  %v2450_v55 = vshrl.u32 %v10451_v56, 16 }
 0x138   : > { %1676 = vst [vmem:[%s10175_s12 + $0x80] sm:$0xff] %v1644_v21  ;;  %v10468_v17 = vrot.slane %v2046_v14, 1  ;;  %v2444_v39 = vor.u32 %v2443_v27, %v2439_v20  ;;  %v9447_v14 = vld [vmem:[%s12087_s1 + $0x2e8] sm:$0xff] }
 0x139   : > { %v1501_v29 = vpop.f32.mrf.mxu2  ;;  %v1326_v36 = vpop.f32.mrf.mxu0  ;;  %5329 = vmatpush.bf16.msra.mxu3 %v9447_v14 }
 0x13a   : > { %v1590_v23 = vpop.f32.mrf.mxu3  ;;  %v1502_v35 = vadd.f32 %v1501_v29, %v1413_v50  ;;  %v1415_v8 = vpop.f32.mrf.mxu1  ;;  %v1327_v5 = vadd.f32 %v10410_v6, %v1326_v36  ;;  %v1706_v50 = vld [vmem:[%s9970_s20 + $0x38] sm:$0x1]  ;;  %v9632_v29 = vld [vmem:[%s9970_s20 + $0x30] sm:$0xe] }
 0x13b   : > { %v1882_v36 = vunpack.c.l.b16 %v1706_v50 }
 0x13c   : > { %v1591_v42 = vadd.f32 %v1590_v23, %v1502_v35  ;;  %3594 = vmatmul.bf16.gmra.mxu0 %v2667_v53  ;;  %v1416_v47 = vadd.f32 %v1415_v8, %v1327_v5  ;;  %v2714_v53 = vor.u32 %v2713_v59, %v2709_v52  ;;  %v2044_v35 = vor.u32 %v2043_v16, %v2039_v15 }
 0x13d   : > { %3683 = vmatmul.bf16.gmra.mxu1 %v2679_v31  ;;  %v2734_v31 = vor.u32 %v2733_v7, %v2729_v4  ;;  %v10476_v5 = vor.u32 %v9632_v29, %v9631_v28  ;;  %v10490_v49 = vpack.c.b16 %v1882_v36, %v1882_v36  ;;  %v2449_v52 = vsel %vm452_vm0, %v2444_v39, %v10474_v38 }
 0x13e   : > { %v1645_v13 = vmax.f32 %v1591_v42, 0.0  ;;  %3772 = vmatmul.bf16.gmra.mxu2 %v2687_v32  ;;  %v2738_v32 = vrot.slane %v2736_v61, 1  ;;  %v10481_v42 = vor.u32 %v9795_v10, %v9794_v62  ;;  %v2719_v11 = vsel %vm452_vm0, %v2714_v53, %v2718_v3  ;;  %v9439_v62 = vld [vmem:[%s12087_s1 + $0x2a8] sm:$0xff]  ;;  %v10518_v53 = vld [vmem:[%s9970_s20 + $0x3c] sm:$0xff]  }
 0x13f   : > { %3861 = vmatmul.bf16.gmra.mxu3 %v2699_v37  ;;  %v10472_v37 = vld [vmem:[%s9970_s20 + $0x30] sm:$0xff]   ;;  %v2049_v48 = vsel %vm452_vm0, %v2044_v35, %v10468_v17  ;;  %v2055_v57 = vshll.u32 %v10476_v5, 16  ;;  %v2771_v3 = vshll.u32 %v2449_v52, 16  ;;  %v2060_v4 = vshll.u32 %v10490_v49, 16  ;;  %v9423_v10 = vld [vmem:[%s12087_s1 + $0x228] sm:$0xff]  ;;  %5240 = vmatpush.bf16.msra.mxu2 %v9439_v62 }
 0x140   : > { %1677 = vst [vmem:[%s10175_s12 + $0x88] sm:$0xff] %v1645_v13  ;;  %v2739_v46 = vsel %vm452_vm0, %v2734_v31, %v2738_v32  ;;  %v2050_v13 = vshrl.u32 %v10447_v51, 16  ;;  %v2763_v26 = vshll.u32 %v10472_v37, 16  ;;  %v2741_v51 = vshrl.u32 %v10414_v12, 16  ;;  %5062 = vmatpush.bf16.msra.mxu0 %v9423_v10  ;;  %v9797_v31 = vld [vmem:[%s9970_s20 + $0x3c] sm:$0xf0] }
 0x141   : > { %v1504_v43 = vpop.f32.mrf.mxu2  ;;  %v1328_v0 = vpop.f32.mrf.mxu0  ;;  %v2455_v59 = vshll.u32 %v10481_v42, 16  ;;  %v2761_v56 = vshrl.u32 %v10472_v37, 16  ;;  %v2053_v12 = vshrl.u32 %v10476_v5, 16  ;;  %v2057_v7 = vrot.slane %v2055_v57, 1  ;;  %v9798_v32 = vld [vmem:[%s9970_s20 + $0x3c] sm:$0xe] }
 0x142   : > { %v1593_v58 = vpop.f32.mrf.mxu3  ;;  %v1505_v63 = vadd.f32 %v1504_v43, %v1416_v47  ;;  %v1417_v1 = vpop.f32.mrf.mxu1  ;;  %v1329_v22 = vadd.f32 %v10410_v6, %v1328_v0  ;;  %v2745_v43 = vrot.slane %v2743_v18, 1  ;;  %v10500_v0 = vshll.u32 %v2050_v13, 16 }
 0x143   : > { %v2457_v25 = vrot.slane %v2455_v59, 1  ;;  %v2749_v28 = vshrl.u32 %v2049_v48, 16  ;;  %v2773_v35 = vrot.slane %v2771_v3, 1  ;;  %v10525_v37 = vrot.slane %v2060_v4, 1 }
 0x144   : > { %v1594_v21 = vadd.f32 %v1593_v58, %v1505_v63  ;;  %v1418_v8 = vadd.f32 %v1417_v1, %v1329_v22  ;;  %v10497_v58 = vpack.c.b16 %v2282_v24, %v2282_v24  ;;  %v2751_v63 = vshll.u32 %v2049_v48, 16  ;;  %v9431_v48 = vld [vmem:[%s12087_s1 + $0x268] sm:$0xff] }
 0x145   : > { %v2765_v1 = vrot.slane %v2763_v26, 1  ;;  %v2746_v20 = vor.u32 %v2745_v43, %v2741_v51  ;;  %v2453_v22 = vshrl.u32 %v10481_v42, 16  ;;  %v2058_v39 = vor.u32 %v2057_v7, %v2053_v12  ;;  %v1709_v42 = vld [vmem:[%s9970_s20 + $0x44] sm:$0x1]  ;;  %5151 = vmatpush.bf16.msra.mxu1 %v9431_v48 }
 0x146   : > { %v1646_v23 = vmax.f32 %v1594_v21, 0.0  ;;  %v2460_v21 = vshll.u32 %v10497_v58, 16  ;;  %v2753_v29 = vrot.slane %v2751_v63, 1  ;;  %v2758_v18 = vrot.slane %v10500_v0, 1 }
 0x147   : > { %v10522_v33 = vor.u32 %v2765_v1, %v2761_v56  ;;  %v2747_v13 = vsel %vm452_vm0, %v2746_v20, %v10468_v17  ;;  %v1885_v57 = vunpack.c.l.b16 %v1709_v42  ;;  %v9799_v51 = vor.u32 %v9798_v32, %v9797_v31 }
 0x148   : > { %1678 = vst [vmem:[%s10175_s12 + $0x90] sm:$0xff] %v1646_v23  ;;  %v2776_v23 = vshll.u32 %v2450_v55, 16  ;;  %v10527_v5 = vrot.slane %v2460_v21, 1  ;;  %v2064_v56 = vshrl.u32 %v10490_v49, 16  ;;  %v2803_v1 = vshll.u32 %v10454_v9, 16 }
 0x149   : > { %v1506_v54 = vpop.f32.mrf.mxu2  ;;  %v1331_v44 = vpop.f32.mrf.mxu0  ;;  %v2464_v12 = vshrl.u32 %v10497_v58, 16  ;;  %v10553_v62 = vpack.c.b16 %v1885_v57, %v1885_v57  ;;  %v2069_v10 = vshll.u32 %v9799_v51, 16  ;;  %v2067_v31 = vshrl.u32 %v9799_v51, 16 }
 0x14a   : > { %v1595_v2 = vpop.f32.mrf.mxu3  ;;  %v1507_v30 = vadd.f32 %v1506_v54, %v1418_v8  ;;  %v1420_v45 = vpop.f32.mrf.mxu1  ;;  %v1332_v47 = vadd.f32 %v10410_v6, %v1331_v44  ;;  %v2458_v54 = vor.u32 %v2457_v25, %v2453_v22  ;;  %v2778_v24 = vrot.slane %v2776_v23, 1  ;;  %v8216_v44 = vld [vmem:[%s9970_s20 + $0x50] sm:$0x1] }
 0x14b   : > { %v2796_v21 = vshll.u32 %v2064_v56, 16  ;;  %v2801_v22 = vshrl.u32 %v10454_v9, 16  ;;  %v2805_v25 = vrot.slane %v2803_v1, 1  ;;  %v2074_v23 = vshll.u32 %v10553_v62, 16  ;;  %v10589_v56 = vld [vmem:[%s9970_s20 + $0x48] sm:$0xff]  }
 0x14c   : > { %v1596_v40 = vadd.f32 %v1595_v2, %v1507_v30  ;;  %3599 = vmatmul.bf16.gmra.mxu0 %v2707_v34  ;;  %v1421_v61 = vadd.f32 %v1420_v45, %v1332_v47  ;;  %v2769_v34 = vshrl.u32 %v2449_v52, 16  ;;  %v9655_v45 = vld [vmem:[%s9970_s20 + $0x48] sm:$0xf0]  ;;  %v2767_v47 = vsel %vm452_vm0, %v10522_v33, %v10474_v38 }
 0x14d   : > { %3688 = vmatmul.bf16.gmra.mxu1 %v2719_v11  ;;  %v9656_v11 = vld [vmem:[%s9970_s20 + $0x48] sm:$0xe]  ;;  %v2063_v52 = vsel %vm452_vm0, %v2058_v39, %v10525_v37  ;;  %v2463_v55 = vsel %vm452_vm0, %v2458_v54, %v10527_v5  ;;  %v2285_v38 = vunpack.c.l.b16 %v8216_v44  ;;  %v2071_v32 = vrot.slane %v2069_v10, 1  ;;  %v9800_v44 = vld [vmem:[%s9970_s20 + $0x54] sm:$0xf0] }
 0x14e   : > { %v1647_v60 = vmax.f32 %v1596_v40, 0.0  ;;  %3777 = vmatmul.bf16.gmra.mxu2 %v2727_v41  ;;  %v2754_v41 = vor.u32 %v2753_v29, %v2749_v28  ;;  %v2774_v30 = vor.u32 %v2773_v35, %v2769_v34  ;;  %v2791_v4 = vshll.u32 %v2063_v52, 16 }
 0x14f   : > { %3866 = vmatmul.bf16.gmra.mxu3 %v2739_v46  ;;  %v2811_v7 = vshll.u32 %v2463_v55, 16  ;;  %v2789_v20 = vshrl.u32 %v2063_v52, 16  ;;  %v2798_v54 = vrot.slane %v2796_v21, 1  ;;  %v9634_v52 = vld [vmem:[%s9970_s20 + $0x48] sm:$0xf0]  ;;  %v2787_v51 = vsel %vm452_vm0, %v10522_v33, %v10525_v37 }
 0x150   : > { %1679 = vst [vmem:[%s10175_s12 + $0x98] sm:$0xff] %v1647_v60  ;;  %v2759_v60 = vsel %vm452_vm0, %v2754_v41, %v2758_v18  ;;  %v2779_v0 = vsel %vm452_vm0, %v2774_v30, %v2778_v24  ;;  %v2793_v58 = vrot.slane %v2791_v4, 1  ;;  %v10563_v30 = vld [vmem:[%s9970_s20 + $0x54] sm:$0xff]   ;;  %v2821_v21 = vshrl.u32 %v10518_v53, 16 }
 0x151   : > { %v1509_v15 = vpop.f32.mrf.mxu2  ;;  %v1333_v50 = vpop.f32.mrf.mxu0 }
 0x152   : > { %v1598_v16 = vpop.f32.mrf.mxu3  ;;  %v1510_v27 = vadd.f32 %v1509_v15, %v1421_v61  ;;  %v1422_v19 = vpop.f32.mrf.mxu1  ;;  %v1334_v8 = vadd.f32 %v10410_v6, %v1333_v50  ;;  %v9657_v61 = vor.u32 %v9656_v11, %v9655_v45  ;;  %v2813_v50 = vrot.slane %v2811_v7, 1  ;;  %v9801_v45 = vld [vmem:[%s9970_s20 + $0x54] sm:$0xe] }
 0x153   : > { %v2794_v24 = vor.u32 %v2793_v58, %v2789_v20  ;;  %v2078_v7 = vshrl.u32 %v10553_v62, 16 }
 0x154   : > { %v1599_v36 = vadd.f32 %v1598_v16, %v1510_v27  ;;  %v1423_v46 = vadd.f32 %v1422_v19, %v1334_v8  ;;  %v10555_v16 = vpack.c.b16 %v2285_v38, %v2285_v38  ;;  %v2469_v49 = vshll.u32 %v9657_v61, 16 }
 0x155   : > { %v2809_v27 = vshrl.u32 %v2463_v55, 16  ;;  %v2816_v19 = vshll.u32 %v2464_v12, 16  ;;  %v2467_v8 = vshrl.u32 %v9657_v61, 16  ;;  %v9635_v55 = vld [vmem:[%s9970_s20 + $0x48] sm:$0xe]  ;;  %v2799_v38 = vsel %vm452_vm0, %v2794_v24, %v2798_v54 }
 0x156   : > { %v1648_v2 = vmax.f32 %v1599_v36, 0.0  ;;  %v2474_v9 = vshll.u32 %v10555_v16, 16  ;;  %v2471_v39 = vrot.slane %v2469_v49, 1  ;;  %v9636_v4 = vor.u32 %v9635_v55, %v9634_v52 }
 0x157   : > { %v2818_v42 = vrot.slane %v2816_v19, 1  ;;  %v2814_v11 = vor.u32 %v2813_v50, %v2809_v27  ;;  %v2843_v49 = vshll.u32 %v10589_v56, 16  ;;  %v2478_v20 = vshrl.u32 %v10555_v16, 16 }
 0x158   : > { %1680 = vst [vmem:[%s10175_s12 + $0xa0] sm:$0xff] %v1648_v2  ;;  %v2806_v2 = vor.u32 %v2805_v25, %v2801_v22  ;;  %v10569_v48 = vrot.slane %v2474_v9, 1  ;;  %v2083_v19 = vshll.u32 %v9636_v4, 16 }
 0x159   : > { %v1511_v26 = vpop.f32.mrf.mxu2  ;;  %v1336_v17 = vpop.f32.mrf.mxu0  ;;  %v2819_v61 = vsel %vm452_vm0, %v2814_v11, %v2818_v42 }
 0x15a   : > { %v1600_v40 = vpop.f32.mrf.mxu3  ;;  %v1512_v43 = vadd.f32 %v1511_v26, %v1423_v46  ;;  %v1425_v59 = vpop.f32.mrf.mxu1  ;;  %v1337_v63 = vadd.f32 %v10410_v6, %v1336_v17  ;;  %v10567_v46 = vrot.slane %v2074_v23, 1  ;;  %v2472_v26 = vor.u32 %v2471_v39, %v2467_v8  ;;  %v8219_v17 = vld [vmem:[%s9970_s20 + $0x5c] sm:$0x1] }
 0x15b   : > { %v2288_v10 = vunpack.c.l.b16 %v8219_v17 }
 0x15c   : > { %v1601_v3 = vadd.f32 %v1600_v40, %v1512_v43  ;;  %3604 = vmatmul.bf16.gmra.mxu0 %v2747_v13  ;;  %v1426_v15 = vadd.f32 %v1425_v59, %v1337_v63  ;;  %v2072_v13 = vor.u32 %v2071_v32, %v2067_v31  ;;  %v1712_v40 = vld [vmem:[%s9970_s20 + $0x50] sm:$0x1]  ;;  %v2807_v43 = vsel %vm452_vm0, %v2806_v2, %v10527_v5  ;;  %v9438_v32 = vld [vmem:[%s12087_s1 + $0x2a0] sm:$0xff] }
 0x15d   : > { %3693 = vmatmul.bf16.gmra.mxu1 %v2759_v60  ;;  %v2823_v63 = vshll.u32 %v10518_v53, 16  ;;  %v2477_v5 = vsel %vm452_vm0, %v2472_v26, %v10569_v48  ;;  %v10602_v16 = vpack.c.b16 %v2288_v10, %v2288_v10  ;;  %v2845_v31 = vrot.slane %v2843_v49, 1  ;;  %5241 = vmatpush.bf16.msra.mxu2 %v9438_v32  ;;  %v9659_v49 = vld [vmem:[%s9970_s20 + $0x60] sm:$0xe] }
 0x15e   : > { %v1649_v14 = vmax.f32 %v1601_v3, 0.0  ;;  %3782 = vmatmul.bf16.gmra.mxu2 %v2767_v47  ;;  %v1888_v3 = vunpack.c.l.b16 %v1712_v40  ;;  %v2851_v58 = vshll.u32 %v2477_v5, 16  ;;  %v2849_v39 = vshrl.u32 %v2477_v5, 16  ;;  %v1715_v5 = vld [vmem:[%s9970_s20 + $0x5c] sm:$0x1] }
 0x15f   : > { %3871 = vmatmul.bf16.gmra.mxu3 %v2779_v0  ;;  %v10586_v0 = vsel %vm452_vm0, %v2072_v13, %v10567_v46  ;;  %v2825_v22 = vrot.slane %v2823_v63, 1  ;;  %v2856_v2 = vshll.u32 %v2478_v20, 16  ;;  %v2488_v11 = vshll.u32 %v10602_v16, 16 }
 0x160   : > { %1681 = vst [vmem:[%s10175_s12 + $0xa8] sm:$0xff] %v1649_v14  ;;  %v9802_v14 = vor.u32 %v9801_v45, %v9800_v44  ;;  %v2831_v25 = vshll.u32 %v10586_v0, 16  ;;  %v10599_v62 = vpack.c.b16 %v1888_v3, %v1888_v3  ;;  %v2829_v53 = vshrl.u32 %v10586_v0, 16 }
 0x161   : > { %v1514_v28 = vpop.f32.mrf.mxu2  ;;  %v1338_v35 = vpop.f32.mrf.mxu0  ;;  %v2853_v54 = vrot.slane %v2851_v58, 1  ;;  %v2081_v44 = vshrl.u32 %v9636_v4, 16  ;;  %v2085_v45 = vrot.slane %v2083_v19, 1  ;;  %v2826_v52 = vor.u32 %v2825_v22, %v2821_v21 }
 0x162   : > { %v1603_v29 = vpop.f32.mrf.mxu3  ;;  %v1515_v34 = vadd.f32 %v1514_v28, %v1426_v15  ;;  %v1427_v36 = vpop.f32.mrf.mxu1  ;;  %v1339_v18 = vadd.f32 %v10410_v6, %v1338_v35  ;;  %v2836_v28 = vshll.u32 %v2078_v7, 16  ;;  %v2483_v23 = vshll.u32 %v9802_v14, 16  ;;  %v9446_v35 = vld [vmem:[%s12087_s1 + $0x2e0] sm:$0xff] }
 0x163   : > { %v2833_v8 = vrot.slane %v2831_v25, 1  ;;  %v2088_v42 = vshll.u32 %v10599_v62, 16  ;;  %v2481_v13 = vshrl.u32 %v9802_v14, 16  ;;  %5330 = vmatpush.bf16.msra.mxu3 %v9446_v35  ;;  %v2086_v0 = vor.u32 %v2085_v45, %v2081_v44  ;;  %v8222_v14 = vld [vmem:[%s9970_s20 + $0x68] sm:$0x1] }
 0x164   : > { %v1604_v41 = vadd.f32 %v1603_v29, %v1515_v34  ;;  %v1428_v57 = vadd.f32 %v1427_v36, %v1339_v18  ;;  %v2841_v29 = vshrl.u32 %v10589_v56, 16  ;;  %v9422_v34 = vld [vmem:[%s12087_s1 + $0x220] sm:$0xff]  ;;  %v2838_v55 = vrot.slane %v2836_v28, 1 }
 0x165   : > { %5063 = vmatpush.bf16.msra.mxu0 %v9422_v34  ;;  %v2834_v17 = vor.u32 %v2833_v8, %v2829_v53  ;;  %v10625_v63 = vrot.slane %v2088_v42, 1  ;;  %v10627_v56 = vrot.slane %v2488_v11, 1  ;;  %v2492_v32 = vshrl.u32 %v10602_v16, 16 }
 0x166   : > { %v1650_v47 = vmax.f32 %v1604_v41, 0.0 }
 0x167   : > { %v2839_v7 = vsel %vm452_vm0, %v2834_v17, %v2838_v55  ;;  %v2091_v58 = vsel %vm452_vm0, %v2086_v0, %v10625_v63  ;;  %v2896_v44 = vshll.u32 %v2492_v32, 16  ;;  %v9807_v55 = vld [vmem:[%s9970_s20 + $0x6c] sm:$0xe] }
 0x168   : > { %1682 = vst [vmem:[%s10175_s12 + $0xb0] sm:$0xff] %v1650_v47  ;;  %v2485_v47 = vrot.slane %v2483_v23, 1  ;;  %v2871_v53 = vshll.u32 %v2091_v58, 16 }
 0x169   : > { %v1516_v59 = vpop.f32.mrf.mxu2  ;;  %v1341_v33 = vpop.f32.mrf.mxu0 }
 0x16a   : > { %v1605_v60 = vpop.f32.mrf.mxu3  ;;  %v1517_v1 = vadd.f32 %v1516_v59, %v1428_v57  ;;  %v1430_v37 = vpop.f32.mrf.mxu1  ;;  %v1342_v12 = vadd.f32 %v10410_v6, %v1341_v33  ;;  %v10619_v57 = vld [vmem:[%s9970_s20 + $0x54] sm:$0xff]   ;;  %v10623_v59 = vor.u32 %v2845_v31, %v2841_v29  ;;  %v2291_v29 = vunpack.c.l.b16 %v8222_v14 }
 0x16b   : > { %v2883_v31 = vshll.u32 %v10563_v30, 16  ;;  %v8225_v14 = vld [vmem:[%s9970_s20 + $0x74] sm:$0x1] }
 0x16c   : > { %v1606_v15 = vadd.f32 %v1605_v60, %v1517_v1  ;;  %3609 = vmatmul.bf16.gmra.mxu0 %v2787_v51  ;;  %v1431_v50 = vadd.f32 %v1430_v37, %v1342_v12  ;;  %v9803_v51 = vld [vmem:[%s9970_s20 + $0x54] sm:$0xf0]  ;;  %v2858_v60 = vrot.slane %v2856_v2, 1  ;;  %v2486_v1 = vor.u32 %v2485_v47, %v2481_v13  ;;  %v9430_v37 = vld [vmem:[%s12087_s1 + $0x260] sm:$0xff] }
 0x16d   : > { %3698 = vmatmul.bf16.gmra.mxu1 %v2799_v38  ;;  %v2827_v12 = vsel %vm452_vm0, %v2826_v52, %v10567_v46  ;;  %v2847_v10 = vsel %vm452_vm0, %v10623_v59, %v10569_v48  ;;  %v1891_v48 = vunpack.c.l.b16 %v1715_v5  ;;  %v10656_v2 = vpack.c.b16 %v2291_v29, %v2291_v29  ;;  %v10659_v52 = vld [vmem:[%s9970_s20 + $0x6c] sm:$0xff]   ;;  %v9637_v5 = vld [vmem:[%s9970_s20 + $0x60] sm:$0xf0] }
 0x16e   : > { %v1651_v27 = vmax.f32 %v1606_v15, 0.0  ;;  %3787 = vmatmul.bf16.gmra.mxu2 %v2807_v43  ;;  %v9804_v43 = vld [vmem:[%s9970_s20 + $0x54] sm:$0xe]  ;;  %v9658_v15 = vld [vmem:[%s9970_s20 + $0x60] sm:$0xf0]  ;;  %5152 = vmatpush.bf16.msra.mxu1 %v9430_v37  ;;  %v2885_v42 = vrot.slane %v2883_v31, 1 }
 0x16f   : > { %3876 = vmatmul.bf16.gmra.mxu3 %v2819_v61  ;;  %v2854_v61 = vor.u32 %v2853_v54, %v2849_v39  ;;  %v9805_v19 = vor.u32 %v9804_v43, %v9803_v51  ;;  %v9660_v23 = vor.u32 %v9659_v49, %v9658_v15  ;;  %v2869_v39 = vshrl.u32 %v2091_v58, 16 }
 0x170   : > { %1683 = vst [vmem:[%s10175_s12 + $0xb8] sm:$0xff] %v1651_v27  ;;  %v2092_v27 = vshrl.u32 %v10599_v62, 16  ;;  %v2881_v54 = vshrl.u32 %v10563_v30, 16  ;;  %v9806_v30 = vld [vmem:[%s9970_s20 + $0x6c] sm:$0xf0]  ;;  %v2502_v0 = vshll.u32 %v10656_v2, 16  ;;  %v2867_v15 = vsel %vm452_vm0, %v10623_v59, %v10625_v63 }
 0x171   : > { %v1519_v36 = vpop.f32.mrf.mxu2  ;;  %v1343_v18 = vpop.f32.mrf.mxu0  ;;  %v2859_v25 = vsel %vm452_vm0, %v2854_v61, %v2858_v60  ;;  %v2097_v8 = vshll.u32 %v9805_v19, 16  ;;  %v2095_v43 = vshrl.u32 %v9805_v19, 16  ;;  %v2495_v60 = vshrl.u32 %v9660_v23, 16 }
 0x172   : > { %v1608_v9 = vpop.f32.mrf.mxu3  ;;  %v1520_v41 = vadd.f32 %v1519_v36, %v1431_v50  ;;  %v1432_v24 = vpop.f32.mrf.mxu1  ;;  %v1344_v40 = vadd.f32 %v10410_v6, %v1343_v18  ;;  %v2491_v50 = vsel %vm452_vm0, %v2486_v1, %v10627_v56  ;;  %v2876_v35 = vshll.u32 %v2092_v27, 16 }
 0x173   : > { %v2891_v36 = vshll.u32 %v2491_v50, 16  ;;  %v2099_v17 = vrot.slane %v2097_v8, 1  ;;  %v2886_v37 = vor.u32 %v2885_v42, %v2881_v54  ;;  %v10679_v58 = vrot.slane %v2502_v0, 1 }
 0x174   : > { %v1609_v26 = vadd.f32 %v1608_v9, %v1520_v41  ;;  %v1433_v33 = vadd.f32 %v1432_v24, %v1344_v40  ;;  %v10652_v9 = vpack.c.b16 %v1891_v48, %v1891_v48  ;;  %v2497_v41 = vshll.u32 %v9660_v23, 16 }
 0x175   : > { %v2873_v24 = vrot.slane %v2871_v53, 1  ;;  %v2878_v47 = vrot.slane %v2876_v35, 1  ;;  %v2893_v40 = vrot.slane %v2891_v36, 1  ;;  %v2887_v19 = vsel %vm452_vm0, %v2886_v37, %v10627_v56 }
 0x176   : > { %v1652_v38 = vmax.f32 %v1609_v26, 0.0  ;;  %v2889_v26 = vshrl.u32 %v2491_v50, 16  ;;  %v2102_v51 = vshll.u32 %v10652_v9, 16  ;;  %v2499_v1 = vrot.slane %v2497_v41, 1 }
 0x177   : > { %v2903_v59 = vshll.u32 %v10619_v57, 16  ;;  %v2294_v63 = vunpack.c.l.b16 %v8225_v14  ;;  %v2506_v54 = vshrl.u32 %v10656_v2, 16 }
 0x178   : > { %1684 = vst [vmem:[%s10175_s12 + $0xc0] sm:$0xff] %v1652_v38  ;;  %v10673_v49 = vrot.slane %v2102_v51, 1  ;;  %v2500_v27 = vor.u32 %v2499_v1, %v2495_v60  ;;  %v9445_v51 = vld [vmem:[%s12087_s1 + $0x2d8] sm:$0xff] }
 0x179   : > { %v1521_v3 = vpop.f32.mrf.mxu2  ;;  %v1346_v21 = vpop.f32.mrf.mxu0  ;;  %5331 = vmatpush.bf16.msra.mxu3 %v9445_v51 }
 0x17a   : > { %v1610_v4 = vpop.f32.mrf.mxu3  ;;  %v1522_v20 = vadd.f32 %v1521_v3, %v1433_v33  ;;  %v1435_v22 = vpop.f32.mrf.mxu1  ;;  %v1347_v46 = vadd.f32 %v10410_v6, %v1346_v21  ;;  %v1718_v33 = vld [vmem:[%s9970_s20 + $0x68] sm:$0x1]  ;;  %v9638_v3 = vld [vmem:[%s9970_s20 + $0x60] sm:$0xe] }
 0x17b   : > { %v1894_v21 = vunpack.c.l.b16 %v1718_v33 }
 0x17c   : > { %v1611_v28 = vadd.f32 %v1610_v4, %v1522_v20  ;;  %3614 = vmatmul.bf16.gmra.mxu0 %v2827_v12  ;;  %v1436_v34 = vadd.f32 %v1435_v22, %v1347_v46  ;;  %v2874_v12 = vor.u32 %v2873_v24, %v2869_v39  ;;  %v2100_v20 = vor.u32 %v2099_v17, %v2095_v43 }
 0x17d   : > { %3703 = vmatmul.bf16.gmra.mxu1 %v2839_v7  ;;  %v2894_v7 = vor.u32 %v2893_v40, %v2889_v26  ;;  %v10681_v46 = vor.u32 %v9638_v3, %v9637_v5  ;;  %v10695_v36 = vpack.c.b16 %v1894_v21, %v1894_v21  ;;  %v2505_v39 = vsel %vm452_vm0, %v2500_v27, %v10679_v58 }
 0x17e   : > { %v1653_v62 = vmax.f32 %v1611_v28, 0.0  ;;  %3792 = vmatmul.bf16.gmra.mxu2 %v2847_v10  ;;  %v2898_v10 = vrot.slane %v2896_v44, 1  ;;  %v10686_v28 = vor.u32 %v9807_v55, %v9806_v30  ;;  %v2879_v31 = vsel %vm452_vm0, %v2874_v12, %v2878_v47  ;;  %v9437_v30 = vld [vmem:[%s12087_s1 + $0x298] sm:$0xff]  ;;  %v10723_v12 = vld [vmem:[%s9970_s20 + $0x6c] sm:$0xff]  }
 0x17f   : > { %3881 = vmatmul.bf16.gmra.mxu3 %v2859_v25  ;;  %v10677_v25 = vld [vmem:[%s9970_s20 + $0x60] sm:$0xff]   ;;  %v2105_v35 = vsel %vm452_vm0, %v2100_v20, %v10673_v49  ;;  %v2111_v41 = vshll.u32 %v10681_v46, 16  ;;  %v2931_v47 = vshll.u32 %v2505_v39, 16  ;;  %v2116_v26 = vshll.u32 %v10695_v36, 16  ;;  %v9421_v55 = vld [vmem:[%s12087_s1 + $0x218] sm:$0xff]  ;;  %5242 = vmatpush.bf16.msra.mxu2 %v9437_v30 }
 0x180   : > { %1685 = vst [vmem:[%s10175_s12 + $0xc8] sm:$0xff] %v1653_v62  ;;  %v2899_v32 = vsel %vm452_vm0, %v2894_v7, %v2898_v10  ;;  %v2106_v62 = vshrl.u32 %v10652_v9, 16  ;;  %v2923_v56 = vshll.u32 %v10677_v25, 16  ;;  %v2901_v9 = vshrl.u32 %v10619_v57, 16  ;;  %5064 = vmatpush.bf16.msra.mxu0 %v9421_v55  ;;  %v9809_v7 = vld [vmem:[%s9970_s20 + $0x6c] sm:$0xf0] }
 0x181   : > { %v1524_v16 = vpop.f32.mrf.mxu2  ;;  %v1348_v11 = vpop.f32.mrf.mxu0  ;;  %v2511_v24 = vshll.u32 %v10686_v28, 16  ;;  %v2921_v2 = vshrl.u32 %v10677_v25, 16  ;;  %v2109_v57 = vshrl.u32 %v10681_v46, 16  ;;  %v2113_v40 = vrot.slane %v2111_v41, 1  ;;  %v9810_v10 = vld [vmem:[%s9970_s20 + $0x6c] sm:$0xe] }
 0x182   : > { %v1613_v18 = vpop.f32.mrf.mxu3  ;;  %v1525_v45 = vadd.f32 %v1524_v16, %v1436_v34  ;;  %v1437_v13 = vpop.f32.mrf.mxu1  ;;  %v1349_v61 = vadd.f32 %v10410_v6, %v1348_v11  ;;  %v2905_v16 = vrot.slane %v2903_v59, 1  ;;  %v10705_v11 = vshll.u32 %v2106_v62, 16 }
 0x183   : > { %v2513_v0 = vrot.slane %v2511_v24, 1  ;;  %v2909_v5 = vshrl.u32 %v2105_v35, 16  ;;  %v2933_v20 = vrot.slane %v2931_v47, 1  ;;  %v10730_v25 = vrot.slane %v2116_v26, 1 }
 0x184   : > { %v1614_v38 = vadd.f32 %v1613_v18, %v1525_v45  ;;  %v1438_v22 = vadd.f32 %v1437_v13, %v1349_v61  ;;  %v10702_v18 = vpack.c.b16 %v2294_v63, %v2294_v63  ;;  %v2911_v45 = vshll.u32 %v2105_v35, 16 }
 0x185   : > { %v2925_v13 = vrot.slane %v2923_v56, 1  ;;  %v2906_v60 = vor.u32 %v2905_v16, %v2901_v9  ;;  %v2509_v61 = vshrl.u32 %v10686_v28, 16  ;;  %v2114_v27 = vor.u32 %v2113_v40, %v2109_v57  ;;  %v1721_v28 = vld [vmem:[%s9970_s20 + $0x74] sm:$0x1] }
 0x186   : > { %v1654_v4 = vmax.f32 %v1614_v38, 0.0  ;;  %v2516_v38 = vshll.u32 %v10702_v18, 16  ;;  %v2913_v3 = vrot.slane %v2911_v45, 1  ;;  %v2918_v59 = vrot.slane %v10705_v11, 1 }
 0x187   : > { %v10727_v14 = vor.u32 %v2925_v13, %v2921_v2  ;;  %v9811_v41 = vor.u32 %v9810_v10, %v9809_v7  ;;  %v2120_v2 = vshrl.u32 %v10695_v36, 16  ;;  %v2963_v13 = vshll.u32 %v10659_v52, 16 }
 0x188   : > { %1686 = vst [vmem:[%s10175_s12 + $0xd0] sm:$0xff] %v1654_v4  ;;  %v2936_v4 = vshll.u32 %v2506_v54, 16  ;;  %v10732_v46 = vrot.slane %v2516_v38, 1  ;;  %v1897_v54 = vunpack.c.l.b16 %v1721_v28  ;;  %v2520_v57 = vshrl.u32 %v10702_v18, 16 }
 0x189   : > { %v1526_v50 = vpop.f32.mrf.mxu2  ;;  %v1351_v23 = vpop.f32.mrf.mxu0  ;;  %v2927_v62 = vsel %vm452_vm0, %v10727_v14, %v10679_v58  ;;  %v2125_v55 = vshll.u32 %v9811_v41, 16  ;;  %v2956_v38 = vshll.u32 %v2120_v2, 16  ;;  %v2123_v7 = vshrl.u32 %v9811_v41, 16  ;;  %v10799_v2 = vld [vmem:[%s9970_s20 + $0x78] sm:$0xff]  }
 0x18a   : > { %v1615_v48 = vpop.f32.mrf.mxu3  ;;  %v1527_v29 = vadd.f32 %v1526_v50, %v1438_v22  ;;  %v1440_v53 = vpop.f32.mrf.mxu1  ;;  %v1352_v34 = vadd.f32 %v10410_v6, %v1351_v23  ;;  %v2514_v50 = vor.u32 %v2513_v0, %v2509_v61  ;;  %v2938_v63 = vrot.slane %v2936_v4, 1  ;;  %v8228_v23 = vld [vmem:[%s9970_s20 + $0x80] sm:$0x1] }
 0x18b   : > { %v2297_v58 = vunpack.c.l.b16 %v8228_v23  ;;  %v10763_v30 = vpack.c.b16 %v1897_v54, %v1897_v54  ;;  %v2961_v61 = vshrl.u32 %v10659_v52, 16  ;;  %v2965_v0 = vrot.slane %v2963_v13, 1  ;;  %v9812_v23 = vld [vmem:[%s9970_s20 + $0x84] sm:$0xf0] }
 0x18c   : > { %v1616_v8 = vadd.f32 %v1615_v48, %v1527_v29  ;;  %3619 = vmatmul.bf16.gmra.mxu0 %v2867_v15  ;;  %v1441_v44 = vadd.f32 %v1440_v53, %v1352_v34  ;;  %v2929_v15 = vshrl.u32 %v2505_v39, 16  ;;  %v9661_v53 = vld [vmem:[%s9970_s20 + $0x78] sm:$0xf0]  ;;  %v2519_v39 = vsel %vm452_vm0, %v2514_v50, %v10732_v46 }
 0x18d   : > { %3708 = vmatmul.bf16.gmra.mxu1 %v2879_v31  ;;  %v9662_v31 = vld [vmem:[%s9970_s20 + $0x78] sm:$0xe]  ;;  %v2971_v40 = vshll.u32 %v2519_v39, 16  ;;  %v2130_v4 = vshll.u32 %v10763_v30, 16  ;;  %v2127_v10 = vrot.slane %v2125_v55, 1  ;;  %v2958_v50 = vrot.slane %v2956_v38, 1 }
 0x18e   : > { %v1655_v42 = vmax.f32 %v1616_v8, 0.0  ;;  %3797 = vmatmul.bf16.gmra.mxu2 %v2887_v19  ;;  %v2914_v19 = vor.u32 %v2913_v3, %v2909_v5  ;;  %v2934_v29 = vor.u32 %v2933_v20, %v2929_v15  ;;  %v9429_v34 = vld [vmem:[%s12087_s1 + $0x258] sm:$0xff]  ;;  %v2119_v8 = vsel %vm452_vm0, %v2114_v27, %v10730_v25 }
 0x18f   : > { %3886 = vmatmul.bf16.gmra.mxu3 %v2899_v32  ;;  %5153 = vmatpush.bf16.msra.mxu1 %v9429_v34  ;;  %v2951_v26 = vshll.u32 %v2119_v8, 16  ;;  %v2947_v41 = vsel %vm452_vm0, %v10727_v14, %v10730_v25  ;;  %v2981_v38 = vshrl.u32 %v10723_v12, 16 }
 0x190   : > { %1687 = vst [vmem:[%s10175_s12 + $0xd8] sm:$0xff] %v1655_v42  ;;  %v2919_v24 = vsel %vm452_vm0, %v2914_v19, %v2918_v59  ;;  %v9663_v42 = vor.u32 %v9662_v31, %v9661_v53  ;;  %v2939_v11 = vsel %vm452_vm0, %v2934_v29, %v2938_v63  ;;  %v10773_v29 = vld [vmem:[%s9970_s20 + $0x84] sm:$0xff]  }
 0x191   : > { %v1529_v43 = vpop.f32.mrf.mxu2  ;;  %v1353_v33 = vpop.f32.mrf.mxu0  ;;  %v2953_v18 = vrot.slane %v2951_v26, 1  ;;  %v9813_v53 = vld [vmem:[%s9970_s20 + $0x84] sm:$0xe] }
 0x192   : > { %v1618_v17 = vpop.f32.mrf.mxu3  ;;  %v1530_v1 = vadd.f32 %v1529_v43, %v1441_v44  ;;  %v1442_v37 = vpop.f32.mrf.mxu1  ;;  %v1354_v22 = vadd.f32 %v10410_v6, %v1353_v33  ;;  %v2907_v6 = vsel %vm452_vm0, %v2906_v60, %v10673_v49  ;;  %v10756_v44 = vld [vmem:[%s12088_s2] ss:$0 sm:$0xff]  ;;  %v2525_v36 = vshll.u32 %v9663_v42, 16 }
 0x193   : > { %v2949_v60 = vshrl.u32 %v2119_v8, 16  ;;  %v2973_v33 = vrot.slane %v2971_v40, 1  ;;  %v9640_v8 = vld [vmem:[%s9970_s20 + $0x78] sm:$0xf0]  ;;  %v2134_v40 = vshrl.u32 %v10763_v30, 16 }
 0x194   : > { %v1619_v21 = vadd.f32 %v1618_v17, %v1530_v1  ;;  %v1443_v32 = vadd.f32 %v1442_v37, %v1354_v22  ;;  %v10765_v17 = vpack.c.b16 %v2297_v58, %v2297_v58  ;;  %v2969_v1 = vshrl.u32 %v2519_v39, 16  ;;  %v9641_v39 = vld [vmem:[%s9970_s20 + $0x78] sm:$0xe] }
 0x195   : > { %v2976_v37 = vshll.u32 %v2520_v57, 16  ;;  %v2523_v22 = vshrl.u32 %v9663_v42, 16  ;;  %v2527_v27 = vrot.slane %v2525_v36, 1  ;;  %v2954_v63 = vor.u32 %v2953_v18, %v2949_v60 }
 0x196   : > { %v1656_v48 = vmax.f32 %v1619_v21, 0.0  ;;  %v2530_v52 = vshll.u32 %v10765_v17, 16  ;;  %v2974_v31 = vor.u32 %v2973_v33, %v2969_v1  ;;  %v9642_v26 = vor.u32 %v9641_v39, %v9640_v8 }
 0x197   : > { %v2978_v28 = vrot.slane %v2976_v37, 1  ;;  %v2959_v58 = vsel %vm452_vm0, %v2954_v63, %v2958_v50  ;;  %v3003_v36 = vshll.u32 %v10799_v2, 16  ;;  %v2534_v60 = vshrl.u32 %v10765_v17, 16 }
 0x198   : > { %1688 = vst [vmem:[%s10175_s12 + $0xe0] sm:$0xff] %v1656_v48  ;;  %v2966_v48 = vor.u32 %v2965_v0, %v2961_v61  ;;  %v10779_v34 = vrot.slane %v2530_v52, 1  ;;  %v2139_v37 = vshll.u32 %v9642_v26, 16 }
 0x199   : > { %v1531_v35 = vpop.f32.mrf.mxu2  ;;  %v1356_v49 = vpop.f32.mrf.mxu0  ;;  %v2979_v42 = vsel %vm452_vm0, %v2974_v31, %v2978_v28 }
 0x19a   : > { %v1620_v56 = vpop.f32.mrf.mxu3  ;;  %v1532_v9 = vadd.f32 %v1531_v35, %v1443_v32  ;;  %v1445_v16 = vpop.f32.mrf.mxu1  ;;  %v1357_v45 = vadd.f32 %v10756_v44, %v1356_v49  ;;  %v10777_v32 = vrot.slane %v2130_v4, 1  ;;  %v2528_v35 = vor.u32 %v2527_v27, %v2523_v22  ;;  %v8231_v49 = vld [vmem:[%s9970_s20 + $0x8c] sm:$0x1] }
 0x19b   : > { %v2300_v55 = vunpack.c.l.b16 %v8231_v49 }
 0x19c   : > { %v1621_v47 = vadd.f32 %v1620_v56, %v1532_v9  ;;  %3624 = vmatmul.bf16.gmra.mxu0 %v2907_v6  ;;  %v1446_v43 = vadd.f32 %v1445_v16, %v1357_v45  ;;  %v2128_v6 = vor.u32 %v2127_v10, %v2123_v7  ;;  %v1724_v56 = vld [vmem:[%s9970_s20 + $0x80] sm:$0x1]  ;;  %v2967_v9 = vsel %vm452_vm0, %v2966_v48, %v10732_v46  ;;  %v9436_v10 = vld [vmem:[%s12087_s1 + $0x290] sm:$0xff] }
 0x19d   : > { %3713 = vmatmul.bf16.gmra.mxu1 %v2919_v24  ;;  %v2983_v45 = vshll.u32 %v10723_v12, 16  ;;  %v2533_v46 = vsel %vm452_vm0, %v2528_v35, %v10779_v34  ;;  %v10812_v17 = vpack.c.b16 %v2300_v55, %v2300_v55  ;;  %v3005_v7 = vrot.slane %v3003_v36, 1  ;;  %5243 = vmatpush.bf16.msra.mxu2 %v9436_v10  ;;  %v9665_v36 = vld [vmem:[%s9970_s20 + $0x90] sm:$0xe] }
 0x19e   : > { %v1657_v51 = vmax.f32 %v1621_v47, 0.0  ;;  %3802 = vmatmul.bf16.gmra.mxu2 %v2927_v62  ;;  %v1900_v47 = vunpack.c.l.b16 %v1724_v56  ;;  %v3011_v18 = vshll.u32 %v2533_v46, 16  ;;  %v3009_v27 = vshrl.u32 %v2533_v46, 16  ;;  %v1727_v46 = vld [vmem:[%s9970_s20 + $0x8c] sm:$0x1] }
 0x19f   : > { %3891 = vmatmul.bf16.gmra.mxu3 %v2939_v11  ;;  %v10796_v11 = vsel %vm452_vm0, %v2128_v6, %v10777_v32  ;;  %v2985_v61 = vrot.slane %v2983_v45, 1  ;;  %v3016_v48 = vshll.u32 %v2534_v60, 16  ;;  %v2544_v31 = vshll.u32 %v10812_v17, 16 }
 0x1a0   : > { %1689 = vst [vmem:[%s10175_s12 + $0xe8] sm:$0xff] %v1657_v51  ;;  %v9814_v51 = vor.u32 %v9813_v53, %v9812_v23  ;;  %v2991_v0 = vshll.u32 %v10796_v11, 16  ;;  %v10809_v30 = vpack.c.b16 %v1900_v47, %v1900_v47  ;;  %v2989_v12 = vshrl.u32 %v10796_v11, 16 }
 0x1a1   : > { %v1534_v5 = vpop.f32.mrf.mxu2  ;;  %v1358_v20 = vpop.f32.mrf.mxu0  ;;  %v3013_v50 = vrot.slane %v3011_v18, 1  ;;  %v2137_v23 = vshrl.u32 %v9642_v26, 16  ;;  %v2141_v53 = vrot.slane %v2139_v37, 1  ;;  %v2986_v8 = vor.u32 %v2985_v61, %v2981_v38 }
 0x1a2   : > { %v1623_v3 = vpop.f32.mrf.mxu3  ;;  %v1535_v15 = vadd.f32 %v1534_v5, %v1446_v43  ;;  %v1447_v21 = vpop.f32.mrf.mxu1  ;;  %v1359_v59 = vadd.f32 %v10756_v44, %v1358_v20  ;;  %v2996_v5 = vshll.u32 %v2134_v40, 16  ;;  %v2539_v4 = vshll.u32 %v9814_v51, 16  ;;  %v9444_v20 = vld [vmem:[%s12087_s1 + $0x2d0] sm:$0xff] }
 0x1a3   : > { %v2993_v22 = vrot.slane %v2991_v0, 1  ;;  %v2144_v28 = vshll.u32 %v10809_v30, 16  ;;  %v2537_v6 = vshrl.u32 %v9814_v51, 16  ;;  %5332 = vmatpush.bf16.msra.mxu3 %v9444_v20  ;;  %v2142_v11 = vor.u32 %v2141_v53, %v2137_v23  ;;  %v8234_v51 = vld [vmem:[%s9970_s20 + $0x98] sm:$0x1] }
 0x1a4   : > { %v1624_v19 = vadd.f32 %v1623_v3, %v1535_v15  ;;  %v1448_v54 = vadd.f32 %v1447_v21, %v1359_v59  ;;  %v3001_v3 = vshrl.u32 %v10799_v2, 16  ;;  %v9420_v15 = vld [vmem:[%s12087_s1 + $0x210] sm:$0xff]  ;;  %v2998_v39 = vrot.slane %v2996_v5, 1 }
 0x1a5   : > { %5065 = vmatpush.bf16.msra.mxu0 %v9420_v15  ;;  %v2994_v49 = vor.u32 %v2993_v22, %v2989_v12  ;;  %v10835_v45 = vrot.slane %v2144_v28, 1  ;;  %v10837_v2 = vrot.slane %v2544_v31, 1  ;;  %v2548_v10 = vshrl.u32 %v10812_v17, 16 }
 0x1a6   : > { %v1658_v62 = vmax.f32 %v1624_v19, 0.0 }
 0x1a7   : > { %v2999_v40 = vsel %vm452_vm0, %v2994_v49, %v2998_v39  ;;  %v2147_v18 = vsel %vm452_vm0, %v2142_v11, %v10835_v45  ;;  %v3056_v23 = vshll.u32 %v2548_v10, 16  ;;  %v9819_v39 = vld [vmem:[%s9970_s20 + $0x9c] sm:$0xe] }
 0x1a8   : > { %1690 = vst [vmem:[%s10175_s12 + $0xf0] sm:$0xff] %v1658_v62  ;;  %v2541_v62 = vrot.slane %v2539_v4, 1  ;;  %v3031_v12 = vshll.u32 %v2147_v18, 16 }
 0x1a9   : > { %v1536_v16 = vpop.f32.mrf.mxu2  ;;  %v3590_v14 = vpop.f32.mrf.mxu0 }
 0x1aa   : > { %v1625_v24 = vpop.f32.mrf.mxu3  ;;  %v1537_v13 = vadd.f32 %v1536_v16, %v1448_v54  ;;  %v3679_v25 = vpop.f32.mrf.mxu1  ;;  %v3591_v57 = vadd.f32 %v10756_v44, %v3590_v14  ;;  %v10829_v54 = vld [vmem:[%s9970_s20 + $0x84] sm:$0xff]   ;;  %v10833_v16 = vor.u32 %v3005_v7, %v3001_v3  ;;  %v2303_v3 = vunpack.c.l.b16 %v8234_v51 }
 0x1ab   : > { %v3043_v7 = vshll.u32 %v10773_v29, 16  ;;  %v8237_v51 = vld [vmem:[%s9970_s20 + $0xa4] sm:$0x1] }
 0x1ac   : > { %v1626_v43 = vadd.f32 %v1625_v24, %v1537_v13  ;;  %3629 = vmatmul.bf16.gmra.mxu0 %v2947_v41  ;;  %v3680_v33 = vadd.f32 %v3679_v25, %v3591_v57  ;;  %v9815_v41 = vld [vmem:[%s9970_s20 + $0x84] sm:$0xf0]  ;;  %v3018_v24 = vrot.slane %v3016_v48, 1  ;;  %v2542_v13 = vor.u32 %v2541_v62, %v2537_v6  ;;  %v9428_v25 = vld [vmem:[%s12087_s1 + $0x250] sm:$0xff] }
 0x1ad   : > { %3718 = vmatmul.bf16.gmra.mxu1 %v2959_v58  ;;  %v2987_v57 = vsel %vm452_vm0, %v2986_v8, %v10777_v32  ;;  %v3007_v55 = vsel %vm452_vm0, %v10833_v16, %v10779_v34  ;;  %v1903_v34 = vunpack.c.l.b16 %v1727_v46  ;;  %v10866_v48 = vpack.c.b16 %v2303_v3, %v2303_v3  ;;  %v10869_v8 = vld [vmem:[%s9970_s20 + $0x9c] sm:$0xff]   ;;  %v9643_v46 = vld [vmem:[%s9970_s20 + $0x90] sm:$0xf0] }
 0x1ae   : > { %v1659_v1 = vmax.f32 %v1626_v43, 0.0  ;;  %3807 = vmatmul.bf16.gmra.mxu2 %v2967_v9  ;;  %v9816_v9 = vld [vmem:[%s9970_s20 + $0x84] sm:$0xe]  ;;  %v9664_v43 = vld [vmem:[%s9970_s20 + $0x90] sm:$0xf0]  ;;  %5154 = vmatpush.bf16.msra.mxu1 %v9428_v25  ;;  %v3045_v28 = vrot.slane %v3043_v7, 1 }
 0x1af   : > { %3896 = vmatmul.bf16.gmra.mxu3 %v2979_v42  ;;  %v3014_v42 = vor.u32 %v3013_v50, %v3009_v27  ;;  %v9817_v37 = vor.u32 %v9816_v9, %v9815_v41  ;;  %v9666_v4 = vor.u32 %v9665_v36, %v9664_v43  ;;  %v3029_v27 = vshrl.u32 %v2147_v18, 16 }
 0x1b0   : > { %1691 = vst [vmem:[%s10175_s12 + $0xf8] sm:$0xff] %v1659_v1  ;;  %v2148_v1 = vshrl.u32 %v10809_v30, 16  ;;  %v3041_v50 = vshrl.u32 %v10773_v29, 16  ;;  %v9818_v29 = vld [vmem:[%s9970_s20 + $0x9c] sm:$0xf0]  ;;  %v2558_v11 = vshll.u32 %v10866_v48, 16  ;;  %v3027_v43 = vsel %vm452_vm0, %v10833_v16, %v10835_v45 }
 0x1b1   : > { %v3768_v21 = vpop.f32.mrf.mxu2  ;;  %v3592_v59 = vpop.f32.mrf.mxu0  ;;  %v3019_v0 = vsel %vm452_vm0, %v3014_v42, %v3018_v24  ;;  %v2153_v22 = vshll.u32 %v9817_v37, 16  ;;  %v2151_v9 = vshrl.u32 %v9817_v37, 16  ;;  %v2551_v24 = vshrl.u32 %v9666_v4, 16 }
 0x1b2   : > { %v3857_v52 = vpop.f32.mrf.mxu3  ;;  %v3769_v19 = vadd.f32 %v3768_v21, %v3680_v33  ;;  %v3681_v63 = vpop.f32.mrf.mxu1  ;;  %v3593_v56 = vadd.f32 %v10756_v44, %v3592_v59  ;;  %v2547_v33 = vsel %vm452_vm0, %v2542_v13, %v10837_v2  ;;  %v3036_v20 = vshll.u32 %v2148_v1, 16 }
 0x1b3   : > { %v3051_v21 = vshll.u32 %v2547_v33, 16  ;;  %v2155_v49 = vrot.slane %v2153_v22, 1  ;;  %v3046_v25 = vor.u32 %v3045_v28, %v3041_v50  ;;  %v10889_v18 = vrot.slane %v2558_v11, 1 }
 0x1b4   : > { %v3858_v35 = vadd.f32 %v3857_v52, %v3769_v19  ;;  %v3682_v14 = vadd.f32 %v3681_v63, %v3593_v56  ;;  %v10862_v52 = vpack.c.b16 %v1903_v34, %v1903_v34  ;;  %v2553_v19 = vshll.u32 %v9666_v4, 16 }
 0x1b5   : > { %v3033_v63 = vrot.slane %v3031_v12, 1  ;;  %v3038_v62 = vrot.slane %v3036_v20, 1  ;;  %v3053_v56 = vrot.slane %v3051_v21, 1  ;;  %v3047_v37 = vsel %vm452_vm0, %v3046_v25, %v10837_v2 }
 0x1b6   : > { %v3937_v58 = vmax.f32 %v3858_v35, 0.0  ;;  %v3049_v35 = vshrl.u32 %v2547_v33, 16  ;;  %v2158_v41 = vshll.u32 %v10862_v52, 16  ;;  %v2555_v13 = vrot.slane %v2553_v19, 1 }
 0x1b7   : > { %v3063_v16 = vshll.u32 %v10829_v54, 16  ;;  %v2306_v45 = vunpack.c.l.b16 %v8237_v51  ;;  %v2562_v50 = vshrl.u32 %v10866_v48, 16 }
 0x1b8   : > { %8455 = vst [vmem:[%s10175_s12 + $0x100] sm:$0xff] %v3937_v58  ;;  %v10883_v36 = vrot.slane %v2158_v41, 1  ;;  %v2556_v1 = vor.u32 %v2555_v13, %v2551_v24  ;;  %v9443_v41 = vld [vmem:[%s12087_s1 + $0x2c8] sm:$0xff] }
 0x1b9   : > { %v3770_v47 = vpop.f32.mrf.mxu2  ;;  %v3595_v38 = vpop.f32.mrf.mxu0  ;;  %5333 = vmatpush.bf16.msra.mxu3 %v9443_v41 }
 0x1ba   : > { %v3859_v26 = vpop.f32.mrf.mxu3  ;;  %v3771_v60 = vadd.f32 %v3770_v47, %v3682_v14  ;;  %v3684_v61 = vpop.f32.mrf.mxu1  ;;  %v3596_v32 = vadd.f32 %v10756_v44, %v3595_v38  ;;  %v1730_v14 = vld [vmem:[%s9970_s20 + $0x98] sm:$0x1]  ;;  %v9644_v47 = vld [vmem:[%s9970_s20 + $0x90] sm:$0xe] }
 0x1bb   : > { %v1906_v38 = vunpack.c.l.b16 %v1730_v14 }
 0x1bc   : > { %v3860_v5 = vadd.f32 %v3859_v26, %v3771_v60  ;;  %3634 = vmatmul.bf16.gmra.mxu0 %v2987_v57  ;;  %v3685_v15 = vadd.f32 %v3684_v61, %v3596_v32  ;;  %v3034_v57 = vor.u32 %v3033_v63, %v3029_v27  ;;  %v2156_v60 = vor.u32 %v2155_v49, %v2151_v9 }
 0x1bd   : > { %3723 = vmatmul.bf16.gmra.mxu1 %v2999_v40  ;;  %v3054_v40 = vor.u32 %v3053_v56, %v3049_v35  ;;  %v10891_v32 = vor.u32 %v9644_v47, %v9643_v46  ;;  %v10905_v21 = vpack.c.b16 %v1906_v38, %v1906_v38  ;;  %v2561_v27 = vsel %vm452_vm0, %v2556_v1, %v10889_v18 }
 0x1be   : > { %v3938_v30 = vmax.f32 %v3860_v5, 0.0  ;;  %3812 = vmatmul.bf16.gmra.mxu2 %v3007_v55  ;;  %v3058_v55 = vrot.slane %v3056_v23, 1  ;;  %v10896_v5 = vor.u32 %v9819_v39, %v9818_v29  ;;  %v3039_v7 = vsel %vm452_vm0, %v3034_v57, %v3038_v62  ;;  %v9435_v29 = vld [vmem:[%s12087_s1 + $0x288] sm:$0xff]  ;;  %v10933_v57 = vld [vmem:[%s9970_s20 + $0x9c] sm:$0xff]  }
 0x1bf   : > { %3901 = vmatmul.bf16.gmra.mxu3 %v3019_v0  ;;  %v10887_v0 = vld [vmem:[%s9970_s20 + $0x90] sm:$0xff]   ;;  %v2161_v20 = vsel %vm452_vm0, %v2156_v60, %v10883_v36  ;;  %v2167_v19 = vshll.u32 %v10891_v32, 16  ;;  %v3091_v62 = vshll.u32 %v2561_v27, 16  ;;  %v2172_v35 = vshll.u32 %v10905_v21, 16  ;;  %v9419_v39 = vld [vmem:[%s12087_s1 + $0x208] sm:$0xff]  ;;  %5244 = vmatpush.bf16.msra.mxu2 %v9435_v29 }
 0x1c0   : > { %8456 = vst [vmem:[%s10175_s12 + $0x108] sm:$0xff] %v3938_v30  ;;  %v3059_v10 = vsel %vm452_vm0, %v3054_v40, %v3058_v55  ;;  %v2162_v30 = vshrl.u32 %v10862_v52, 16  ;;  %v3083_v2 = vshll.u32 %v10887_v0, 16  ;;  %v3061_v52 = vshrl.u32 %v10829_v54, 16  ;;  %5066 = vmatpush.bf16.msra.mxu0 %v9419_v39  ;;  %v9821_v40 = vld [vmem:[%s9970_s20 + $0x9c] sm:$0xf0] }
 0x1c1   : > { %v3773_v17 = vpop.f32.mrf.mxu2  ;;  %v3597_v31 = vpop.f32.mrf.mxu0  ;;  %v2567_v63 = vshll.u32 %v10896_v5, 16  ;;  %v3081_v48 = vshrl.u32 %v10887_v0, 16  ;;  %v2165_v54 = vshrl.u32 %v10891_v32, 16  ;;  %v2169_v56 = vrot.slane %v2167_v19, 1  ;;  %v9822_v55 = vld [vmem:[%s9970_s20 + $0x9c] sm:$0xe] }
 0x1c2   : > { %v3862_v59 = vpop.f32.mrf.mxu3  ;;  %v3774_v53 = vadd.f32 %v3773_v17, %v3685_v15  ;;  %v3686_v6 = vpop.f32.mrf.mxu1  ;;  %v3598_v42 = vadd.f32 %v10756_v44, %v3597_v31  ;;  %v3065_v17 = vrot.slane %v3063_v16, 1  ;;  %v10915_v31 = vshll.u32 %v2162_v30, 16 }
 0x1c3   : > { %v2569_v11 = vrot.slane %v2567_v63, 1  ;;  %v3069_v46 = vshrl.u32 %v2161_v20, 16  ;;  %v3093_v60 = vrot.slane %v3091_v62, 1  ;;  %v10940_v0 = vrot.slane %v2172_v35, 1 }
 0x1c4   : > { %v3863_v58 = vadd.f32 %v3862_v59, %v3774_v53  ;;  %v3687_v61 = vadd.f32 %v3686_v6, %v3598_v42  ;;  %v10912_v59 = vpack.c.b16 %v2306_v45, %v2306_v45  ;;  %v3071_v53 = vshll.u32 %v2161_v20, 16  ;;  %v9427_v20 = vld [vmem:[%s12087_s1 + $0x248] sm:$0xff] }
 0x1c5   : > { %v3085_v6 = vrot.slane %v3083_v2, 1  ;;  %v3066_v24 = vor.u32 %v3065_v17, %v3061_v52  ;;  %v2565_v42 = vshrl.u32 %v10896_v5, 16  ;;  %v2170_v1 = vor.u32 %v2169_v56, %v2165_v54  ;;  %v1733_v5 = vld [vmem:[%s9970_s20 + $0xa4] sm:$0x1]  ;;  %5155 = vmatpush.bf16.msra.mxu1 %v9427_v20 }
 0x1c6   : > { %v3939_v26 = vmax.f32 %v3863_v58, 0.0  ;;  %v2572_v58 = vshll.u32 %v10912_v59, 16  ;;  %v3073_v47 = vrot.slane %v3071_v53, 1  ;;  %v3078_v16 = vrot.slane %v10915_v31, 1 }
 0x1c7   : > { %v10937_v51 = vor.u32 %v3085_v6, %v3081_v48  ;;  %v3067_v30 = vsel %vm452_vm0, %v3066_v24, %v10883_v36  ;;  %v1909_v19 = vunpack.c.l.b16 %v1733_v5  ;;  %v9823_v52 = vor.u32 %v9822_v55, %v9821_v40 }
 0x1c8   : > { %8457 = vst [vmem:[%s10175_s12 + $0x110] sm:$0xff] %v3939_v26  ;;  %v3096_v26 = vshll.u32 %v2562_v50, 16  ;;  %v10942_v32 = vrot.slane %v2572_v58, 1  ;;  %v2176_v48 = vshrl.u32 %v10905_v21, 16  ;;  %v3123_v6 = vshll.u32 %v10869_v8, 16 }
 0x1c9   : > { %v3775_v33 = vpop.f32.mrf.mxu2  ;;  %v3600_v4 = vpop.f32.mrf.mxu0  ;;  %v2576_v54 = vshrl.u32 %v10912_v59, 16  ;;  %v10968_v29 = vpack.c.b16 %v1909_v19, %v1909_v19  ;;  %v2181_v39 = vshll.u32 %v9823_v52, 16  ;;  %v2179_v40 = vshrl.u32 %v9823_v52, 16 }
 0x1ca   : > { %v3864_v34 = vpop.f32.mrf.mxu3  ;;  %v3776_v3 = vadd.f32 %v3775_v33, %v3687_v61  ;;  %v3689_v12 = vpop.f32.mrf.mxu1  ;;  %v3601_v15 = vadd.f32 %v10756_v44, %v3600_v4  ;;  %v2570_v33 = vor.u32 %v2569_v11, %v2565_v42  ;;  %v3098_v45 = vrot.slane %v3096_v26, 1  ;;  %v8240_v4 = vld [vmem:[%s9970_s20 + $0xb0] sm:$0x1] }
 0x1cb   : > { %v3116_v58 = vshll.u32 %v2176_v48, 16  ;;  %v3121_v42 = vshrl.u32 %v10869_v8, 16  ;;  %v3125_v11 = vrot.slane %v3123_v6, 1  ;;  %v2186_v26 = vshll.u32 %v10968_v29, 16  ;;  %v11004_v48 = vld [vmem:[%s9970_s20 + $0xa8] sm:$0xff]  }
 0x1cc   : > { %v3865_v22 = vadd.f32 %v3864_v34, %v3776_v3  ;;  %3639 = vmatmul.bf16.gmra.mxu0 %v3027_v43  ;;  %v3690_v23 = vadd.f32 %v3689_v12, %v3601_v15  ;;  %v3089_v43 = vshrl.u32 %v2561_v27, 16  ;;  %v9667_v12 = vld [vmem:[%s9970_s20 + $0xa8] sm:$0xf0]  ;;  %v3087_v15 = vsel %vm452_vm0, %v10937_v51, %v10889_v18 }
 0x1cd   : > { %3728 = vmatmul.bf16.gmra.mxu1 %v3039_v7  ;;  %v9668_v7 = vld [vmem:[%s9970_s20 + $0xa8] sm:$0xe]  ;;  %v2175_v27 = vsel %vm452_vm0, %v2170_v1, %v10940_v0  ;;  %v2575_v50 = vsel %vm452_vm0, %v2570_v33, %v10942_v32  ;;  %v2309_v18 = vunpack.c.l.b16 %v8240_v4  ;;  %v2183_v55 = vrot.slane %v2181_v39, 1  ;;  %v9824_v4 = vld [vmem:[%s9970_s20 + $0xb4] sm:$0xf0] }
 0x1ce   : > { %v3940_v28 = vmax.f32 %v3865_v22, 0.0  ;;  %3817 = vmatmul.bf16.gmra.mxu2 %v3047_v37  ;;  %v3074_v37 = vor.u32 %v3073_v47, %v3069_v46  ;;  %v3094_v3 = vor.u32 %v3093_v60, %v3089_v43  ;;  %v3111_v35 = vshll.u32 %v2175_v27, 16 }
 0x1cf   : > { %3906 = vmatmul.bf16.gmra.mxu3 %v3059_v10  ;;  %v3131_v56 = vshll.u32 %v2575_v50, 16  ;;  %v3109_v24 = vshrl.u32 %v2175_v27, 16  ;;  %v3118_v33 = vrot.slane %v3116_v58, 1  ;;  %v9646_v27 = vld [vmem:[%s9970_s20 + $0xa8] sm:$0xf0]  ;;  %v3107_v52 = vsel %vm452_vm0, %v10937_v51, %v10940_v0 }
 0x1d0   : > { %8458 = vst [vmem:[%s10175_s12 + $0x118] sm:$0xff] %v3940_v28  ;;  %v3079_v28 = vsel %vm452_vm0, %v3074_v37, %v3078_v16  ;;  %v3099_v31 = vsel %vm452_vm0, %v3094_v3, %v3098_v45  ;;  %v3113_v59 = vrot.slane %v3111_v35, 1  ;;  %v10978_v3 = vld [vmem:[%s9970_s20 + $0xb4] sm:$0xff]   ;;  %v3141_v58 = vshrl.u32 %v10933_v57, 16 }
 0x1d1   : > { %v3778_v9 = vpop.f32.mrf.mxu2  ;;  %v3602_v14 = vpop.f32.mrf.mxu0 }
 0x1d2   : > { %v3867_v49 = vpop.f32.mrf.mxu3  ;;  %v3779_v13 = vadd.f32 %v3778_v9, %v3690_v23  ;;  %v3691_v25 = vpop.f32.mrf.mxu1  ;;  %v3603_v61 = vadd.f32 %v10756_v44, %v3602_v14  ;;  %v9669_v23 = vor.u32 %v9668_v7, %v9667_v12  ;;  %v3133_v14 = vrot.slane %v3131_v56, 1  ;;  %v9825_v12 = vld [vmem:[%s9970_s20 + $0xb4] sm:$0xe] }
 0x1d3   : > { %v3114_v45 = vor.u32 %v3113_v59, %v3109_v24  ;;  %v2190_v56 = vshrl.u32 %v10968_v29, 16 }
 0x1d4   : > { %v3868_v38 = vadd.f32 %v3867_v49, %v3779_v13  ;;  %v3692_v10 = vadd.f32 %v3691_v25, %v3603_v61  ;;  %v10970_v49 = vpack.c.b16 %v2309_v18, %v2309_v18  ;;  %v2581_v21 = vshll.u32 %v9669_v23, 16 }
 0x1d5   : > { %v3129_v13 = vshrl.u32 %v2575_v50, 16  ;;  %v3136_v25 = vshll.u32 %v2576_v54, 16  ;;  %v2579_v61 = vshrl.u32 %v9669_v23, 16  ;;  %v9647_v50 = vld [vmem:[%s9970_s20 + $0xa8] sm:$0xe]  ;;  %v3119_v18 = vsel %vm452_vm0, %v3114_v45, %v3118_v33 }
 0x1d6   : > { %v3941_v34 = vmax.f32 %v3868_v38, 0.0  ;;  %v2586_v8 = vshll.u32 %v10970_v49, 16  ;;  %v2583_v1 = vrot.slane %v2581_v21, 1  ;;  %v9648_v35 = vor.u32 %v9647_v50, %v9646_v27 }
 0x1d7   : > { %v3138_v5 = vrot.slane %v3136_v25, 1  ;;  %v3134_v7 = vor.u32 %v3133_v14, %v3129_v13  ;;  %v3163_v21 = vshll.u32 %v11004_v48, 16  ;;  %v2590_v24 = vshrl.u32 %v10970_v49, 16 }
 0x1d8   : > { %8459 = vst [vmem:[%s10175_s12 + $0x120] sm:$0xff] %v3941_v34  ;;  %v3126_v34 = vor.u32 %v3125_v11, %v3121_v42  ;;  %v10984_v20 = vrot.slane %v2586_v8, 1  ;;  %v2195_v25 = vshll.u32 %v9648_v35, 16 }
 0x1d9   : > { %v3780_v2 = vpop.f32.mrf.mxu2  ;;  %v3605_v36 = vpop.f32.mrf.mxu0  ;;  %v3139_v23 = vsel %vm452_vm0, %v3134_v7, %v3138_v5 }
 0x1da   : > { %v3869_v22 = vpop.f32.mrf.mxu3  ;;  %v3781_v17 = vadd.f32 %v3780_v2, %v3692_v10  ;;  %v3694_v63 = vpop.f32.mrf.mxu1  ;;  %v3606_v53 = vadd.f32 %v10756_v44, %v3605_v36  ;;  %v10982_v10 = vrot.slane %v2186_v26, 1  ;;  %v2584_v2 = vor.u32 %v2583_v1, %v2579_v61  ;;  %v8243_v36 = vld [vmem:[%s9970_s20 + $0xbc] sm:$0x1] }
 0x1db   : > { %v2312_v39 = vunpack.c.l.b16 %v8243_v36 }
 0x1dc   : > { %v3870_v62 = vadd.f32 %v3869_v22, %v3781_v17  ;;  %3644 = vmatmul.bf16.gmra.mxu0 %v3067_v30  ;;  %v3695_v9 = vadd.f32 %v3694_v63, %v3606_v53  ;;  %v2184_v30 = vor.u32 %v2183_v55, %v2179_v40  ;;  %v1736_v22 = vld [vmem:[%s9970_s20 + $0xb0] sm:$0x1]  ;;  %v3127_v17 = vsel %vm452_vm0, %v3126_v34, %v10942_v32  ;;  %v9434_v55 = vld [vmem:[%s12087_s1 + $0x280] sm:$0xff] }
 0x1dd   : > { %3733 = vmatmul.bf16.gmra.mxu1 %v3079_v28  ;;  %v3143_v53 = vshll.u32 %v10933_v57, 16  ;;  %v2589_v32 = vsel %vm452_vm0, %v2584_v2, %v10984_v20  ;;  %v11017_v49 = vpack.c.b16 %v2312_v39, %v2312_v39  ;;  %v3165_v40 = vrot.slane %v3163_v21, 1  ;;  %5245 = vmatpush.bf16.msra.mxu2 %v9434_v55  ;;  %v8246_v39 = vld [vmem:[%s9970_s20 + $0xc8] sm:$0x1] }
 0x1de   : > { %v3942_v41 = vmax.f32 %v3870_v62, 0.0  ;;  %3822 = vmatmul.bf16.gmra.mxu2 %v3087_v15  ;;  %v1912_v62 = vunpack.c.l.b16 %v1736_v22  ;;  %v3171_v59 = vshll.u32 %v2589_v32, 16  ;;  %v3169_v1 = vshrl.u32 %v2589_v32, 16  ;;  %v1739_v32 = vld [vmem:[%s9970_s20 + $0xbc] sm:$0x1] }
 0x1df   : > { %3911 = vmatmul.bf16.gmra.mxu3 %v3099_v31  ;;  %v11001_v31 = vsel %vm452_vm0, %v2184_v30, %v10982_v10  ;;  %v3145_v42 = vrot.slane %v3143_v53, 1  ;;  %v3176_v34 = vshll.u32 %v2590_v24, 16  ;;  %v2600_v7 = vshll.u32 %v11017_v49, 16 }
 0x1e0   : > { %8460 = vst [vmem:[%s10175_s12 + $0x128] sm:$0xff] %v3942_v41  ;;  %v9826_v41 = vor.u32 %v9825_v12, %v9824_v4  ;;  %v3151_v11 = vshll.u32 %v11001_v31, 16  ;;  %v11014_v29 = vpack.c.b16 %v1912_v62, %v1912_v62  ;;  %v3149_v57 = vshrl.u32 %v11001_v31, 16 }
 0x1e1   : > { %v3783_v46 = vpop.f32.mrf.mxu2  ;;  %v3607_v60 = vpop.f32.mrf.mxu0  ;;  %v3173_v33 = vrot.slane %v3171_v59, 1  ;;  %v2193_v4 = vshrl.u32 %v9648_v35, 16  ;;  %v2197_v12 = vrot.slane %v2195_v25, 1  ;;  %v3146_v27 = vor.u32 %v3145_v42, %v3141_v58 }
 0x1e2   : > { %v3872_v47 = vpop.f32.mrf.mxu3  ;;  %v3784_v43 = vadd.f32 %v3783_v46, %v3695_v9  ;;  %v3696_v38 = vpop.f32.mrf.mxu1  ;;  %v3608_v16 = vadd.f32 %v10756_v44, %v3607_v60  ;;  %v3156_v46 = vshll.u32 %v2190_v56, 16  ;;  %v2595_v26 = vshll.u32 %v9826_v41, 16  ;;  %v9442_v60 = vld [vmem:[%s12087_s1 + $0x2c0] sm:$0xff] }
 0x1e3   : > { %v3153_v61 = vrot.slane %v3151_v11, 1  ;;  %v2200_v5 = vshll.u32 %v11014_v29, 16  ;;  %v2593_v30 = vshrl.u32 %v9826_v41, 16  ;;  %5334 = vmatpush.bf16.msra.mxu3 %v9442_v60  ;;  %v2198_v31 = vor.u32 %v2197_v12, %v2193_v4  ;;  %v9670_v41 = vld [vmem:[%s9970_s20 + $0xc0] sm:$0xf0] }
 0x1e4   : > { %v3873_v37 = vadd.f32 %v3872_v47, %v3784_v43  ;;  %v3697_v19 = vadd.f32 %v3696_v38, %v3608_v16  ;;  %v3161_v47 = vshrl.u32 %v11004_v48, 16  ;;  %v9418_v43 = vld [vmem:[%s12087_s1 + $0x200] sm:$0xff]  ;;  %v3158_v50 = vrot.slane %v3156_v46, 1 }
 0x1e5   : > { %5067 = vmatpush.bf16.msra.mxu0 %v9418_v43  ;;  %v3154_v36 = vor.u32 %v3153_v61, %v3149_v57  ;;  %v11040_v53 = vrot.slane %v2200_v5, 1  ;;  %v11042_v48 = vrot.slane %v2600_v7, 1  ;;  %v2315_v46 = vunpack.c.l.b16 %v8246_v39 }
 0x1e6   : > { %v3943_v15 = vmax.f32 %v3873_v37, 0.0 }
 0x1e7   : > { %v3159_v42 = vsel %vm452_vm0, %v3154_v36, %v3158_v50  ;;  %v2203_v59 = vsel %vm452_vm0, %v2198_v31, %v11040_v53 }
 0x1e8   : > { %8461 = vst [vmem:[%s10175_s12 + $0x130] sm:$0xff] %v3943_v15  ;;  %v2597_v15 = vrot.slane %v2595_v26, 1  ;;  %v2204_v26 = vshrl.u32 %v11014_v29, 16  ;;  %v3191_v57 = vshll.u32 %v2203_v59, 16  ;;  %v3189_v61 = vshrl.u32 %v2203_v59, 16 }
 0x1e9   : > { %v3785_v63 = vpop.f32.mrf.mxu2  ;;  %v3610_v51 = vpop.f32.mrf.mxu0 }
 0x1ea   : > { %v3874_v28 = vpop.f32.mrf.mxu3  ;;  %v3786_v6 = vadd.f32 %v3785_v63, %v3697_v19  ;;  %v3699_v0 = vpop.f32.mrf.mxu1  ;;  %v3611_v54 = vadd.f32 %v10756_v44, %v3610_v51  ;;  %v11034_v19 = vld [vmem:[%s9970_s20 + $0xb4] sm:$0xff]   ;;  %v11038_v63 = vor.u32 %v3165_v40, %v3161_v47  ;;  %v3203_v40 = vshll.u32 %v10978_v3, 16 }
 0x1ec   : > { %v3875_v9 = vadd.f32 %v3874_v28, %v3786_v6  ;;  %3649 = vmatmul.bf16.gmra.mxu0 %v3107_v52  ;;  %v3700_v14 = vadd.f32 %v3699_v0, %v3611_v54  ;;  %v9827_v52 = vld [vmem:[%s9970_s20 + $0xb4] sm:$0xf0]  ;;  %v3178_v28 = vrot.slane %v3176_v34, 1  ;;  %v2598_v6 = vor.u32 %v2597_v15, %v2593_v30  ;;  %v9426_v0 = vld [vmem:[%s12087_s1 + $0x240] sm:$0xff] }
 0x1ed   : > { %3738 = vmatmul.bf16.gmra.mxu1 %v3119_v18  ;;  %v3147_v54 = vsel %vm452_vm0, %v3146_v27, %v10982_v10  ;;  %v3167_v56 = vsel %vm452_vm0, %v11038_v63, %v10984_v20  ;;  %v1915_v20 = vunpack.c.l.b16 %v1739_v32  ;;  %v3205_v5 = vrot.slane %v3203_v40, 1 }
 0x1ee   : > { %v3944_v13 = vmax.f32 %v3875_v9, 0.0  ;;  %3827 = vmatmul.bf16.gmra.mxu2 %v3127_v17  ;;  %v9828_v17 = vld [vmem:[%s9970_s20 + $0xb4] sm:$0xe]  ;;  %v9671_v9 = vld [vmem:[%s9970_s20 + $0xc0] sm:$0xe]  ;;  %5156 = vmatpush.bf16.msra.mxu1 %v9426_v0 }
 0x1ef   : > { %3916 = vmatmul.bf16.gmra.mxu3 %v3139_v23  ;;  %v3174_v23 = vor.u32 %v3173_v33, %v3169_v1  ;;  %v9672_v47 = vor.u32 %v9671_v9, %v9670_v41  ;;  %v11070_v1 = vpack.c.b16 %v2315_v46, %v2315_v46 }
 0x1f0   : > { %8462 = vst [vmem:[%s10175_s12 + $0x138] sm:$0xff] %v3944_v13  ;;  %v2603_v13 = vsel %vm452_vm0, %v2598_v6, %v11042_v48 }
 0x1f1   : > { %v3788_v38 = vpop.f32.mrf.mxu2  ;;  %v3612_v16 = vpop.f32.mrf.mxu0  ;;  %v3179_v11 = vsel %vm452_vm0, %v3174_v23, %v3178_v28  ;;  %v3211_v60 = vshll.u32 %v2603_v13, 16  ;;  %v2609_v33 = vshll.u32 %v9672_v47, 16  ;;  %v2607_v50 = vshrl.u32 %v9672_v47, 16 }
 0x1f2   : > { %v3877_v8 = vpop.f32.mrf.mxu3  ;;  %v3789_v37 = vadd.f32 %v3788_v38, %v3700_v14  ;;  %v3701_v45 = vpop.f32.mrf.mxu1  ;;  %v3613_v22 = vadd.f32 %v10756_v44, %v3612_v16  ;;  %v9829_v14 = vor.u32 %v9828_v17, %v9827_v52  ;;  %v11067_v38 = vpack.c.b16 %v1915_v20, %v1915_v20  ;;  %v11077_v17 = vld [vmem:[%s12088_s2] ss:$0 sm:$0xff] }
 0x1f3   : > { %v3196_v16 = vshll.u32 %v2204_v26, 16  ;;  %v3213_v30 = vrot.slane %v3211_v60, 1  ;;  %v2614_v36 = vshll.u32 %v11070_v1, 16  ;;  %v2611_v28 = vrot.slane %v2609_v33, 1 }
 0x1f4   : > { %v3878_v2 = vadd.f32 %v3877_v8, %v3789_v37  ;;  %v3702_v51 = vadd.f32 %v3701_v45, %v3613_v22  ;;  %v2209_v8 = vshll.u32 %v9829_v14, 16  ;;  %v3193_v37 = vrot.slane %v3191_v57, 1 }
 0x1f5   : > { %v3201_v45 = vshrl.u32 %v10978_v3, 16  ;;  %v2207_v22 = vshrl.u32 %v9829_v14, 16  ;;  %v3198_v31 = vrot.slane %v3196_v16, 1  ;;  %v9624_v14 = vld [vmem:[%s9970_s20 + $0xc0] sm:$0xff]   ;;  %v2618_v57 = vshrl.u32 %v11070_v1, 16 }
 0x1f6   : > { %v3945_v18 = vmax.f32 %v3878_v2, 0.0  ;;  %v2214_v2 = vshll.u32 %v11067_v38, 16  ;;  %v2211_v27 = vrot.slane %v2209_v8, 1  ;;  %v3194_v23 = vor.u32 %v3193_v37, %v3189_v61 }
 0x1f7   : > { %v3206_v6 = vor.u32 %v3205_v5, %v3201_v45  ;;  %v3243_v26 = vshll.u32 %v9624_v14, 16  ;;  %v3221_v8 = vshrl.u32 %v11034_v19, 16  ;;  %v3241_v45 = vshrl.u32 %v9624_v14, 16 }
 0x1f8   : > { %8463 = vst [vmem:[%s10175_s12 + $0x140] sm:$0xff] %v3945_v18  ;;  %v11081_v32 = vrot.slane %v2214_v2, 1 }
 0x1f9   : > { %v3790_v62 = vpop.f32.mrf.mxu2  ;;  %v3615_v24 = vpop.f32.mrf.mxu0  ;;  %v3207_v59 = vsel %vm452_vm0, %v3206_v6, %v11042_v48  ;;  %v3245_v5 = vrot.slane %v3243_v26, 1 }
 0x1fa   : > { %v3879_v35 = vpop.f32.mrf.mxu3  ;;  %v3791_v21 = vadd.f32 %v3790_v62, %v3702_v51  ;;  %v3704_v58 = vpop.f32.mrf.mxu1  ;;  %v3616_v10 = vadd.f32 %v10756_v44, %v3615_v24  ;;  %v2604_v44 = vshrl.u32 %v11017_v49, 16  ;;  %v3209_v49 = vshrl.u32 %v2603_v13, 16 }
 0x1fb   : > { %v2212_v62 = vor.u32 %v2211_v27, %v2207_v22  ;;  %v3246_v27 = vor.u32 %v3245_v5, %v3241_v45 }
 0x1fc   : > { %v3880_v25 = vadd.f32 %v3879_v35, %v3791_v21  ;;  %3654 = vmatmul.bf16.gmra.mxu0 %v3147_v54  ;;  %v3705_v43 = vadd.f32 %v3704_v58, %v3616_v10  ;;  %v3216_v15 = vshll.u32 %v2604_v44, 16  ;;  %v3214_v51 = vor.u32 %v3213_v30, %v3209_v49  ;;  %v9481_v44 = vld [vmem:[%s12087_s1 + $0x3f8] sm:$0xff] }
 0x1fd   : > { %3743 = vmatmul.bf16.gmra.mxu1 %v3159_v42  ;;  %v11084_v54 = vrot.slane %v2614_v36, 1  ;;  %v3187_v58 = vsel %vm452_vm0, %v11038_v63, %v11040_v53  ;;  %v3199_v42 = vsel %vm452_vm0, %v3194_v23, %v3198_v31  ;;  %v2217_v13 = vsel %vm452_vm0, %v2212_v62, %v11081_v32  ;;  %7637 = vmatpush.bf16.msrb.mxu3 %v9481_v44 }
 0x1fe   : > { %v3946_v55 = vmax.f32 %v3880_v25, 0.0  ;;  %3832 = vmatmul.bf16.gmra.mxu2 %v3167_v56  ;;  %v3218_v0 = vrot.slane %v3216_v15, 1  ;;  %v2612_v56 = vor.u32 %v2611_v28, %v2607_v50  ;;  %v3223_v63 = vshll.u32 %v11034_v19, 16  ;;  %v8567_v28 = vld [vmem:[%s9970_s20 + $0x20] sm:$0x1] }
 0x1ff   : > { %3921 = vmatmul.bf16.gmra.mxu3 %v3179_v11  ;;  %v2218_v53 = vshrl.u32 %v11067_v38, 16  ;;  %v3231_v48 = vshll.u32 %v2217_v13, 16  ;;  %v3229_v37 = vshrl.u32 %v2217_v13, 16 }
 0x200   : > { %8464 = vst [vmem:[%s10175_s12 + $0x148] sm:$0xff] %v3946_v55  ;;  %v3219_v10 = vsel %vm452_vm0, %v3214_v51, %v3218_v0  ;;  %v2617_v25 = vsel %vm452_vm0, %v2612_v56, %v11084_v54  ;;  %v9473_v55 = vld [vmem:[%s12087_s1 + $0x3b8] sm:$0xff]  ;;  %v3225_v61 = vrot.slane %v3223_v63, 1  ;;  %v9386_v56 = vld [vmem:[%s9970_s20 + $0xc] sm:$0xff] }
 0x201   : > { %v3793_v34 = vpop.f32.mrf.mxu2  ;;  %v3617_v12 = vpop.f32.mrf.mxu0  ;;  %v3251_v40 = vshll.u32 %v2617_v25, 16  ;;  %v3236_v1 = vshll.u32 %v2218_v53, 16  ;;  %v3233_v16 = vrot.slane %v3231_v48, 1  ;;  %7548 = vmatpush.bf16.msrb.mxu2 %v9473_v55 }
 0x202   : > { %v3882_v29 = vpop.f32.mrf.mxu3  ;;  %v3794_v4 = vadd.f32 %v3793_v34, %v3705_v43  ;;  %v3706_v7 = vpop.f32.mrf.mxu1  ;;  %v3618_v3 = vadd.f32 %v11077_v17, %v3617_v12  ;;  %v9457_v43 = vld [vmem:[%s12087_s1 + $0x338] sm:$0xff]  ;;  %v3226_v15 = vor.u32 %v3225_v61, %v3221_v8 }
 0x203   : > { %7370 = vmatpush.bf16.msrb.mxu0 %v9457_v43  ;;  %v3253_v12 = vrot.slane %v3251_v40, 1  ;;  %v3234_v2 = vor.u32 %v3233_v16, %v3229_v37  ;;  %v3238_v22 = vrot.slane %v3236_v1, 1  ;;  %v8520_v1 = vld [vmem:[%s9970_s20 + $0x20] sm:$0x1] }
 0x204   : > { %v3883_v52 = vadd.f32 %v3882_v29, %v3794_v4  ;;  %v3707_v35 = vadd.f32 %v3706_v7, %v3618_v3  ;;  %v3249_v4 = vshrl.u32 %v2617_v25, 16  ;;  %v3256_v7 = vshll.u32 %v2618_v57, 16  ;;  %v8519_v3 = vld [vmem:[%s9970_s20 + $0x14] sm:$0x1] }
 0x205   : > { %v3227_v62 = vsel %vm452_vm0, %v3226_v15, %v11081_v32 }
 0x206   : > { %v3947_v18 = vmax.f32 %v3883_v52, 0.0  ;;  %v3254_v50 = vor.u32 %v3253_v12, %v3249_v4  ;;  %v3258_v52 = vrot.slane %v3256_v7, 1  ;;  %v9387_v12 = vld [vmem:[%s9970_s20 + $0x18] sm:$0xff]  ;;  %v4212_v7 = vunpack.c.l.b16 %v8520_v1 }
 0x208   : > { %8465 = vst [vmem:[%s10175_s12 + $0x150] sm:$0xff] %v3947_v18  ;;  %v9465_v18 = vld [vmem:[%s12087_s1 + $0x378] sm:$0xff] }
 0x209   : > { %v3795_v39 = vpop.f32.mrf.mxu2  ;;  %v3620_v21 = vpop.f32.mrf.mxu0  ;;  %7459 = vmatpush.bf16.msrb.mxu1 %v9465_v18  ;;  %v9456_v18 = vld [vmem:[%s12087_s1 + $0x330] sm:$0xff] }
 0x20a   : > { %v3884_v41 = vpop.f32.mrf.mxu3  ;;  %v3796_v9 = vadd.f32 %v3795_v39, %v3707_v35  ;;  %v3709_v24 = vpop.f32.mrf.mxu1  ;;  %v3621_v11 = vadd.f32 %v11077_v17, %v3620_v21  ;;  %v3239_v35 = vsel %vm452_vm0, %v3234_v2, %v3238_v22  ;;  %v4211_v39 = vunpack.c.l.b16 %v8519_v3  ;;  %7371 = vmatpush.bf16.msrb.mxu0 %v9456_v18  ;;  %v8570_v18 = vld [vmem:[%s9970_s20 + $0x44] sm:$0x1] }
 0x20b   : > { %v3259_v21 = vsel %vm452_vm0, %v3254_v50, %v3258_v52  ;;  %v4258_v50 = vshll.u32 %v9387_v12, 16  ;;  %v4228_v52 = vpack.c.b16 %v4212_v7, %v4212_v7 }
 0x20c   : > { %v3885_v20 = vadd.f32 %v3884_v41, %v3796_v9  ;;  %3659 = vmatmul.bf16.gmra.mxu0 %v3187_v58  ;;  %v3710_v47 = vadd.f32 %v3709_v24, %v3621_v11  ;;  %v3247_v9 = vsel %vm452_vm0, %v3246_v27, %v11084_v54  ;;  %v9402_v24 = vld [vmem:[%s9970_s20 + $0x18] sm:$0xff]  ;;  %v4563_v58 = vunpack.c.l.b16 %v8567_v28  ;;  %v9472_v28 = vld [vmem:[%s12087_s1 + $0x3b0] sm:$0xff] }
 0x20d   : > { %3748 = vmatmul.bf16.gmra.mxu1 %v3199_v42  ;;  %v4596_v26 = vshrl.u32 %v9402_v24, 16  ;;  %7549 = vmatpush.bf16.msrb.mxu2 %v9472_v28 }
 0x20e   : > { %v3948_v46 = vmax.f32 %v3885_v20, 0.0  ;;  %3837 = vmatmul.bf16.gmra.mxu2 %v3207_v59  ;;  %v4227_v59 = vpack.c.b16 %v4211_v39, %v4211_v39  ;;  %v4579_v13 = vpack.c.b16 %v4563_v58, %v4563_v58  ;;  %v4598_v20 = vshll.u32 %v9402_v24, 16 }
 0x20f   : > { %3926 = vmatmul.bf16.gmra.mxu3 %v3219_v10  ;;  %v4246_v10 = vshll.u32 %v9386_v56, 16  ;;  %v4263_v39 = vshll.u32 %v4228_v52, 16 }
 0x210   : > { %8466 = vst [vmem:[%s10175_s12 + $0x158] sm:$0xff] %v3948_v46  ;;  %v4244_v46 = vshrl.u32 %v9386_v56, 16  ;;  %v4251_v48 = vshll.u32 %v4227_v59, 16  ;;  %v4600_v57 = vrot.slane %v4598_v20, 1  ;;  %v4603_v40 = vshll.u32 %v4579_v13, 16 }
 0x211   : > { %v3798_v60 = vpop.f32.mrf.mxu2  ;;  %v3622_v34 = vpop.f32.mrf.mxu0  ;;  %v8521_v13 = vld [vmem:[%s9970_s20 + $0x2c] sm:$0x1] }
 0x212   : > { %v3887_v38 = vpop.f32.mrf.mxu3  ;;  %v3799_v33 = vadd.f32 %v3798_v60, %v3710_v47  ;;  %v3711_v29 = vpop.f32.mrf.mxu1  ;;  %v3623_v19 = vadd.f32 %v11077_v17, %v3622_v34  ;;  %v4248_v47 = vrot.slane %v4246_v10, 1  ;;  %v4601_v8 = vor.u32 %v4600_v57, %v4596_v26  ;;  %v8568_v34 = vld [vmem:[%s9970_s20 + $0x2c] sm:$0x1]  ;;  %v9388_v26 = vld [vmem:[%s9970_s20 + $0x24] sm:$0xff] }
 0x213   : > { %v4605_v61 = vrot.slane %v4603_v40, 1  ;;  %v4564_v15 = vunpack.c.l.b16 %v8568_v34  ;;  %v4213_v57 = vunpack.c.l.b16 %v8521_v13  ;;  %v9471_v13 = vld [vmem:[%s12087_s1 + $0x3a8] sm:$0xff] }
 0x214   : > { %v3888_v49 = vadd.f32 %v3887_v38, %v3799_v33  ;;  %v3712_v36 = vadd.f32 %v3711_v29, %v3623_v19  ;;  %v4249_v60 = vor.u32 %v4248_v47, %v4244_v46  ;;  %v4253_v38 = vrot.slane %v4251_v48, 1  ;;  %7550 = vmatpush.bf16.msrb.mxu2 %v9471_v13 }
 0x215   : > { %v4606_v19 = vsel %vm452_vm0, %v4601_v8, %v4605_v61  ;;  %v4270_v61 = vshll.u32 %v9388_v26, 16  ;;  %v4229_v1 = vpack.c.b16 %v4213_v57, %v4213_v57 }
 0x216   : > { %v3949_v30 = vmax.f32 %v3888_v49, 0.0  ;;  %v4254_v4 = vsel %vm452_vm0, %v4249_v60, %v4253_v38 }
 0x217   : > { %v4275_v7 = vshll.u32 %v4229_v1, 16 }
 0x218   : > { %8467 = vst [vmem:[%s10175_s12 + $0x160] sm:$0xff] %v3949_v30  ;;  %v9403_v30 = vld [vmem:[%s9970_s20 + $0x24] sm:$0xff] }
 0x219   : > { %v3800_v23 = vpop.f32.mrf.mxu2  ;;  %v3625_v51 = vpop.f32.mrf.mxu0  ;;  %v4610_v3 = vshll.u32 %v9403_v30, 16 }
 0x21a   : > { %v3889_v31 = vpop.f32.mrf.mxu3  ;;  %v3801_v6 = vadd.f32 %v3800_v23, %v3712_v36  ;;  %v3714_v0 = vpop.f32.mrf.mxu1  ;;  %v3626_v41 = vadd.f32 %v11077_v17, %v3625_v51  ;;  %v4580_v36 = vpack.c.b16 %v4564_v15, %v4564_v15  ;;  %v9480_v23 = vld [vmem:[%s12087_s1 + $0x3f0] sm:$0xff] }
 0x21b   : > { %7638 = vmatpush.bf16.msrb.mxu3 %v9480_v23 }
 0x21c   : > { %v3890_v42 = vadd.f32 %v3889_v31, %v3801_v6  ;;  %3664 = vmatmul.bf16.gmra.mxu0 %v3227_v62  ;;  %v3715_v32 = vadd.f32 %v3714_v0, %v3626_v41  ;;  %v4608_v41 = vshrl.u32 %v9403_v30, 16 }
 0x21d   : > { %3753 = vmatmul.bf16.gmra.mxu1 %v3239_v35  ;;  %v4256_v35 = vshrl.u32 %v9387_v12, 16 }
 0x21e   : > { %v3950_v11 = vmax.f32 %v3890_v42, 0.0  ;;  %3842 = vmatmul.bf16.gmra.mxu2 %v3247_v9  ;;  %v4612_v9 = vrot.slane %v4610_v3, 1 }
 0x21f   : > { %3931 = vmatmul.bf16.gmra.mxu3 %v3259_v21  ;;  %v4615_v21 = vshll.u32 %v4580_v36, 16  ;;  %v8522_v36 = vld [vmem:[%s9970_s20 + $0x38] sm:$0x1] }
 0x220   : > { %8468 = vst [vmem:[%s10175_s12 + $0x168] sm:$0xff] %v3950_v11  ;;  %v4613_v59 = vor.u32 %v4612_v9, %v4608_v41  ;;  %v9405_v9 = vld [vmem:[%s9970_s20 + $0x3c] sm:$0xff] }
 0x221   : > { %v3803_v14 = vpop.f32.mrf.mxu2  ;;  %v3627_v54 = vpop.f32.mrf.mxu0  ;;  %v4617_v10 = vrot.slane %v4615_v21, 1  ;;  %v4566_v21 = vunpack.c.l.b16 %v8570_v18  ;;  %v4632_v57 = vshrl.u32 %v9405_v9, 16 }
 0x222   : > { %v3892_v25 = vpop.f32.mrf.mxu3  ;;  %v3804_v63 = vadd.f32 %v3803_v14, %v3715_v32  ;;  %v3716_v53 = vpop.f32.mrf.mxu1  ;;  %v3628_v43 = vadd.f32 %v11077_v17, %v3627_v54  ;;  %v4265_v32 = vrot.slane %v4263_v39, 1  ;;  %v8569_v14 = vld [vmem:[%s9970_s20 + $0x38] sm:$0x1] }
 0x224   : > { %v3893_v55 = vadd.f32 %v3892_v25, %v3804_v63  ;;  %v3717_v33 = vadd.f32 %v3716_v53, %v3628_v43  ;;  %v9464_v25 = vld [vmem:[%s12087_s1 + $0x370] sm:$0xff] }
 0x225   : > { %7460 = vmatpush.bf16.msrb.mxu1 %v9464_v25  ;;  %v9404_v43 = vld [vmem:[%s9970_s20 + $0x30] sm:$0xff] }
 0x226   : > { %v3951_v44 = vmax.f32 %v3893_v55, 0.0  ;;  %v4618_v55 = vsel %vm452_vm0, %v4613_v59, %v4617_v10  ;;  %v4634_v59 = vshll.u32 %v9405_v9, 16  ;;  %v4582_v10 = vpack.c.b16 %v4566_v21, %v4566_v21 }
 0x228   : > { %8469 = vst [vmem:[%s10175_s12 + $0x170] sm:$0xff] %v3951_v44  ;;  %v4565_v44 = vunpack.c.l.b16 %v8569_v14  ;;  %v9479_v14 = vld [vmem:[%s12087_s1 + $0x3e8] sm:$0xff] }
 0x229   : > { %v3805_v29 = vpop.f32.mrf.mxu2  ;;  %v3630_v45 = vpop.f32.mrf.mxu0  ;;  %7639 = vmatpush.bf16.msrb.mxu3 %v9479_v14 }
 0x22a   : > { %v3894_v37 = vpop.f32.mrf.mxu3  ;;  %v3806_v16 = vadd.f32 %v3805_v29, %v3717_v33  ;;  %v3719_v5 = vpop.f32.mrf.mxu1  ;;  %v3631_v49 = vadd.f32 %v11077_v17, %v3630_v45  ;;  %v4622_v33 = vshll.u32 %v9404_v43, 16  ;;  %v4581_v34 = vpack.c.b16 %v4565_v44, %v4565_v44 }
 0x22c   : > { %v3895_v2 = vadd.f32 %v3894_v37, %v3806_v16  ;;  %5068 = vmatmul.bf16.vlgmr.msra.gmra.mxu0 %v9386_v56  ;;  %v3720_v27 = vadd.f32 %v3719_v5, %v3631_v49  ;;  %v4260_v56 = vrot.slane %v4258_v50, 1  ;;  %v4620_v49 = vshrl.u32 %v9404_v43, 16 }
 0x22d   : > { %5157 = vmatmul.bf16.vlgmr.msra.gmra.mxu1 %v4254_v4  ;;  %v4268_v4 = vshrl.u32 %v9388_v26, 16  ;;  %v4277_v50 = vrot.slane %v4275_v7, 1 }
 0x22e   : > { %v3952_v22 = vmax.f32 %v3895_v2, 0.0  ;;  %5246 = vmatmul.bf16.vlgmr.msra.gmra.mxu2 %v9402_v24  ;;  %v4261_v11 = vor.u32 %v4260_v56, %v4256_v35  ;;  %v9389_v35 = vld [vmem:[%s9970_s20 + $0x30] sm:$0xff]  ;;  %v4214_v56 = vunpack.c.l.b16 %v8522_v36 }
 0x22f   : > { %5335 = vmatmul.bf16.vlgmr.msra.gmra.mxu3 %v4606_v19  ;;  %v4624_v19 = vrot.slane %v4622_v33, 1  ;;  %v8523_v33 = vld [vmem:[%s9970_s20 + $0x44] sm:$0x1] }
 0x230   : > { %8470 = vst [vmem:[%s10175_s12 + $0x178] sm:$0xff] %v3952_v22  ;;  %v4266_v48 = vsel %vm452_vm0, %v4261_v11, %v4265_v32  ;;  %v4282_v11 = vshll.u32 %v9389_v35, 16  ;;  %v4230_v32 = vpack.c.b16 %v4214_v56, %v4214_v56 }
 0x231   : > { %v3808_v31 = vpop.f32.mrf.mxu2  ;;  %v3632_v0 = vpop.f32.mrf.mxu0  ;;  %v4625_v52 = vor.u32 %v4624_v19, %v4620_v49  ;;  %v9390_v49 = vld [vmem:[%s9970_s20 + $0x3c] sm:$0xff]  ;;  %v4215_v19 = vunpack.c.l.b16 %v8523_v33 }
 0x232   : > { %v3897_v6 = vpop.f32.mrf.mxu3  ;;  %v3809_v51 = vadd.f32 %v3808_v31, %v3720_v27  ;;  %v3721_v62 = vpop.f32.mrf.mxu1  ;;  %v3633_v58 = vadd.f32 %v11077_v17, %v3632_v0  ;;  %v9470_v33 = vld [vmem:[%s12087_s1 + $0x3a0] sm:$0xff] }
 0x233   : > { %v4231_v36 = vpack.c.b16 %v4215_v19, %v4215_v19  ;;  %7551 = vmatpush.bf16.msrb.mxu2 %v9470_v33 }
 0x234   : > { %v3898_v24 = vadd.f32 %v3897_v6, %v3809_v51  ;;  %v3722_v20 = vadd.f32 %v3721_v62, %v3633_v58 }
 0x235   : > { %v4299_v56 = vshll.u32 %v4231_v36, 16 }
 0x236   : > { %v3953_v42 = vmax.f32 %v3898_v24, 0.0 }
 0x238   : > { %8471 = vst [vmem:[%s10175_s12 + $0x180] sm:$0xff] %v3953_v42 }
 0x239   : > { %v3810_v63 = vpop.f32.mrf.mxu2  ;;  %v3635_v46 = vpop.f32.mrf.mxu0 }
 0x23a   : > { %v3899_v54 = vpop.f32.mrf.mxu3  ;;  %v3811_v53 = vadd.f32 %v3810_v63, %v3722_v20  ;;  %v3724_v47 = vpop.f32.mrf.mxu1  ;;  %v3636_v40 = vadd.f32 %v11077_v17, %v3635_v46  ;;  %v9455_v20 = vld [vmem:[%s12087_s1 + $0x328] sm:$0xff] }
 0x23b   : > { %7372 = vmatpush.bf16.msrb.mxu0 %v9455_v20  ;;  %v8572_v20 = vld [vmem:[%s9970_s20 + $0x5c] sm:$0x1] }
 0x23c   : > { %v3900_v60 = vadd.f32 %v3899_v54, %v3811_v53  ;;  %5073 = vmatmul.bf16.gmra.mxu0 %v9387_v12  ;;  %v3725_v8 = vadd.f32 %v3724_v47, %v3636_v40  ;;  %v4272_v12 = vrot.slane %v4270_v61, 1  ;;  %v4280_v47 = vshrl.u32 %v9389_v35, 16 }
 0x23d   : > { %5162 = vmatmul.bf16.gmra.mxu1 %v4266_v48  ;;  %v4284_v48 = vrot.slane %v4282_v11, 1  ;;  %v4636_v40 = vrot.slane %v4634_v59, 1  ;;  %v4301_v11 = vrot.slane %v4299_v56, 1 }
 0x23e   : > { %v3954_v38 = vmax.f32 %v3900_v60, 0.0  ;;  %5251 = vmatmul.bf16.gmra.mxu2 %v9403_v30  ;;  %v4627_v30 = vshll.u32 %v4581_v34, 16  ;;  %v4273_v27 = vor.u32 %v4272_v12, %v4268_v4 }
 0x23f   : > { %5340 = vmatmul.bf16.gmra.mxu3 %v4618_v55  ;;  %v4639_v55 = vshll.u32 %v4582_v10, 16  ;;  %v4637_v61 = vor.u32 %v4636_v40, %v4632_v57  ;;  %v8524_v10 = vld [vmem:[%s9970_s20 + $0x50] sm:$0x1]  ;;  %v9407_v40 = vld [vmem:[%s9970_s20 + $0x54] sm:$0xff] }
 0x240   : > { %8472 = vst [vmem:[%s10175_s12 + $0x188] sm:$0xff] %v3954_v38  ;;  %v4629_v3 = vrot.slane %v4627_v30, 1  ;;  %v4278_v62 = vsel %vm452_vm0, %v4273_v27, %v4277_v50  ;;  %v4285_v38 = vor.u32 %v4284_v48, %v4280_v47  ;;  %v9391_v47 = vld [vmem:[%s9970_s20 + $0x48] sm:$0xff]  ;;  %v4216_v48 = vunpack.c.l.b16 %v8524_v10 }
 0x241   : > { %v3813_v29 = vpop.f32.mrf.mxu2  ;;  %v3637_v45 = vpop.f32.mrf.mxu0  ;;  %v4641_v1 = vrot.slane %v4639_v55, 1  ;;  %v4568_v55 = vunpack.c.l.b16 %v8572_v20  ;;  %v4656_v19 = vshrl.u32 %v9407_v40, 16 }
 0x242   : > { %v3902_v37 = vpop.f32.mrf.mxu3  ;;  %v3814_v16 = vadd.f32 %v3813_v29, %v3725_v8  ;;  %v3726_v5 = vpop.f32.mrf.mxu1  ;;  %v3638_v2 = vadd.f32 %v11077_v17, %v3637_v45  ;;  %v4630_v41 = vsel %vm452_vm0, %v4625_v52, %v4629_v3  ;;  %v8571_v29 = vld [vmem:[%s9970_s20 + $0x50] sm:$0x1]  ;;  %v4294_v3 = vshll.u32 %v9390_v49, 16 }
 0x244   : > { %v3903_v15 = vadd.f32 %v3902_v37, %v3814_v16  ;;  %v3727_v28 = vadd.f32 %v3726_v5, %v3638_v2  ;;  %v9463_v37 = vld [vmem:[%s12087_s1 + $0x368] sm:$0xff] }
 0x245   : > { %7461 = vmatpush.bf16.msrb.mxu1 %v9463_v37  ;;  %v9406_v2 = vld [vmem:[%s9970_s20 + $0x48] sm:$0xff] }
 0x246   : > { %v3955_v22 = vmax.f32 %v3903_v15, 0.0  ;;  %v4642_v15 = vsel %vm452_vm0, %v4637_v61, %v4641_v1  ;;  %v4658_v61 = vshll.u32 %v9407_v40, 16  ;;  %v4584_v1 = vpack.c.b16 %v4568_v55, %v4568_v55 }
 0x248   : > { %8473 = vst [vmem:[%s10175_s12 + $0x190] sm:$0xff] %v3955_v22  ;;  %v4567_v22 = vunpack.c.l.b16 %v8571_v29  ;;  %v9478_v29 = vld [vmem:[%s12087_s1 + $0x3e0] sm:$0xff] }
 0x249   : > { %v3815_v23 = vpop.f32.mrf.mxu2  ;;  %v3640_v51 = vpop.f32.mrf.mxu0  ;;  %7640 = vmatpush.bf16.msrb.mxu3 %v9478_v29 }
 0x24a   : > { %v3904_v31 = vpop.f32.mrf.mxu3  ;;  %v3816_v6 = vadd.f32 %v3815_v23, %v3727_v28  ;;  %v3729_v0 = vpop.f32.mrf.mxu1  ;;  %v3641_v39 = vadd.f32 %v11077_v17, %v3640_v51  ;;  %v4646_v28 = vshll.u32 %v9406_v2, 16  ;;  %v4583_v18 = vpack.c.b16 %v4567_v22, %v4567_v22 }
 0x24c   : > { %v3905_v24 = vadd.f32 %v3904_v31, %v3816_v6  ;;  %5078 = vmatmul.bf16.gmra.mxu0 %v9388_v26  ;;  %v3730_v42 = vadd.f32 %v3729_v0, %v3641_v39  ;;  %v4287_v26 = vshll.u32 %v4230_v32, 16  ;;  %v4644_v39 = vshrl.u32 %v9406_v2, 16 }
 0x24d   : > { %5167 = vmatmul.bf16.gmra.mxu1 %v4278_v62  ;;  %v4292_v62 = vshrl.u32 %v9390_v49, 16 }
 0x24e   : > { %v3956_v58 = vmax.f32 %v3905_v24, 0.0  ;;  %5256 = vmatmul.bf16.gmra.mxu2 %v9404_v43  ;;  %v4289_v8 = vrot.slane %v4287_v26, 1 }
 0x24f   : > { %5345 = vmatmul.bf16.gmra.mxu3 %v4630_v41  ;;  %v4648_v41 = vrot.slane %v4646_v28, 1  ;;  %v8525_v28 = vld [vmem:[%s9970_s20 + $0x5c] sm:$0x1] }
 0x250   : > { %8474 = vst [vmem:[%s10175_s12 + $0x198] sm:$0xff] %v3956_v58  ;;  %v4290_v7 = vsel %vm452_vm0, %v4285_v38, %v4289_v8  ;;  %v4306_v38 = vshll.u32 %v9391_v47, 16  ;;  %v4232_v8 = vpack.c.b16 %v4216_v48, %v4216_v48 }
 0x251   : > { %v3818_v25 = vpop.f32.mrf.mxu2  ;;  %v3642_v53 = vpop.f32.mrf.mxu0  ;;  %v4649_v32 = vor.u32 %v4648_v41, %v4644_v39  ;;  %v9392_v39 = vld [vmem:[%s9970_s20 + $0x54] sm:$0xff]  ;;  %v4217_v41 = vunpack.c.l.b16 %v8525_v28 }
 0x252   : > { %v3907_v63 = vpop.f32.mrf.mxu3  ;;  %v3819_v54 = vadd.f32 %v3818_v25, %v3730_v42  ;;  %v3731_v46 = vpop.f32.mrf.mxu1  ;;  %v3643_v44 = vadd.f32 %v11077_v17, %v3642_v53  ;;  %v9469_v28 = vld [vmem:[%s12087_s1 + $0x398] sm:$0xff] }
 0x253   : > { %v4233_v10 = vpack.c.b16 %v4217_v41, %v4217_v41  ;;  %7552 = vmatpush.bf16.msrb.mxu2 %v9469_v28 }
 0x254   : > { %v3908_v43 = vadd.f32 %v3907_v63, %v3819_v54  ;;  %v3732_v34 = vadd.f32 %v3731_v46, %v3643_v44 }
 0x255   : > { %v4323_v48 = vshll.u32 %v4233_v10, 16 }
 0x256   : > { %v3957_v60 = vmax.f32 %v3908_v43, 0.0 }
 0x258   : > { %8475 = vst [vmem:[%s10175_s12 + $0x1a0] sm:$0xff] %v3957_v60 }
 0x259   : > { %v3820_v16 = vpop.f32.mrf.mxu2  ;;  %v3645_v4 = vpop.f32.mrf.mxu0 }
 0x25a   : > { %v3909_v45 = vpop.f32.mrf.mxu3  ;;  %v3821_v5 = vadd.f32 %v3820_v16, %v3732_v34  ;;  %v3734_v12 = vpop.f32.mrf.mxu1  ;;  %v3646_v30 = vadd.f32 %v11077_v17, %v3645_v4  ;;  %v9454_v34 = vld [vmem:[%s12087_s1 + $0x320] sm:$0xff] }
 0x25b   : > { %7373 = vmatpush.bf16.msrb.mxu0 %v9454_v34  ;;  %v8574_v34 = vld [vmem:[%s9970_s20 + $0x74] sm:$0x1] }
 0x25c   : > { %v3910_v27 = vadd.f32 %v3909_v45, %v3821_v5  ;;  %5083 = vmatmul.bf16.gmra.mxu0 %v9389_v35  ;;  %v3735_v52 = vadd.f32 %v3734_v12, %v3646_v30  ;;  %v4296_v35 = vrot.slane %v4294_v3, 1  ;;  %v4304_v12 = vshrl.u32 %v9391_v47, 16 }
 0x25d   : > { %5172 = vmatmul.bf16.gmra.mxu1 %v4290_v7  ;;  %v4308_v7 = vrot.slane %v4306_v38, 1  ;;  %v4660_v30 = vrot.slane %v4658_v61, 1  ;;  %v4325_v38 = vrot.slane %v4323_v48, 1 }
 0x25e   : > { %v3958_v50 = vmax.f32 %v3910_v27, 0.0  ;;  %5261 = vmatmul.bf16.gmra.mxu2 %v9405_v9  ;;  %v4651_v9 = vshll.u32 %v4583_v18, 16  ;;  %v4297_v42 = vor.u32 %v4296_v35, %v4292_v62 }
 0x25f   : > { %5350 = vmatmul.bf16.gmra.mxu3 %v4642_v15  ;;  %v4663_v15 = vshll.u32 %v4584_v1, 16  ;;  %v4661_v3 = vor.u32 %v4660_v30, %v4656_v19  ;;  %v8526_v1 = vld [vmem:[%s9970_s20 + $0x68] sm:$0x1]  ;;  %v9409_v30 = vld [vmem:[%s9970_s20 + $0x6c] sm:$0xff] }
 0x260   : > { %8476 = vst [vmem:[%s10175_s12 + $0x1a8] sm:$0xff] %v3958_v50  ;;  %v4653_v59 = vrot.slane %v4651_v9, 1  ;;  %v4302_v46 = vsel %vm452_vm0, %v4297_v42, %v4301_v11  ;;  %v4309_v50 = vor.u32 %v4308_v7, %v4304_v12  ;;  %v9393_v12 = vld [vmem:[%s9970_s20 + $0x60] sm:$0xff]  ;;  %v4218_v7 = vunpack.c.l.b16 %v8526_v1 }
 0x261   : > { %v3823_v23 = vpop.f32.mrf.mxu2  ;;  %v3647_v51 = vpop.f32.mrf.mxu0  ;;  %v4665_v36 = vrot.slane %v4663_v15, 1  ;;  %v4570_v15 = vunpack.c.l.b16 %v8574_v34  ;;  %v4680_v41 = vshrl.u32 %v9409_v30, 16 }
 0x262   : > { %v3912_v31 = vpop.f32.mrf.mxu3  ;;  %v3824_v6 = vadd.f32 %v3823_v23, %v3735_v52  ;;  %v3736_v0 = vpop.f32.mrf.mxu1  ;;  %v3648_v24 = vadd.f32 %v11077_v17, %v3647_v51  ;;  %v4654_v57 = vsel %vm452_vm0, %v4649_v32, %v4653_v59  ;;  %v8573_v23 = vld [vmem:[%s9970_s20 + $0x68] sm:$0x1]  ;;  %v4318_v59 = vshll.u32 %v9392_v39, 16 }
 0x264   : > { %v3913_v21 = vadd.f32 %v3912_v31, %v3824_v6  ;;  %v3737_v13 = vadd.f32 %v3736_v0, %v3648_v24  ;;  %v9462_v31 = vld [vmem:[%s12087_s1 + $0x360] sm:$0xff] }
 0x265   : > { %7462 = vmatpush.bf16.msrb.mxu1 %v9462_v31  ;;  %v9408_v24 = vld [vmem:[%s9970_s20 + $0x60] sm:$0xff] }
 0x266   : > { %v3959_v58 = vmax.f32 %v3913_v21, 0.0  ;;  %v4666_v21 = vsel %vm452_vm0, %v4661_v3, %v4665_v36  ;;  %v4682_v3 = vshll.u32 %v9409_v30, 16  ;;  %v4586_v36 = vpack.c.b16 %v4570_v15, %v4570_v15  ;;  %v11261_v15 = vld [vmem:[%s12088_s2] ss:$0 sm:$0xff] }
 0x268   : > { %8477 = vst [vmem:[%s10175_s12 + $0x1b0] sm:$0xff] %v3959_v58  ;;  %v4569_v58 = vunpack.c.l.b16 %v8573_v23  ;;  %v9477_v23 = vld [vmem:[%s12087_s1 + $0x3d8] sm:$0xff] }
 0x269   : > { %v3825_v14 = vpop.f32.mrf.mxu2  ;;  %v3650_v54 = vpop.f32.mrf.mxu0  ;;  %7641 = vmatpush.bf16.msrb.mxu3 %v9477_v23 }
 0x26a   : > { %v3914_v25 = vpop.f32.mrf.mxu3  ;;  %v3826_v63 = vadd.f32 %v3825_v14, %v3737_v13  ;;  %v3739_v53 = vpop.f32.mrf.mxu1  ;;  %v3651_v26 = vadd.f32 %v11077_v17, %v3650_v54  ;;  %v4670_v13 = vshll.u32 %v9408_v24, 16  ;;  %v4585_v20 = vpack.c.b16 %v4569_v58, %v4569_v58 }
 0x26c   : > { %v3915_v43 = vadd.f32 %v3914_v25, %v3826_v63  ;;  %5088 = vmatmul.bf16.gmra.mxu0 %v9390_v49  ;;  %v3740_v60 = vadd.f32 %v3739_v53, %v3651_v26  ;;  %v4311_v49 = vshll.u32 %v4232_v8, 16  ;;  %v4668_v26 = vshrl.u32 %v9408_v24, 16 }
 0x26d   : > { %5177 = vmatmul.bf16.gmra.mxu1 %v4302_v46  ;;  %v4316_v46 = vshrl.u32 %v9392_v39, 16 }
 0x26e   : > { %v3960_v44 = vmax.f32 %v3915_v43, 0.0  ;;  %5266 = vmatmul.bf16.gmra.mxu2 %v9406_v2  ;;  %v4313_v52 = vrot.slane %v4311_v49, 1 }
 0x26f   : > { %5355 = vmatmul.bf16.gmra.mxu3 %v4654_v57  ;;  %v4672_v57 = vrot.slane %v4670_v13, 1  ;;  %v8527_v13 = vld [vmem:[%s9970_s20 + $0x74] sm:$0x1] }
 0x270   : > { %8478 = vst [vmem:[%s10175_s12 + $0x1b8] sm:$0xff] %v3960_v44  ;;  %v4314_v56 = vsel %vm452_vm0, %v4309_v50, %v4313_v52  ;;  %v4330_v50 = vshll.u32 %v9393_v12, 16  ;;  %v4234_v52 = vpack.c.b16 %v4218_v7, %v4218_v7 }
 0x271   : > { %v3828_v37 = vpop.f32.mrf.mxu2  ;;  %v3652_v5 = vpop.f32.mrf.mxu0  ;;  %v4673_v8 = vor.u32 %v4672_v57, %v4668_v26  ;;  %v9394_v26 = vld [vmem:[%s9970_s20 + $0x6c] sm:$0xff]  ;;  %v4219_v57 = vunpack.c.l.b16 %v8527_v13 }
 0x272   : > { %v3917_v16 = vpop.f32.mrf.mxu3  ;;  %v3829_v45 = vadd.f32 %v3828_v37, %v3740_v60  ;;  %v3741_v4 = vpop.f32.mrf.mxu1  ;;  %v3653_v22 = vadd.f32 %v11077_v17, %v3652_v5  ;;  %v9468_v13 = vld [vmem:[%s12087_s1 + $0x390] sm:$0xff] }
 0x273   : > { %v4235_v1 = vpack.c.b16 %v4219_v57, %v4219_v57  ;;  %7553 = vmatpush.bf16.msrb.mxu2 %v9468_v13 }
 0x274   : > { %v3918_v2 = vadd.f32 %v3917_v16, %v3829_v45  ;;  %v3742_v18 = vadd.f32 %v3741_v4, %v3653_v22 }
 0x276   : > { %v3961_v27 = vmax.f32 %v3918_v2, 0.0 }
 0x278   : > { %8479 = vst [vmem:[%s10175_s12 + $0x1c0] sm:$0xff] %v3961_v27 }
 0x279   : > { %v3830_v6 = vpop.f32.mrf.mxu2  ;;  %v3655_v62 = vpop.f32.mrf.mxu0 }
 0x27a   : > { %v3919_v51 = vpop.f32.mrf.mxu3  ;;  %v3831_v0 = vadd.f32 %v3830_v6, %v3742_v18  ;;  %v3744_v35 = vpop.f32.mrf.mxu1  ;;  %v3656_v9 = vadd.f32 %v11077_v17, %v3655_v62  ;;  %v9453_v18 = vld [vmem:[%s12087_s1 + $0x318] sm:$0xff] }
 0x27b   : > { %7374 = vmatpush.bf16.msrb.mxu0 %v9453_v18  ;;  %v8576_v18 = vld [vmem:[%s9970_s20 + $0x8c] sm:$0x1] }
 0x27c   : > { %v3920_v42 = vadd.f32 %v3919_v51, %v3831_v0  ;;  %5093 = vmatmul.bf16.gmra.mxu0 %v9391_v47  ;;  %v3745_v32 = vadd.f32 %v3744_v35, %v3656_v9  ;;  %v4320_v47 = vrot.slane %v4318_v59, 1  ;;  %v4328_v35 = vshrl.u32 %v9393_v12, 16 }
 0x27d   : > { %5182 = vmatmul.bf16.gmra.mxu1 %v4314_v56  ;;  %v4332_v56 = vrot.slane %v4330_v50, 1  ;;  %v4684_v9 = vrot.slane %v4682_v3, 1 }
 0x27e   : > { %v3962_v11 = vmax.f32 %v3920_v42, 0.0  ;;  %5271 = vmatmul.bf16.gmra.mxu2 %v9407_v40  ;;  %v4675_v40 = vshll.u32 %v4585_v20, 16  ;;  %v4321_v60 = vor.u32 %v4320_v47, %v4316_v46 }
 0x27f   : > { %5360 = vmatmul.bf16.gmra.mxu3 %v4666_v21  ;;  %v4687_v21 = vshll.u32 %v4586_v36, 16  ;;  %v4685_v59 = vor.u32 %v4684_v9, %v4680_v41  ;;  %v8528_v36 = vld [vmem:[%s9970_s20 + $0x80] sm:$0x1]  ;;  %v9411_v9 = vld [vmem:[%s9970_s20 + $0x84] sm:$0xff] }
 0x280   : > { %8480 = vst [vmem:[%s10175_s12 + $0x1c8] sm:$0xff] %v3962_v11  ;;  %v4677_v61 = vrot.slane %v4675_v40, 1  ;;  %v4326_v4 = vsel %vm452_vm0, %v4321_v60, %v4325_v38  ;;  %v4333_v11 = vor.u32 %v4332_v56, %v4328_v35  ;;  %v9395_v35 = vld [vmem:[%s9970_s20 + $0x78] sm:$0xff]  ;;  %v4220_v56 = vunpack.c.l.b16 %v8528_v36 }
 0x281   : > { %v3833_v14 = vpop.f32.mrf.mxu2  ;;  %v3657_v54 = vpop.f32.mrf.mxu0  ;;  %v4689_v10 = vrot.slane %v4687_v21, 1  ;;  %v4572_v21 = vunpack.c.l.b16 %v8576_v18  ;;  %v4704_v57 = vshrl.u32 %v9411_v9, 16 }
 0x282   : > { %v3922_v25 = vpop.f32.mrf.mxu3  ;;  %v3834_v63 = vadd.f32 %v3833_v14, %v3745_v32  ;;  %v3746_v53 = vpop.f32.mrf.mxu1  ;;  %v3658_v43 = vadd.f32 %v11077_v17, %v3657_v54  ;;  %v4678_v19 = vsel %vm452_vm0, %v4673_v8, %v4677_v61  ;;  %v8575_v14 = vld [vmem:[%s9970_s20 + $0x80] sm:$0x1]  ;;  %v4342_v61 = vshll.u32 %v9394_v26, 16 }
 0x284   : > { %v3923_v55 = vadd.f32 %v3922_v25, %v3834_v63  ;;  %v3747_v33 = vadd.f32 %v3746_v53, %v3658_v43  ;;  %v9461_v25 = vld [vmem:[%s12087_s1 + $0x358] sm:$0xff] }
 0x285   : > { %7463 = vmatpush.bf16.msrb.mxu1 %v9461_v25  ;;  %v9410_v43 = vld [vmem:[%s9970_s20 + $0x78] sm:$0xff] }
 0x286   : > { %v3963_v44 = vmax.f32 %v3923_v55, 0.0  ;;  %v4690_v55 = vsel %vm452_vm0, %v4685_v59, %v4689_v10  ;;  %v4692_v7 = vshrl.u32 %v9410_v43, 16  ;;  %v4706_v59 = vshll.u32 %v9411_v9, 16 }
 0x287   : > { %v4588_v10 = vpack.c.b16 %v4572_v21, %v4572_v21 }
 0x288   : > { %8481 = vst [vmem:[%s10175_s12 + $0x1d0] sm:$0xff] %v3963_v44  ;;  %v4571_v44 = vunpack.c.l.b16 %v8575_v14  ;;  %v9476_v14 = vld [vmem:[%s12087_s1 + $0x3d0] sm:$0xff] }
 0x289   : > { %v3835_v29 = vpop.f32.mrf.mxu2  ;;  %v3660_v45 = vpop.f32.mrf.mxu0  ;;  %7642 = vmatpush.bf16.msrb.mxu3 %v9476_v14 }
 0x28a   : > { %v3924_v37 = vpop.f32.mrf.mxu3  ;;  %v3836_v16 = vadd.f32 %v3835_v29, %v3747_v33  ;;  %v3749_v5 = vpop.f32.mrf.mxu1  ;;  %v3661_v49 = vadd.f32 %v11077_v17, %v3660_v45  ;;  %v4694_v33 = vshll.u32 %v9410_v43, 16  ;;  %v4587_v34 = vpack.c.b16 %v4571_v44, %v4571_v44 }
 0x28c   : > { %v3925_v2 = vadd.f32 %v3924_v37, %v3836_v16  ;;  %5098 = vmatmul.bf16.gmra.mxu0 %v9392_v39  ;;  %v3750_v27 = vadd.f32 %v3749_v5, %v3661_v49  ;;  %v4335_v39 = vshll.u32 %v4234_v52, 16  ;;  %v4340_v5 = vshrl.u32 %v9394_v26, 16 }
 0x28d   : > { %5187 = vmatmul.bf16.gmra.mxu1 %v4326_v4  ;;  %v4344_v4 = vrot.slane %v4342_v61, 1  ;;  %v4696_v49 = vrot.slane %v4694_v33, 1  ;;  %v8529_v33 = vld [vmem:[%s9970_s20 + $0x8c] sm:$0x1] }
 0x28e   : > { %v3964_v22 = vmax.f32 %v3925_v2, 0.0  ;;  %5276 = vmatmul.bf16.gmra.mxu2 %v9408_v24  ;;  %v4337_v32 = vrot.slane %v4335_v39, 1 }
 0x28f   : > { %5365 = vmatmul.bf16.gmra.mxu3 %v4678_v19  ;;  %v4699_v19 = vshll.u32 %v4587_v34, 16  ;;  %v4697_v52 = vor.u32 %v4696_v49, %v4692_v7  ;;  %v9396_v7 = vld [vmem:[%s9970_s20 + $0x84] sm:$0xff]  ;;  %v4221_v49 = vunpack.c.l.b16 %v8529_v33 }
 0x290   : > { %8482 = vst [vmem:[%s10175_s12 + $0x1d8] sm:$0xff] %v3964_v22  ;;  %v4338_v48 = vsel %vm452_vm0, %v4333_v11, %v4337_v32  ;;  %v4354_v11 = vshll.u32 %v9395_v35, 16  ;;  %v4236_v32 = vpack.c.b16 %v4220_v56, %v4220_v56  ;;  %v9467_v33 = vld [vmem:[%s12087_s1 + $0x388] sm:$0xff] }
 0x291   : > { %v3838_v31 = vpop.f32.mrf.mxu2  ;;  %v3662_v0 = vpop.f32.mrf.mxu0  ;;  %v4701_v3 = vrot.slane %v4699_v19, 1  ;;  %v4237_v36 = vpack.c.b16 %v4221_v49, %v4221_v49  ;;  %7554 = vmatpush.bf16.msrb.mxu2 %v9467_v33 }
 0x292   : > { %v3927_v6 = vpop.f32.mrf.mxu3  ;;  %v3839_v51 = vadd.f32 %v3838_v31, %v3750_v27  ;;  %v3751_v62 = vpop.f32.mrf.mxu1  ;;  %v3663_v58 = vadd.f32 %v11077_v17, %v3662_v0  ;;  %v4345_v27 = vor.u32 %v4344_v4, %v4340_v5 }
 0x293   : > { %v4702_v41 = vsel %vm452_vm0, %v4697_v52, %v4701_v3  ;;  %v4366_v3 = vshll.u32 %v9396_v7, 16  ;;  %v4371_v56 = vshll.u32 %v4237_v36, 16 }
 0x294   : > { %v3928_v24 = vadd.f32 %v3927_v6, %v3839_v51  ;;  %v3752_v20 = vadd.f32 %v3751_v62, %v3663_v58 }
 0x296   : > { %v3965_v42 = vmax.f32 %v3928_v24, 0.0 }
 0x298   : > { %8483 = vst [vmem:[%s10175_s12 + $0x1e0] sm:$0xff] %v3965_v42 }
 0x299   : > { %v3840_v63 = vpop.f32.mrf.mxu2  ;;  %v3665_v46 = vpop.f32.mrf.mxu0 }
 0x29a   : > { %v3929_v54 = vpop.f32.mrf.mxu3  ;;  %v3841_v53 = vadd.f32 %v3840_v63, %v3752_v20  ;;  %v3754_v47 = vpop.f32.mrf.mxu1  ;;  %v3666_v40 = vadd.f32 %v11077_v17, %v3665_v46  ;;  %v9452_v20 = vld [vmem:[%s12087_s1 + $0x310] sm:$0xff] }
 0x29b   : > { %7375 = vmatpush.bf16.msrb.mxu0 %v9452_v20  ;;  %v8578_v20 = vld [vmem:[%s9970_s20 + $0xa4] sm:$0x1] }
 0x29c   : > { %v3930_v60 = vadd.f32 %v3929_v54, %v3841_v53  ;;  %5103 = vmatmul.bf16.gmra.mxu0 %v9393_v12  ;;  %v3755_v8 = vadd.f32 %v3754_v47, %v3666_v40  ;;  %v4347_v12 = vshll.u32 %v4235_v1, 16  ;;  %v4352_v47 = vshrl.u32 %v9395_v35, 16 }
 0x29d   : > { %5192 = vmatmul.bf16.gmra.mxu1 %v4338_v48  ;;  %v4356_v48 = vrot.slane %v4354_v11, 1  ;;  %v4708_v40 = vrot.slane %v4706_v59, 1  ;;  %v4373_v11 = vrot.slane %v4371_v56, 1 }
 0x29e   : > { %v3966_v38 = vmax.f32 %v3930_v60, 0.0  ;;  %5281 = vmatmul.bf16.gmra.mxu2 %v9409_v30  ;;  %v4349_v50 = vrot.slane %v4347_v12, 1 }
 0x29f   : > { %5370 = vmatmul.bf16.gmra.mxu3 %v4690_v55  ;;  %v4711_v55 = vshll.u32 %v4588_v10, 16  ;;  %v4709_v61 = vor.u32 %v4708_v40, %v4704_v57  ;;  %v8530_v10 = vld [vmem:[%s9970_s20 + $0x98] sm:$0x1]  ;;  %v9413_v40 = vld [vmem:[%s9970_s20 + $0x9c] sm:$0xff] }
 0x2a0   : > { %8484 = vst [vmem:[%s10175_s12 + $0x1e8] sm:$0xff] %v3966_v38  ;;  %v4350_v62 = vsel %vm452_vm0, %v4345_v27, %v4349_v50  ;;  %v4357_v38 = vor.u32 %v4356_v48, %v4352_v47  ;;  %v9397_v47 = vld [vmem:[%s9970_s20 + $0x90] sm:$0xff]  ;;  %v4222_v48 = vunpack.c.l.b16 %v8530_v10  ;;  %v4728_v49 = vshrl.u32 %v9413_v40, 16 }
 0x2a1   : > { %v3843_v29 = vpop.f32.mrf.mxu2  ;;  %v3667_v17 = vpop.f32.mrf.mxu0  ;;  %v4713_v1 = vrot.slane %v4711_v55, 1  ;;  %v4574_v55 = vunpack.c.l.b16 %v8578_v20 }
 0x2a2   : > { %v3932_v37 = vpop.f32.mrf.mxu3  ;;  %v3844_v16 = vadd.f32 %v3843_v29, %v3755_v8  ;;  %v3756_v45 = vpop.f32.mrf.mxu1  ;;  %v3668_v2 = vadd.f32 %v11261_v15, %v3667_v17  ;;  %v8577_v29 = vld [vmem:[%s9970_s20 + $0x98] sm:$0x1] }
 0x2a4   : > { %v3933_v30 = vadd.f32 %v3932_v37, %v3844_v16  ;;  %v3757_v28 = vadd.f32 %v3756_v45, %v3668_v2  ;;  %v9460_v37 = vld [vmem:[%s12087_s1 + $0x350] sm:$0xff] }
 0x2a5   : > { %7464 = vmatpush.bf16.msrb.mxu1 %v9460_v37  ;;  %v9412_v2 = vld [vmem:[%s9970_s20 + $0x90] sm:$0xff] }
 0x2a6   : > { %v3967_v22 = vmax.f32 %v3933_v30, 0.0  ;;  %v4714_v30 = vsel %vm452_vm0, %v4709_v61, %v4713_v1  ;;  %v4730_v61 = vshll.u32 %v9413_v40, 16  ;;  %v4590_v1 = vpack.c.b16 %v4574_v55, %v4574_v55 }
 0x2a8   : > { %8485 = vst [vmem:[%s10175_s12 + $0x1f0] sm:$0xff] %v3967_v22  ;;  %v4573_v22 = vunpack.c.l.b16 %v8577_v29  ;;  %v9475_v29 = vld [vmem:[%s12087_s1 + $0x3c8] sm:$0xff] }
 0x2a9   : > { %v3845_v23 = vpop.f32.mrf.mxu2  ;;  %v5069_v51 = vpop.f32.mrf.mxu0  ;;  %7643 = vmatpush.bf16.msrb.mxu3 %v9475_v29 }
 0x2aa   : > { %v3934_v31 = vpop.f32.mrf.mxu3  ;;  %v3846_v6 = vadd.f32 %v3845_v23, %v3757_v28  ;;  %v5158_v0 = vpop.f32.mrf.mxu1  ;;  %v5070_v39 = vadd.f32 %v11261_v15, %v5069_v51  ;;  %v4718_v28 = vshll.u32 %v9412_v2, 16  ;;  %v4589_v18 = vpack.c.b16 %v4573_v22, %v4573_v22 }
 0x2ac   : > { %v3935_v24 = vadd.f32 %v3934_v31, %v3846_v6  ;;  %5108 = vmatmul.bf16.gmra.mxu0 %v9394_v26  ;;  %v5159_v42 = vadd.f32 %v5158_v0, %v5070_v39  ;;  %v4359_v26 = vshll.u32 %v4236_v32, 16  ;;  %v4716_v39 = vshrl.u32 %v9412_v2, 16 }
 0x2ad   : > { %5197 = vmatmul.bf16.gmra.mxu1 %v4350_v62  ;;  %v4364_v62 = vshrl.u32 %v9396_v7, 16 }
 0x2ae   : > { %v3968_v58 = vmax.f32 %v3935_v24, 0.0  ;;  %5286 = vmatmul.bf16.gmra.mxu2 %v9410_v43  ;;  %v4361_v8 = vrot.slane %v4359_v26, 1 }
 0x2af   : > { %5375 = vmatmul.bf16.gmra.mxu3 %v4702_v41  ;;  %v4720_v41 = vrot.slane %v4718_v28, 1  ;;  %v8531_v28 = vld [vmem:[%s9970_s20 + $0xa4] sm:$0x1] }
 0x2b0   : > { %8486 = vst [vmem:[%s10175_s12 + $0x1f8] sm:$0xff] %v3968_v58  ;;  %v4362_v12 = vsel %vm452_vm0, %v4357_v38, %v4361_v8  ;;  %v4378_v38 = vshll.u32 %v9397_v47, 16  ;;  %v4238_v8 = vpack.c.b16 %v4222_v48, %v4222_v48 }
 0x2b1   : > { %v5247_v25 = vpop.f32.mrf.mxu2  ;;  %v5071_v53 = vpop.f32.mrf.mxu0  ;;  %v4721_v32 = vor.u32 %v4720_v41, %v4716_v39  ;;  %v9398_v39 = vld [vmem:[%s9970_s20 + $0x9c] sm:$0xff]  ;;  %v4223_v41 = vunpack.c.l.b16 %v8531_v28 }
 0x2b2   : > { %v5336_v63 = vpop.f32.mrf.mxu3  ;;  %v5248_v54 = vadd.f32 %v5247_v25, %v5159_v42  ;;  %v5160_v46 = vpop.f32.mrf.mxu1  ;;  %v5072_v44 = vadd.f32 %v11261_v15, %v5071_v53  ;;  %v9466_v28 = vld [vmem:[%s12087_s1 + $0x380] sm:$0xff] }
 0x2b3   : > { %v4239_v10 = vpack.c.b16 %v4223_v41, %v4223_v41  ;;  %7555 = vmatpush.bf16.msrb.mxu2 %v9466_v28  ;;  %v8937_v28 = vld [vmem:[%s9970_s20 + $0x14] sm:$0x1] }
 0x2b4   : > { %v5337_v43 = vadd.f32 %v5336_v63, %v5248_v54  ;;  %v5161_v34 = vadd.f32 %v5160_v46, %v5072_v44 }
 0x2b5   : > { %v4395_v48 = vshll.u32 %v4239_v10, 16 }
 0x2b6   : > { %v5416_v60 = vmax.f32 %v5337_v43, 0.0 }
 0x2b8   : > { %8903 = vst [vmem:[%s10175_s12 + $0x200] sm:$0xff] %v5416_v60 }
 0x2b9   : > { %v5249_v16 = vpop.f32.mrf.mxu2  ;;  %v5074_v5 = vpop.f32.mrf.mxu0 }
 0x2ba   : > { %v5338_v17 = vpop.f32.mrf.mxu3  ;;  %v5250_v45 = vadd.f32 %v5249_v16, %v5161_v34  ;;  %v5163_v4 = vpop.f32.mrf.mxu1  ;;  %v5075_v19 = vadd.f32 %v11261_v15, %v5074_v5  ;;  %v9451_v34 = vld [vmem:[%s12087_s1 + $0x308] sm:$0xff] }
 0x2bb   : > { %7376 = vmatpush.bf16.msrb.mxu0 %v9451_v34  ;;  %v8580_v34 = vld [vmem:[%s9970_s20 + $0xbc] sm:$0x1] }
 0x2bc   : > { %v5339_v27 = vadd.f32 %v5338_v17, %v5250_v45  ;;  %5113 = vmatmul.bf16.gmra.mxu0 %v9395_v35  ;;  %v5164_v52 = vadd.f32 %v5163_v4, %v5075_v19  ;;  %v4368_v35 = vrot.slane %v4366_v3, 1  ;;  %v4376_v4 = vshrl.u32 %v9397_v47, 16 }
 0x2bd   : > { %5202 = vmatmul.bf16.gmra.mxu1 %v4362_v12  ;;  %v4380_v12 = vrot.slane %v4378_v38, 1  ;;  %v4732_v19 = vrot.slane %v4730_v61, 1  ;;  %v4397_v38 = vrot.slane %v4395_v48, 1 }
 0x2be   : > { %v5417_v50 = vmax.f32 %v5339_v27, 0.0  ;;  %5291 = vmatmul.bf16.gmra.mxu2 %v9411_v9  ;;  %v4723_v9 = vshll.u32 %v4589_v18, 16  ;;  %v4369_v42 = vor.u32 %v4368_v35, %v4364_v62 }
 0x2bf   : > { %5380 = vmatmul.bf16.gmra.mxu3 %v4714_v30  ;;  %v4735_v30 = vshll.u32 %v4590_v1, 16  ;;  %v4733_v3 = vor.u32 %v4732_v19, %v4728_v49  ;;  %v8532_v1 = vld [vmem:[%s9970_s20 + $0xb0] sm:$0x1]  ;;  %v9415_v19 = vld [vmem:[%s9970_s20 + $0xb4] sm:$0xff] }
 0x2c0   : > { %8904 = vst [vmem:[%s10175_s12 + $0x208] sm:$0xff] %v5417_v50  ;;  %v4725_v59 = vrot.slane %v4723_v9, 1  ;;  %v4374_v46 = vsel %vm452_vm0, %v4369_v42, %v4373_v11  ;;  %v4381_v50 = vor.u32 %v4380_v12, %v4376_v4  ;;  %v9399_v4 = vld [vmem:[%s9970_s20 + $0xa8] sm:$0xff]  ;;  %v4224_v12 = vunpack.c.l.b16 %v8532_v1 }
 0x2c1   : > { %v5252_v23 = vpop.f32.mrf.mxu2  ;;  %v5076_v51 = vpop.f32.mrf.mxu0  ;;  %v4737_v36 = vrot.slane %v4735_v30, 1  ;;  %v4576_v30 = vunpack.c.l.b16 %v8580_v34  ;;  %v4752_v41 = vshrl.u32 %v9415_v19, 16 }
 0x2c2   : > { %v5341_v31 = vpop.f32.mrf.mxu3  ;;  %v5253_v6 = vadd.f32 %v5252_v23, %v5164_v52  ;;  %v5165_v0 = vpop.f32.mrf.mxu1  ;;  %v5077_v24 = vadd.f32 %v11261_v15, %v5076_v51  ;;  %v4726_v57 = vsel %vm452_vm0, %v4721_v32, %v4725_v59  ;;  %v8579_v23 = vld [vmem:[%s9970_s20 + $0xb0] sm:$0x1]  ;;  %v4390_v59 = vshll.u32 %v9398_v39, 16 }
 0x2c4   : > { %v5342_v21 = vadd.f32 %v5341_v31, %v5253_v6  ;;  %v5166_v13 = vadd.f32 %v5165_v0, %v5077_v24  ;;  %v9459_v31 = vld [vmem:[%s12087_s1 + $0x348] sm:$0xff] }
 0x2c5   : > { %7465 = vmatpush.bf16.msrb.mxu1 %v9459_v31  ;;  %v9414_v24 = vld [vmem:[%s9970_s20 + $0xa8] sm:$0xff] }
 0x2c6   : > { %v5418_v58 = vmax.f32 %v5342_v21, 0.0  ;;  %v4738_v21 = vsel %vm452_vm0, %v4733_v3, %v4737_v36  ;;  %v4754_v3 = vshll.u32 %v9415_v19, 16  ;;  %v4592_v36 = vpack.c.b16 %v4576_v30, %v4576_v30 }
 0x2c8   : > { %8905 = vst [vmem:[%s10175_s12 + $0x210] sm:$0xff] %v5418_v58  ;;  %v4575_v58 = vunpack.c.l.b16 %v8579_v23  ;;  %v9474_v23 = vld [vmem:[%s12087_s1 + $0x3c0] sm:$0xff] }
 0x2c9   : > { %v5254_v14 = vpop.f32.mrf.mxu2  ;;  %v5079_v54 = vpop.f32.mrf.mxu0  ;;  %7644 = vmatpush.bf16.msrb.mxu3 %v9474_v23 }
 0x2ca   : > { %v5343_v25 = vpop.f32.mrf.mxu3  ;;  %v5255_v63 = vadd.f32 %v5254_v14, %v5166_v13  ;;  %v5168_v53 = vpop.f32.mrf.mxu1  ;;  %v5080_v26 = vadd.f32 %v11261_v15, %v5079_v54  ;;  %v4742_v13 = vshll.u32 %v9414_v24, 16  ;;  %v4591_v20 = vpack.c.b16 %v4575_v58, %v4575_v58 }
 0x2cc   : > { %v5344_v43 = vadd.f32 %v5343_v25, %v5255_v63  ;;  %5118 = vmatmul.bf16.gmra.mxu0 %v9396_v7  ;;  %v5169_v60 = vadd.f32 %v5168_v53, %v5080_v26  ;;  %v4383_v7 = vshll.u32 %v4238_v8, 16  ;;  %v4740_v26 = vshrl.u32 %v9414_v24, 16 }
 0x2cd   : > { %5207 = vmatmul.bf16.gmra.mxu1 %v4374_v46  ;;  %v4388_v46 = vshrl.u32 %v9398_v39, 16 }
 0x2ce   : > { %v5419_v44 = vmax.f32 %v5344_v43, 0.0  ;;  %5296 = vmatmul.bf16.gmra.mxu2 %v9412_v2  ;;  %v4385_v52 = vrot.slane %v4383_v7, 1 }
 0x2cf   : > { %5385 = vmatmul.bf16.gmra.mxu3 %v4726_v57  ;;  %v4744_v57 = vrot.slane %v4742_v13, 1  ;;  %v8533_v13 = vld [vmem:[%s9970_s20 + $0xbc] sm:$0x1] }
 0x2d0   : > { %8906 = vst [vmem:[%s10175_s12 + $0x218] sm:$0xff] %v5419_v44  ;;  %v4386_v56 = vsel %vm452_vm0, %v4381_v50, %v4385_v52  ;;  %v4402_v50 = vshll.u32 %v9399_v4, 16  ;;  %v4240_v52 = vpack.c.b16 %v4224_v12, %v4224_v12 }
 0x2d1   : > { %v5257_v37 = vpop.f32.mrf.mxu2  ;;  %v5081_v45 = vpop.f32.mrf.mxu0  ;;  %v4745_v8 = vor.u32 %v4744_v57, %v4740_v26  ;;  %v11355_v26 = vld [vmem:[%s9970_s20 + $0xb4] sm:$0xff]  ;;  %v4225_v57 = vunpack.c.l.b16 %v8533_v13  ;;  %v11387_v13 = vld [vmem:[%s9970_s20 + $0xcc] sm:$0xff] }
 0x2d2   : > { %v5346_v16 = vpop.f32.mrf.mxu3  ;;  %v5258_v17 = vadd.f32 %v5257_v37, %v5169_v60  ;;  %v5170_v5 = vpop.f32.mrf.mxu1  ;;  %v5082_v22 = vadd.f32 %v11261_v15, %v5081_v45 }
 0x2d3   : > { %v4241_v1 = vpack.c.b16 %v4225_v57, %v4225_v57 }
 0x2d4   : > { %v5347_v2 = vadd.f32 %v5346_v16, %v5258_v17  ;;  %v5171_v18 = vadd.f32 %v5170_v5, %v5082_v22 }
 0x2d5   : > { %v4419_v12 = vshll.u32 %v4241_v1, 16 }
 0x2d6   : > { %v5420_v27 = vmax.f32 %v5347_v2, 0.0 }
 0x2d8   : > { %8907 = vst [vmem:[%s10175_s12 + $0x220] sm:$0xff] %v5420_v27 }
 0x2d9   : > { %v5259_v6 = vpop.f32.mrf.mxu2  ;;  %v5084_v62 = vpop.f32.mrf.mxu0 }
 0x2da   : > { %v5348_v51 = vpop.f32.mrf.mxu3  ;;  %v5260_v0 = vadd.f32 %v5259_v6, %v5171_v18  ;;  %v5173_v35 = vpop.f32.mrf.mxu1  ;;  %v5085_v9 = vadd.f32 %v11261_v15, %v5084_v62  ;;  %v9450_v18 = vld [vmem:[%s12087_s1 + $0x300] sm:$0xff] }
 0x2db   : > { %7377 = vmatpush.bf16.msrb.mxu0 %v9450_v18 }
 0x2dc   : > { %v5349_v42 = vadd.f32 %v5348_v51, %v5260_v0  ;;  %5123 = vmatmul.bf16.gmra.mxu0 %v9397_v47  ;;  %v5174_v32 = vadd.f32 %v5173_v35, %v5085_v9  ;;  %v4392_v47 = vrot.slane %v4390_v59, 1  ;;  %v4400_v35 = vshrl.u32 %v9399_v4, 16 }
 0x2dd   : > { %5212 = vmatmul.bf16.gmra.mxu1 %v4386_v56  ;;  %v4404_v56 = vrot.slane %v4402_v50, 1  ;;  %v4756_v9 = vrot.slane %v4754_v3, 1 }
 0x2de   : > { %v5421_v11 = vmax.f32 %v5349_v42, 0.0  ;;  %5301 = vmatmul.bf16.gmra.mxu2 %v9413_v40  ;;  %v4747_v40 = vshll.u32 %v4591_v20, 16  ;;  %v4393_v60 = vor.u32 %v4392_v47, %v4388_v46 }
 0x2df   : > { %5390 = vmatmul.bf16.gmra.mxu3 %v4738_v21  ;;  %v4759_v21 = vshll.u32 %v4592_v36, 16  ;;  %v4757_v59 = vor.u32 %v4756_v9, %v4752_v41  ;;  %v4421_v36 = vrot.slane %v4419_v12, 1  ;;  %v9713_v9 = vld [vmem:[%s9970_s20 + $0x18] sm:$0xf0]  ;;  %v11403_v12 = vld [vmem:[%s9970_s20 + $0x24] sm:$0xff]  }
 0x2e0   : > { %8908 = vst [vmem:[%s10175_s12 + $0x228] sm:$0xff] %v5421_v11  ;;  %v4749_v61 = vrot.slane %v4747_v40, 1  ;;  %v4398_v5 = vsel %vm452_vm0, %v4393_v60, %v4397_v38  ;;  %v4405_v11 = vor.u32 %v4404_v56, %v4400_v35  ;;  %v11379_v56 = vld [vmem:[%s9970_s20 + $0xc0] sm:$0xff] }
 0x2e1   : > { %v5262_v14 = vpop.f32.mrf.mxu2  ;;  %v5086_v54 = vpop.f32.mrf.mxu0  ;;  %v4761_v10 = vrot.slane %v4759_v21, 1  ;;  %v9714_v21 = vld [vmem:[%s9970_s20 + $0x18] sm:$0xe] }
 0x2e2   : > { %v5351_v25 = vpop.f32.mrf.mxu3  ;;  %v5263_v63 = vadd.f32 %v5262_v14, %v5174_v32  ;;  %v5175_v53 = vpop.f32.mrf.mxu1  ;;  %v5087_v43 = vadd.f32 %v11261_v15, %v5086_v54  ;;  %v4750_v49 = vsel %vm452_vm0, %v4745_v8, %v4749_v61  ;;  %v8581_v14 = vld [vmem:[%s9970_s20 + $0xc8] sm:$0x1]  ;;  %v4414_v61 = vshll.u32 %v11355_v26, 16 }
 0x2e4   : > { %v5352_v55 = vadd.f32 %v5351_v25, %v5263_v63  ;;  %v5176_v33 = vadd.f32 %v5175_v53, %v5087_v43  ;;  %v9458_v25 = vld [vmem:[%s12087_s1 + $0x340] sm:$0xff] }
 0x2e5   : > { %7466 = vmatpush.bf16.msrb.mxu1 %v9458_v25  ;;  %v11360_v43 = vld [vmem:[%s9970_s20 + $0xc0] sm:$0xff] }
 0x2e6   : > { %v5422_v44 = vmax.f32 %v5352_v55, 0.0  ;;  %v4762_v55 = vsel %vm452_vm0, %v4757_v59, %v4761_v10  ;;  %v4764_v30 = vshrl.u32 %v11360_v43, 16 }
 0x2e8   : > { %8909 = vst [vmem:[%s10175_s12 + $0x230] sm:$0xff] %v5422_v44  ;;  %v4577_v44 = vunpack.c.l.b16 %v8581_v14 }
 0x2e9   : > { %v5264_v29 = vpop.f32.mrf.mxu2  ;;  %v5089_v17 = vpop.f32.mrf.mxu0 }
 0x2ea   : > { %v5353_v37 = vpop.f32.mrf.mxu3  ;;  %v5265_v16 = vadd.f32 %v5264_v29, %v5176_v33  ;;  %v5178_v45 = vpop.f32.mrf.mxu1  ;;  %v5090_v7 = vadd.f32 %v11261_v15, %v5089_v17  ;;  %v4766_v33 = vshll.u32 %v11360_v43, 16  ;;  %v4593_v34 = vpack.c.b16 %v4577_v44, %v4577_v44 }
 0x2ec   : > { %v5354_v2 = vadd.f32 %v5353_v37, %v5265_v16  ;;  %5128 = vmatmul.bf16.gmra.mxu0 %v9398_v39  ;;  %v5179_v27 = vadd.f32 %v5178_v45, %v5090_v7  ;;  %v4407_v39 = vshll.u32 %v4240_v52, 16  ;;  %v11367_v7 = vld [vmem:[%s9970_s20 + $0xc] sm:$0xff]  }
 0x2ed   : > { %5217 = vmatmul.bf16.gmra.mxu1 %v4398_v5  ;;  %v4412_v5 = vshrl.u32 %v11355_v26, 16 }
 0x2ee   : > { %v5423_v22 = vmax.f32 %v5354_v2, 0.0  ;;  %5306 = vmatmul.bf16.gmra.mxu2 %v9414_v24  ;;  %v4409_v32 = vrot.slane %v4407_v39, 1  ;;  %v4768_v2 = vrot.slane %v4766_v33, 1  ;;  %v5659_v39 = vunpack.c.l.b16 %v8937_v28  ;;  %v9689_v28 = vld [vmem:[%s9970_s20 + $0x18] sm:$0xf0] }
 0x2ef   : > { %5395 = vmatmul.bf16.gmra.mxu3 %v4750_v49  ;;  %v9830_v49 = vld [vmem:[%s9970_s20 + $0xc] sm:$0xf0] }
 0x2f0   : > { %8910 = vst [vmem:[%s10175_s12 + $0x238] sm:$0xff] %v5423_v22  ;;  %v4410_v48 = vsel %vm452_vm0, %v4405_v11, %v4409_v32  ;;  %v4771_v22 = vshll.u32 %v4593_v34, 16  ;;  %v4769_v18 = vor.u32 %v4768_v2, %v4764_v30 }
 0x2f1   : > { %v5267_v31 = vpop.f32.mrf.mxu2  ;;  %v5091_v0 = vpop.f32.mrf.mxu0 }
 0x2f2   : > { %v5356_v6 = vpop.f32.mrf.mxu3  ;;  %v5268_v51 = vadd.f32 %v5267_v31, %v5179_v27  ;;  %v5180_v62 = vpop.f32.mrf.mxu1  ;;  %v5092_v58 = vadd.f32 %v11261_v15, %v5091_v0  ;;  %v4773_v23 = vrot.slane %v4771_v22, 1  ;;  %v8534_v31 = vld [vmem:[%s9970_s20 + $0xc8] sm:$0x1]  ;;  %v9001_v0 = vld [vmem:[%s9970_s20 + $0x20] sm:$0x1] }
 0x2f3   : > { %v4226_v32 = vunpack.c.l.b16 %v8534_v31  ;;  %v6059_v14 = vunpack.c.l.b16 %v9001_v0  ;;  %v9690_v31 = vld [vmem:[%s9970_s20 + $0x18] sm:$0xe] }
 0x2f4   : > { %v5357_v24 = vadd.f32 %v5356_v6, %v5268_v51  ;;  %v5181_v20 = vadd.f32 %v5180_v62, %v5092_v58  ;;  %v8582_v51 = vld [vmem:[%s9970_s20 + $0xd4] sm:$0x1]  ;;  %v4774_v10 = vsel %vm452_vm0, %v4769_v18, %v4773_v23 }
 0x2f5   : > { %v4242_v57 = vpack.c.b16 %v4226_v32, %v4226_v32  ;;  %v11395_v44 = vpack.c.b16 %v6059_v14, %v6059_v14 }
 0x2f6   : > { %v5424_v42 = vmax.f32 %v5357_v24, 0.0 }
 0x2f8   : > { %8911 = vst [vmem:[%s10175_s12 + $0x240] sm:$0xff] %v5424_v42 }
 0x2f9   : > { %v5269_v63 = vpop.f32.mrf.mxu2  ;;  %v5094_v46 = vpop.f32.mrf.mxu0 }
 0x2fa   : > { %v5358_v54 = vpop.f32.mrf.mxu3  ;;  %v5270_v53 = vadd.f32 %v5269_v63, %v5181_v20  ;;  %v5183_v47 = vpop.f32.mrf.mxu1  ;;  %v5095_v40 = vadd.f32 %v11261_v15, %v5094_v46  ;;  %v4578_v20 = vunpack.c.l.b16 %v8582_v51  ;;  %v9715_v63 = vor.u32 %v9714_v21, %v9713_v9 }
 0x2fc   : > { %v5359_v60 = vadd.f32 %v5358_v54, %v5270_v53  ;;  %5133 = vmatmul.bf16.gmra.mxu0 %v9399_v4  ;;  %v5184_v8 = vadd.f32 %v5183_v47, %v5095_v40  ;;  %v4416_v4 = vrot.slane %v4414_v61, 1  ;;  %v4426_v54 = vshll.u32 %v11379_v56, 16 }
 0x2fd   : > { %5222 = vmatmul.bf16.gmra.mxu1 %v4410_v48  ;;  %v11391_v53 = vpack.c.b16 %v5659_v39, %v5659_v39  ;;  %v4778_v40 = vshll.u32 %v11387_v13, 16  ;;  %v6186_v22 = vshrl.u32 %v9715_v63, 16 }
 0x2fe   : > { %v5425_v38 = vmax.f32 %v5359_v60, 0.0  ;;  %5311 = vmatmul.bf16.gmra.mxu2 %v9415_v19  ;;  %v9831_v19 = vld [vmem:[%s9970_s20 + $0xc] sm:$0xe]  ;;  %v4417_v3 = vor.u32 %v4416_v4, %v4412_v5  ;;  %v6188_v60 = vshll.u32 %v9715_v63, 16  ;;  %v4428_v61 = vrot.slane %v4426_v54, 1  ;;  %v9681_v54 = vld [vmem:[%s9970_s20 + $0x18] sm:$0xff]  }
 0x2ff   : > { %5400 = vmatmul.bf16.gmra.mxu3 %v4762_v55  ;;  %v9832_v41 = vor.u32 %v9831_v19, %v9830_v49  ;;  %v4594_v55 = vpack.c.b16 %v4578_v20, %v4578_v20  ;;  %v5793_v1 = vshll.u32 %v11391_v53, 16  ;;  %v6193_v4 = vshll.u32 %v11395_v44, 16  ;;  %v9833_v49 = vld [vmem:[%s9970_s20 + $0x24] sm:$0xf0]  ;;  %v9834_v19 = vld [vmem:[%s9970_s20 + $0x24] sm:$0xe] }
 0x300   : > { %8912 = vst [vmem:[%s10175_s12 + $0x248] sm:$0xff] %v5425_v38  ;;  %v4422_v11 = vsel %vm452_vm0, %v4417_v3, %v4421_v36  ;;  %v8940_v36 = vld [vmem:[%s9970_s20 + $0x20] sm:$0x1]  ;;  %v9835_v20 = vor.u32 %v9834_v19, %v9833_v49  ;;  %v6412_v63 = vshll.u32 %v11367_v7, 16 }
 0x301   : > { %v5272_v29 = vpop.f32.mrf.mxu2  ;;  %v5096_v17 = vpop.f32.mrf.mxu0  ;;  %v5788_v46 = vshll.u32 %v9832_v41, 16  ;;  %v4783_v5 = vshll.u32 %v4594_v55, 16 }
 0x302   : > { %v5361_v37 = vpop.f32.mrf.mxu3  ;;  %v5273_v16 = vadd.f32 %v5272_v29, %v5184_v8  ;;  %v5185_v45 = vpop.f32.mrf.mxu1  ;;  %v5097_v50 = vadd.f32 %v11261_v15, %v5096_v17  ;;  %v4776_v17 = vshrl.u32 %v11387_v13, 16 }
 0x303   : > { %v5790_v33 = vrot.slane %v5788_v46, 1  ;;  %v4785_v0 = vrot.slane %v4783_v5, 1 }
 0x304   : > { %v5362_v27 = vadd.f32 %v5361_v37, %v5273_v16  ;;  %v5186_v6 = vadd.f32 %v5185_v45, %v5097_v50  ;;  %v4431_v16 = vshll.u32 %v4242_v57, 16  ;;  %v4780_v45 = vrot.slane %v4778_v40, 1 }
 0x306   : > { %v5426_v52 = vmax.f32 %v5362_v27, 0.0  ;;  %v6190_v27 = vrot.slane %v6188_v60, 1  ;;  %v4433_v23 = vrot.slane %v4431_v16, 1  ;;  %v4781_v51 = vor.u32 %v4780_v45, %v4776_v17 }
 0x308   : > { %8913 = vst [vmem:[%s10175_s12 + $0x250] sm:$0xff] %v5426_v52  ;;  %v11408_v52 = vrot.slane %v5793_v1, 1  ;;  %v6191_v39 = vor.u32 %v6190_v27, %v6186_v22  ;;  %v6414_v1 = vrot.slane %v6412_v63, 1 }
 0x309   : > { %v5274_v62 = vpop.f32.mrf.mxu2  ;;  %v5099_v58 = vpop.f32.mrf.mxu0 }
 0x30a   : > { %v5363_v35 = vpop.f32.mrf.mxu3  ;;  %v5275_v24 = vadd.f32 %v5274_v62, %v5186_v6  ;;  %v5188_v42 = vpop.f32.mrf.mxu1  ;;  %v5100_v59 = vadd.f32 %v11261_v15, %v5099_v58  ;;  %v9004_v6 = vld [vmem:[%s9970_s20 + $0x2c] sm:$0x1]  ;;  %v9691_v58 = vor.u32 %v9690_v31, %v9689_v28  ;;  %v9836_v28 = vld [vmem:[%s9970_s20 + $0x24] sm:$0xf0] }
 0x30c   : > { %v5364_v25 = vadd.f32 %v5363_v35, %v5275_v24  ;;  %5138 = vmatmul.bf16.gmra.mxu0 %v11355_v26  ;;  %v5189_v48 = vadd.f32 %v5188_v42, %v5100_v59  ;;  %v4424_v26 = vshrl.u32 %v11379_v56, 16  ;;  %v11415_v35 = vrot.slane %v6193_v4, 1 }
 0x30d   : > { %5227 = vmatmul.bf16.gmra.mxu1 %v4422_v11  ;;  %v5662_v24 = vunpack.c.l.b16 %v8940_v36  ;;  %v6062_v42 = vunpack.c.l.b16 %v9004_v6  ;;  %v5802_v55 = vshll.u32 %v9691_v58, 16  ;;  %v5800_v45 = vshrl.u32 %v9691_v58, 16  ;;  %v11439_v36 = vld [vmem:[%s9970_s20 + $0x24] sm:$0xff]  }
 0x30e   : > { %v5427_v47 = vmax.f32 %v5364_v25, 0.0  ;;  %5316 = vmatmul.bf16.gmra.mxu2 %v11360_v43  ;;  %v5786_v43 = vshrl.u32 %v9832_v41, 16  ;;  %v4429_v50 = vor.u32 %v4428_v61, %v4424_v26  ;;  %v4786_v25 = vsel %vm452_vm0, %v4781_v51, %v4785_v0 }
 0x30f   : > { %5405 = vmatmul.bf16.gmra.mxu3 %v4774_v10  ;;  %v6196_v57 = vsel %vm452_vm0, %v6191_v39, %v11415_v35  ;;  %v11428_v40 = vpack.c.b16 %v5662_v24, %v5662_v24  ;;  %v11430_v26 = vpack.c.b16 %v6062_v42, %v6062_v42  ;;  %v6410_v61 = vshrl.u32 %v11367_v7, 16  ;;  %v9007_v24 = vld [vmem:[%s9970_s20 + $0x38] sm:$0x1] }
 0x310   : > { %8914 = vst [vmem:[%s10175_s12 + $0x258] sm:$0xff] %v5427_v47  ;;  %v5791_v3 = vor.u32 %v5790_v33, %v5786_v43  ;;  %v4434_v10 = vsel %vm452_vm0, %v4429_v50, %v4433_v23  ;;  %v5797_v47 = vshrl.u32 %v11391_v53, 16  ;;  %v6202_v53 = vshll.u32 %v9835_v20, 16 }
 0x311   : > { %v5277_v38 = vpop.f32.mrf.mxu2  ;;  %v5101_v29 = vpop.f32.mrf.mxu0  ;;  %v6197_v43 = vshrl.u32 %v11395_v44, 16  ;;  %v6440_v33 = vshll.u32 %v6196_v57, 16  ;;  %v5804_v5 = vrot.slane %v5802_v55, 1  ;;  %v6207_v7 = vshll.u32 %v11430_v26, 16 }
 0x312   : > { %v5366_v8 = vpop.f32.mrf.mxu3  ;;  %v5278_v34 = vadd.f32 %v5277_v38, %v5189_v48  ;;  %v5190_v37 = vpop.f32.mrf.mxu1  ;;  %v5102_v2 = vadd.f32 %v11261_v15, %v5101_v29  ;;  %v5796_v21 = vsel %vm452_vm0, %v5791_v3, %v11408_v52  ;;  %v6425_v29 = vshll.u32 %v5797_v47, 16 }
 0x313   : > { %v6420_v48 = vshll.u32 %v5796_v21, 16  ;;  %v6415_v22 = vor.u32 %v6414_v1, %v6410_v61  ;;  %v6438_v27 = vshrl.u32 %v6196_v57, 16  ;;  %v6442_v50 = vrot.slane %v6440_v33, 1 }
 0x314   : > { %v5367_v30 = vadd.f32 %v5366_v8, %v5278_v34  ;;  %v5191_v62 = vadd.f32 %v5190_v37, %v5102_v2  ;;  %v6432_v8 = vshll.u32 %v9681_v54, 16  ;;  %v6430_v37 = vshrl.u32 %v9681_v54, 16 }
 0x315   : > { %v6422_v34 = vrot.slane %v6420_v48, 1  ;;  %v6204_v2 = vrot.slane %v6202_v53, 1  ;;  %v6445_v3 = vshll.u32 %v6197_v43, 16  ;;  %v6427_v6 = vrot.slane %v6425_v29, 1 }
 0x316   : > { %v5428_v18 = vmax.f32 %v5367_v30, 0.0  ;;  %v6434_v19 = vrot.slane %v6432_v8, 1  ;;  %v6200_v30 = vshrl.u32 %v9835_v20, 16  ;;  %v11446_v39 = vrot.slane %v6207_v7, 1 }
 0x317   : > { %v6443_v42 = vor.u32 %v6442_v50, %v6438_v27  ;;  %v6416_v20 = vsel %vm452_vm0, %v6415_v22, %v11408_v52  ;;  %v6065_v47 = vunpack.c.l.b16 %v9007_v24  ;;  %v5811_v1 = vshrl.u32 %v11428_v40, 16 }
 0x318   : > { %8915 = vst [vmem:[%s10175_s12 + $0x260] sm:$0xff] %v5428_v18  ;;  %v9837_v18 = vld [vmem:[%s9970_s20 + $0x24] sm:$0xe]  ;;  %v11450_v58 = vor.u32 %v6434_v19, %v6430_v37 }
 0x319   : > { %v5279_v41 = vpop.f32.mrf.mxu2  ;;  %v5104_v32 = vpop.f32.mrf.mxu0 }
 0x31a   : > { %v5368_v9 = vpop.f32.mrf.mxu3  ;;  %v5280_v11 = vadd.f32 %v5279_v41, %v5191_v62  ;;  %v5193_v59 = vpop.f32.mrf.mxu1  ;;  %v5105_v14 = vadd.f32 %v11261_v15, %v5104_v32  ;;  %v5805_v62 = vor.u32 %v5804_v5, %v5800_v45  ;;  %v9716_v32 = vld [vmem:[%s9970_s20 + $0x30] sm:$0xf0]  ;;  %v6436_v52 = vsel %vm452_vm0, %v11450_v58, %v11415_v35 }
 0x31b   : > { %v6465_v45 = vshll.u32 %v5811_v1, 16  ;;  %v6470_v5 = vshrl.u32 %v11403_v12, 16 }
 0x31c   : > { %v5369_v46 = vadd.f32 %v5368_v9, %v5280_v11  ;;  %5143 = vmatmul.bf16.gmra.mxu0 %v11379_v56  ;;  %v5194_v38 = vadd.f32 %v5193_v59, %v5105_v14  ;;  %v6418_v56 = vshrl.u32 %v5796_v21, 16  ;;  %v6205_v9 = vor.u32 %v6204_v2, %v6200_v30  ;;  %v8943_v21 = vld [vmem:[%s9970_s20 + $0x2c] sm:$0x1]  ;;  %v9717_v59 = vld [vmem:[%s9970_s20 + $0x30] sm:$0xe] }
 0x31d   : > { %5232 = vmatmul.bf16.gmra.mxu1 %v4434_v10  ;;  %v6447_v11 = vrot.slane %v6445_v3, 1  ;;  %v9718_v8 = vor.u32 %v9717_v59, %v9716_v32  ;;  %v9839_v32 = vld [vmem:[%s9970_s20 + $0x3c] sm:$0xf0]  ;;  %v9840_v59 = vld [vmem:[%s9970_s20 + $0x3c] sm:$0xe] }
 0x31e   : > { %v5429_v60 = vmax.f32 %v5369_v46, 0.0  ;;  %5321 = vmatmul.bf16.gmra.mxu2 %v11387_v13  ;;  %v5807_v13 = vshll.u32 %v11428_v40, 16  ;;  %v6423_v51 = vor.u32 %v6422_v34, %v6418_v56  ;;  %v5665_v46 = vunpack.c.l.b16 %v8943_v21 }
 0x31f   : > { %5410 = vmatmul.bf16.gmra.mxu3 %v4786_v25  ;;  %v6448_v61 = vsel %vm452_vm0, %v6443_v42, %v6447_v11  ;;  %v6472_v56 = vshll.u32 %v11403_v12, 16  ;;  %v6211_v34 = vshrl.u32 %v11430_v26, 16  ;;  %v6216_v40 = vshll.u32 %v9718_v8, 16  ;;  %v11487_v11 = vld [vmem:[%s9970_s20 + $0x3c] sm:$0xff]  }
 0x320   : > { %8916 = vst [vmem:[%s10175_s12 + $0x268] sm:$0xff] %v5429_v60  ;;  %v11444_v0 = vrot.slane %v5807_v13, 1  ;;  %v6428_v63 = vsel %vm452_vm0, %v6423_v51, %v6427_v6  ;;  %v6210_v60 = vsel %vm452_vm0, %v6205_v9, %v11446_v39  ;;  %v11470_v37 = vpack.c.b16 %v5665_v46, %v5665_v46  ;;  %v11481_v51 = vld [vmem:[%s12088_s2] ss:$0 sm:$0xff] }
 0x321   : > { %v5282_v16 = vpop.f32.mrf.mxu2  ;;  %v5106_v49 = vpop.f32.mrf.mxu0  ;;  %v6480_v29 = vshll.u32 %v6210_v60, 16  ;;  %v6474_v26 = vrot.slane %v6472_v56, 1  ;;  %v6214_v27 = vshrl.u32 %v9718_v8, 16 }
 0x322   : > { %v5371_v17 = vpop.f32.mrf.mxu3  ;;  %v5283_v4 = vadd.f32 %v5282_v16, %v5194_v38  ;;  %v5195_v44 = vpop.f32.mrf.mxu1  ;;  %v5107_v31 = vadd.f32 %v11261_v15, %v5106_v49  ;;  %v5810_v54 = vsel %vm452_vm0, %v5805_v62, %v11444_v0  ;;  %v9838_v38 = vor.u32 %v9837_v18, %v9836_v28 }
 0x323   : > { %v6460_v33 = vshll.u32 %v5810_v54, 16  ;;  %v6458_v13 = vshrl.u32 %v5810_v54, 16  ;;  %v6485_v49 = vshll.u32 %v6211_v34, 16  ;;  %v6482_v30 = vrot.slane %v6480_v29, 1  ;;  %v9692_v54 = vld [vmem:[%s9970_s20 + $0x30] sm:$0xf0] }
 0x324   : > { %v5372_v23 = vadd.f32 %v5371_v17, %v5283_v4  ;;  %v5196_v10 = vadd.f32 %v5195_v44, %v5107_v31  ;;  %v5816_v17 = vshll.u32 %v9838_v38, 16  ;;  %v6478_v4 = vshrl.u32 %v6210_v60, 16 }
 0x325   : > { %v6462_v7 = vrot.slane %v6460_v33, 1  ;;  %v5821_v2 = vshll.u32 %v11470_v37, 16  ;;  %v5814_v22 = vshrl.u32 %v9838_v38, 16  ;;  %v6467_v31 = vrot.slane %v6465_v45, 1  ;;  %v9682_v33 = vld [vmem:[%s9970_s20 + $0x30] sm:$0xff]  }
 0x326   : > { %v5430_v41 = vmax.f32 %v5372_v23, 0.0  ;;  %v5818_v18 = vrot.slane %v5816_v17, 1  ;;  %v6218_v23 = vrot.slane %v6216_v40, 1  ;;  %v6483_v21 = vor.u32 %v6482_v30, %v6478_v4 }
 0x327   : > { %v6463_v9 = vor.u32 %v6462_v7, %v6458_v13  ;;  %v6487_v24 = vrot.slane %v6485_v49, 1  ;;  %v11484_v42 = vrot.slane %v5821_v2, 1  ;;  %v6456_v60 = vsel %vm452_vm0, %v11450_v58, %v11444_v0 }
 0x328   : > { %8917 = vst [vmem:[%s10175_s12 + $0x270] sm:$0xff] %v5430_v41  ;;  %v6475_v41 = vor.u32 %v6474_v26, %v6470_v5  ;;  %v9841_v17 = vor.u32 %v9840_v59, %v9839_v32  ;;  %v6512_v13 = vshll.u32 %v9682_v33, 16 }
 0x329   : > { %v5284_v14 = vpop.f32.mrf.mxu2  ;;  %v5109_v57 = vpop.f32.mrf.mxu0  ;;  %v6468_v38 = vsel %vm452_vm0, %v6463_v9, %v6467_v31  ;;  %v6488_v1 = vsel %vm452_vm0, %v6483_v21, %v6487_v24  ;;  %v9843_v9 = vld [vmem:[%s9970_s20 + $0x3c] sm:$0xe] }
 0x32a   : > { %v5373_v25 = vpop.f32.mrf.mxu3  ;;  %v5285_v48 = vadd.f32 %v5284_v14, %v5196_v10  ;;  %v5198_v55 = vpop.f32.mrf.mxu1  ;;  %v5110_v53 = vadd.f32 %v11261_v15, %v5109_v57  ;;  %v11472_v15 = vpack.c.b16 %v6065_v47, %v6065_v47  ;;  %v9693_v47 = vld [vmem:[%s9970_s20 + $0x30] sm:$0xe]  ;;  %v6476_v8 = vsel %vm452_vm0, %v6475_v41, %v11446_v39  ;;  %v11521_v41 = vld [vmem:[%s9970_s20 + $0x3c] sm:$0xff]  }
 0x32b   : > { %v9694_v58 = vor.u32 %v9693_v47, %v9692_v54  ;;  %v6492_v39 = vshll.u32 %v11439_v36, 16  ;;  %v6230_v2 = vshll.u32 %v9841_v17, 16 }
 0x32c   : > { %v5374_v43 = vadd.f32 %v5373_v25, %v5285_v48  ;;  %7378 = vmatmul.bf16.vlgmr.msrb.gmra.mxu0 %v6416_v20  ;;  %v5199_v35 = vadd.f32 %v5198_v55, %v5110_v53  ;;  %v6221_v12 = vshll.u32 %v11472_v15, 16  ;;  %v5819_v20 = vor.u32 %v5818_v18, %v5814_v22  ;;  %v9010_v48 = vld [vmem:[%s9970_s20 + $0x44] sm:$0x1] }
 0x32d   : > { %7467 = vmatmul.bf16.vlgmr.msrb.gmra.mxu1 %v6428_v63  ;;  %v6219_v25 = vor.u32 %v6218_v23, %v6214_v27  ;;  %v8946_v63 = vld [vmem:[%s9970_s20 + $0x38] sm:$0x1]  ;;  %v6068_v29 = vunpack.c.l.b16 %v9010_v48  ;;  %v6225_v7 = vshrl.u32 %v11472_v15, 16  ;;  %v5830_v49 = vshll.u32 %v9694_v58, 16 }
 0x32e   : > { %v5431_v16 = vmax.f32 %v5374_v43, 0.0  ;;  %7556 = vmatmul.bf16.vlgmr.msrb.gmra.mxu2 %v6436_v52  ;;  %v11491_v14 = vrot.slane %v6221_v12, 1  ;;  %v5824_v43 = vsel %vm452_vm0, %v5819_v20, %v11484_v42  ;;  %v5668_v0 = vunpack.c.l.b16 %v8946_v63 }
 0x32f   : > { %7645 = vmatmul.bf16.vlgmr.msrb.gmra.mxu3 %v6448_v61  ;;  %v6500_v40 = vshll.u32 %v5824_v43, 16  ;;  %v6510_v15 = vshrl.u32 %v9682_v33, 16  ;;  %v5828_v24 = vshrl.u32 %v9694_v58, 16  ;;  %v5832_v32 = vrot.slane %v5830_v49, 1  ;;  %v9719_v58 = vld [vmem:[%s9970_s20 + $0x48] sm:$0xf0] }
 0x330   : > { %8918 = vst [vmem:[%s10175_s12 + $0x278] sm:$0xff] %v5431_v16  ;;  %v6224_v56 = vsel %vm452_vm0, %v6219_v25, %v11491_v14  ;;  %v11514_v4 = vpack.c.b16 %v5668_v0, %v5668_v0  ;;  %v6228_v25 = vshrl.u32 %v9841_v17, 16  ;;  %v6232_v63 = vrot.slane %v6230_v2, 1  ;;  %v9013_v0 = vld [vmem:[%s9970_s20 + $0x50] sm:$0x1] }
 0x331   : > { %v5287_v44 = vpop.f32.mrf.mxu2  ;;  %v5111_v3 = vpop.f32.mrf.mxu0  ;;  %v6520_v26 = vshll.u32 %v6224_v56, 16  ;;  %v6518_v31 = vshrl.u32 %v6224_v56, 16 }
 0x332   : > { %v5376_v19 = vpop.f32.mrf.mxu3  ;;  %v5288_v50 = vadd.f32 %v5287_v44, %v5199_v35  ;;  %v5200_v28 = vpop.f32.mrf.mxu1  ;;  %v5112_v62 = vadd.f32 %v11481_v51, %v5111_v3  ;;  %v5825_v35 = vshrl.u32 %v11470_v37, 16  ;;  %v11516_v44 = vpack.c.b16 %v6068_v29, %v6068_v29  ;;  %v9720_v29 = vld [vmem:[%s9970_s20 + $0x48] sm:$0xe] }
 0x333   : > { %v6490_v37 = vshrl.u32 %v11439_v36, 16  ;;  %v6502_v3 = vrot.slane %v6500_v40, 1  ;;  %v9842_v36 = vld [vmem:[%s9970_s20 + $0x3c] sm:$0xf0]  ;;  %v5835_v21 = vshll.u32 %v11514_v4, 16 }
 0x334   : > { %v5377_v6 = vadd.f32 %v5376_v19, %v5288_v50  ;;  %v5201_v46 = vadd.f32 %v5200_v28, %v5112_v62  ;;  %v6494_v19 = vrot.slane %v6492_v39, 1  ;;  %v6505_v30 = vshll.u32 %v5825_v35, 16 }
 0x335   : > { %v6498_v50 = vshrl.u32 %v5824_v43, 16  ;;  %v6514_v28 = vrot.slane %v6512_v13, 1  ;;  %v6525_v62 = vshll.u32 %v6225_v7, 16  ;;  %v6235_v59 = vshll.u32 %v11516_v44, 16 }
 0x336   : > { %v5432_v10 = vmax.f32 %v5377_v6, 0.0  ;;  %v6522_v6 = vrot.slane %v6520_v26, 1  ;;  %v6495_v54 = vor.u32 %v6494_v19, %v6490_v37  ;;  %v6507_v48 = vrot.slane %v6505_v30, 1 }
 0x337   : > { %v6503_v47 = vor.u32 %v6502_v3, %v6498_v50  ;;  %v5839_v26 = vshrl.u32 %v11514_v4, 16  ;;  %v6071_v37 = vunpack.c.l.b16 %v9013_v0  ;;  %v9721_v19 = vor.u32 %v9720_v29, %v9719_v58  ;;  %v9016_v0 = vld [vmem:[%s9970_s20 + $0x5c] sm:$0x1] }
 0x338   : > { %8919 = vst [vmem:[%s10175_s12 + $0x280] sm:$0xff] %v5432_v10  ;;  %v6496_v17 = vsel %vm452_vm0, %v6495_v54, %v11484_v42  ;;  %v6239_v4 = vshrl.u32 %v11516_v44, 16  ;;  %v11562_v54 = vld [vmem:[%s9970_s20 + $0x54] sm:$0xff]  }
 0x339   : > { %v5289_v57 = vpop.f32.mrf.mxu2  ;;  %v5114_v52 = vpop.f32.mrf.mxu0  ;;  %v6508_v40 = vsel %vm452_vm0, %v6503_v47, %v6507_v48 }
 0x33a   : > { %v5378_v55 = vpop.f32.mrf.mxu3  ;;  %v5290_v53 = vadd.f32 %v5289_v57, %v5201_v46  ;;  %v5203_v61 = vpop.f32.mrf.mxu1  ;;  %v5115_v34 = vadd.f32 %v11481_v51, %v5114_v52  ;;  %v11528_v57 = vor.u32 %v6514_v28, %v6510_v15  ;;  %v6545_v28 = vshll.u32 %v5839_v26, 16 }
 0x33b   : > { %v6074_v26 = vunpack.c.l.b16 %v9016_v0  ;;  %v9849_v0 = vld [vmem:[%s9970_s20 + $0x54] sm:$0xe] }
 0x33c   : > { %v5379_v16 = vadd.f32 %v5378_v55, %v5290_v53  ;;  %7383 = vmatmul.bf16.gmra.mxu0 %v6456_v60  ;;  %v5204_v5 = vadd.f32 %v5203_v61, %v5115_v34  ;;  %v8949_v55 = vld [vmem:[%s9970_s20 + $0x44] sm:$0x1]  ;;  %v6523_v60 = vor.u32 %v6522_v6, %v6518_v31  ;;  %v5833_v53 = vor.u32 %v5832_v32, %v5828_v24 }
 0x33d   : > { %7472 = vmatmul.bf16.gmra.mxu1 %v6468_v38  ;;  %v6527_v38 = vrot.slane %v6525_v62, 1  ;;  %v11534_v61 = vrot.slane %v6235_v59, 1  ;;  %v5671_v56 = vunpack.c.l.b16 %v8949_v55  ;;  %v9844_v34 = vor.u32 %v9843_v9, %v9842_v36 }
 0x33e   : > { %v5433_v45 = vmax.f32 %v5379_v16, 0.0  ;;  %7561 = vmatmul.bf16.gmra.mxu2 %v6476_v8  ;;  %v11531_v8 = vrot.slane %v5835_v21, 1  ;;  %v6516_v13 = vsel %vm452_vm0, %v11528_v57, %v11491_v14  ;;  %v6552_v14 = vshll.u32 %v11487_v11, 16 }
 0x33f   : > { %7650 = vmatmul.bf16.gmra.mxu3 %v6488_v1  ;;  %v6233_v1 = vor.u32 %v6232_v63, %v6228_v25  ;;  %v11553_v30 = vpack.c.b16 %v5671_v56, %v5671_v56  ;;  %v5844_v2 = vshll.u32 %v9844_v34, 16  ;;  %v6550_v6 = vshrl.u32 %v11487_v11, 16  ;;  %v9845_v11 = vld [vmem:[%s9970_s20 + $0x54] sm:$0xf0] }
 0x340   : > { %8920 = vst [vmem:[%s10175_s12 + $0x288] sm:$0xff] %v5433_v45  ;;  %v5838_v7 = vsel %vm452_vm0, %v5833_v53, %v11531_v8  ;;  %v5842_v36 = vshrl.u32 %v9844_v34, 16  ;;  %v6554_v59 = vrot.slane %v6552_v14, 1  ;;  %v6242_v63 = vshrl.u32 %v9721_v19, 16  ;;  %v9696_v34 = vld [vmem:[%s9970_s20 + $0x48] sm:$0xe] }
 0x341   : > { %v5292_v22 = vpop.f32.mrf.mxu2  ;;  %v5116_v12 = vpop.f32.mrf.mxu0  ;;  %v6238_v42 = vsel %vm452_vm0, %v6233_v1, %v11534_v61  ;;  %v6540_v50 = vshll.u32 %v5838_v7, 16  ;;  %v6538_v15 = vshrl.u32 %v5838_v7, 16  ;;  %v5849_v62 = vshll.u32 %v11553_v30, 16  ;;  %v8952_v1 = vld [vmem:[%s9970_s20 + $0x50] sm:$0x1] }
 0x342   : > { %v5381_v27 = vpop.f32.mrf.mxu3  ;;  %v5293_v18 = vadd.f32 %v5292_v22, %v5204_v5  ;;  %v5205_v23 = vpop.f32.mrf.mxu1  ;;  %v5117_v20 = vadd.f32 %v11481_v51, %v5116_v12  ;;  %v6528_v5 = vsel %vm452_vm0, %v6523_v60, %v6527_v38  ;;  %v6560_v3 = vshll.u32 %v6238_v42, 16 }
 0x343   : > { %v6244_v12 = vshll.u32 %v9721_v19, 16  ;;  %v5846_v9 = vrot.slane %v5844_v2, 1  ;;  %v6542_v32 = vrot.slane %v6540_v50, 1  ;;  %v6547_v38 = vrot.slane %v6545_v28, 1 }
 0x344   : > { %v5382_v10 = vadd.f32 %v5381_v27, %v5293_v18  ;;  %v5206_v52 = vadd.f32 %v5205_v23, %v5117_v20  ;;  %v11557_v18 = vpack.c.b16 %v6071_v37, %v6071_v37  ;;  %v6558_v20 = vshrl.u32 %v6238_v42, 16 }
 0x345   : > { %v6562_v25 = vrot.slane %v6560_v3, 1  ;;  %v6246_v60 = vrot.slane %v6244_v12, 1  ;;  %v11568_v53 = vrot.slane %v5849_v62, 1  ;;  %v6543_v56 = vor.u32 %v6542_v32, %v6538_v15  ;;  %v9683_v3 = vld [vmem:[%s9970_s20 + $0x48] sm:$0xff]  }
 0x346   : > { %v5434_v46 = vmax.f32 %v5382_v10, 0.0  ;;  %v6565_v10 = vshll.u32 %v6239_v4, 16  ;;  %v6249_v55 = vshll.u32 %v11557_v18, 16  ;;  %v6555_v58 = vor.u32 %v6554_v59, %v6550_v6 }
 0x347   : > { %v6563_v29 = vor.u32 %v6562_v25, %v6558_v20  ;;  %v6536_v19 = vsel %vm452_vm0, %v11528_v57, %v11531_v8  ;;  %v6548_v14 = vsel %vm452_vm0, %v6543_v56, %v6547_v38  ;;  %v6572_v4 = vshll.u32 %v11521_v41, 16  ;;  %v11602_v56 = vld [vmem:[%s9970_s20 + $0x54] sm:$0xff]  }
 0x348   : > { %8921 = vst [vmem:[%s10175_s12 + $0x290] sm:$0xff] %v5434_v46  ;;  %v9846_v46 = vld [vmem:[%s9970_s20 + $0x54] sm:$0xe]  ;;  %v5853_v28 = vshrl.u32 %v11553_v30, 16  ;;  %v6592_v62 = vshll.u32 %v9683_v3, 16  ;;  %v6570_v30 = vshrl.u32 %v11521_v41, 16 }
 0x349   : > { %v5294_v43 = vpop.f32.mrf.mxu2  ;;  %v5119_v39 = vpop.f32.mrf.mxu0  ;;  %v9847_v2 = vor.u32 %v9846_v46, %v9845_v11 }
 0x34a   : > { %v5383_v33 = vpop.f32.mrf.mxu3  ;;  %v5295_v16 = vadd.f32 %v5294_v43, %v5206_v52  ;;  %v5208_v35 = vpop.f32.mrf.mxu1  ;;  %v5120_v45 = vadd.f32 %v11481_v51, %v5119_v39  ;;  %v5847_v52 = vor.u32 %v5846_v9, %v5842_v36  ;;  %v9695_v43 = vld [vmem:[%s9970_s20 + $0x48] sm:$0xf0]  ;;  %v6574_v9 = vrot.slane %v6572_v4, 1 }
 0x34b   : > { %v9697_v7 = vor.u32 %v9696_v34, %v9695_v43  ;;  %v6258_v36 = vshll.u32 %v9847_v2, 16  ;;  %v6585_v59 = vshll.u32 %v5853_v28, 16  ;;  %v9848_v34 = vld [vmem:[%s9970_s20 + $0x54] sm:$0xf0] }
 0x34c   : > { %v5384_v49 = vadd.f32 %v5383_v33, %v5295_v16  ;;  %7388 = vmatmul.bf16.gmra.mxu0 %v6496_v17  ;;  %v5209_v27 = vadd.f32 %v5208_v35, %v5120_v45  ;;  %v6567_v16 = vrot.slane %v6565_v10, 1  ;;  %v11575_v35 = vrot.slane %v6249_v55, 1 }
 0x34d   : > { %7477 = vmatmul.bf16.gmra.mxu1 %v6508_v40  ;;  %v6247_v17 = vor.u32 %v6246_v60, %v6242_v63  ;;  %v5852_v45 = vsel %vm452_vm0, %v5847_v52, %v11568_v53  ;;  %v6590_v10 = vshrl.u32 %v9683_v3, 16  ;;  %v5856_v11 = vshrl.u32 %v9697_v7, 16 }
 0x34e   : > { %v5435_v22 = vmax.f32 %v5384_v49, 0.0  ;;  %7566 = vmatmul.bf16.gmra.mxu2 %v6516_v13  ;;  %v6568_v50 = vsel %vm452_vm0, %v6563_v29, %v6567_v16  ;;  %v6580_v12 = vshll.u32 %v5852_v45, 16  ;;  %v6594_v55 = vrot.slane %v6592_v62, 1 }
 0x34f   : > { %7655 = vmatmul.bf16.gmra.mxu3 %v6528_v5  ;;  %v5674_v5 = vunpack.c.l.b16 %v8952_v1  ;;  %v6252_v57 = vsel %vm452_vm0, %v6247_v17, %v11575_v35  ;;  %v6256_v60 = vshrl.u32 %v9847_v2, 16  ;;  %v6260_v38 = vrot.slane %v6258_v36, 1 }
 0x350   : > { %8922 = vst [vmem:[%s10175_s12 + $0x298] sm:$0xff] %v5435_v22  ;;  %v6582_v32 = vrot.slane %v6580_v12, 1  ;;  %v6575_v52 = vor.u32 %v6574_v9, %v6570_v30  ;;  %v6598_v1 = vshrl.u32 %v6252_v57, 16  ;;  %v6587_v16 = vrot.slane %v6585_v59, 1 }
 0x351   : > { %v5297_v23 = vpop.f32.mrf.mxu2  ;;  %v5121_v44 = vpop.f32.mrf.mxu0  ;;  %v11592_v8 = vpack.c.b16 %v5674_v5, %v5674_v5  ;;  %v6261_v5 = vor.u32 %v6260_v38, %v6256_v60 }
 0x352   : > { %v5386_v31 = vpop.f32.mrf.mxu3  ;;  %v5298_v21 = vadd.f32 %v5297_v23, %v5209_v27  ;;  %v5210_v24 = vpop.f32.mrf.mxu1  ;;  %v5122_v48 = vadd.f32 %v11481_v51, %v5121_v44  ;;  %v6556_v27 = vsel %vm452_vm0, %v6555_v58, %v11534_v61  ;;  %v5858_v23 = vshll.u32 %v9697_v7, 16  ;;  %v8955_v7 = vld [vmem:[%s9970_s20 + $0x5c] sm:$0x1] }
 0x353   : > { %v6600_v44 = vshll.u32 %v6252_v57, 16  ;;  %v5863_v63 = vshll.u32 %v11592_v8, 16  ;;  %v5867_v9 = vshrl.u32 %v11592_v8, 16 }
 0x354   : > { %v5387_v47 = vadd.f32 %v5386_v31, %v5298_v21  ;;  %v5211_v39 = vadd.f32 %v5210_v24, %v5122_v48  ;;  %v11594_v31 = vpack.c.b16 %v6074_v26, %v6074_v26  ;;  %v6253_v21 = vshrl.u32 %v11557_v18, 16  ;;  %v9019_v26 = vld [vmem:[%s9970_s20 + $0x68] sm:$0x1] }
 0x355   : > { %v6578_v24 = vshrl.u32 %v5852_v45, 16  ;;  %v5860_v46 = vrot.slane %v5858_v23, 1  ;;  %v6602_v43 = vrot.slane %v6600_v44, 1  ;;  %v11607_v17 = vrot.slane %v5863_v63, 1 }
 0x356   : > { %v5436_v33 = vmax.f32 %v5387_v47, 0.0  ;;  %v6263_v41 = vshll.u32 %v11594_v31, 16  ;;  %v6077_v28 = vunpack.c.l.b16 %v9019_v26 }
 0x358   : > { %8923 = vst [vmem:[%s10175_s12 + $0x2a0] sm:$0xff] %v5436_v33  ;;  %v6605_v33 = vshll.u32 %v6253_v21, 16 }
 0x359   : > { %v5299_v40 = vpop.f32.mrf.mxu2  ;;  %v5124_v42 = vpop.f32.mrf.mxu0 }
 0x35a   : > { %v5388_v13 = vpop.f32.mrf.mxu3  ;;  %v5300_v49 = vadd.f32 %v5299_v40, %v5211_v39  ;;  %v5213_v37 = vpop.f32.mrf.mxu1  ;;  %v5125_v22 = vadd.f32 %v11481_v51, %v5124_v42  ;;  %v6583_v39 = vor.u32 %v6582_v32, %v6578_v24  ;;  %v5861_v40 = vor.u32 %v5860_v46, %v5856_v11 }
 0x35b   : > { %v6603_v42 = vor.u32 %v6602_v43, %v6598_v1  ;;  %v6632_v24 = vshll.u32 %v11562_v54, 16  ;;  %v6267_v32 = vshrl.u32 %v11594_v31, 16  ;;  %v6625_v46 = vshll.u32 %v5867_v9, 16 }
 0x35c   : > { %v5389_v15 = vadd.f32 %v5388_v13, %v5300_v49  ;;  %7393 = vmatmul.bf16.gmra.mxu0 %v6536_v19  ;;  %v5214_v6 = vadd.f32 %v5213_v37, %v5125_v22  ;;  %v11609_v13 = vrot.slane %v6263_v41, 1  ;;  %v11613_v49 = vor.u32 %v6594_v55, %v6590_v10  ;;  %v9722_v19 = vld [vmem:[%s9970_s20 + $0x60] sm:$0xf0] }
 0x35d   : > { %7482 = vmatmul.bf16.gmra.mxu1 %v6548_v14  ;;  %v6607_v37 = vrot.slane %v6605_v33, 1  ;;  %v9723_v14 = vld [vmem:[%s9970_s20 + $0x60] sm:$0xe]  ;;  %v6576_v22 = vsel %vm452_vm0, %v6575_v52, %v11568_v53  ;;  %v6588_v4 = vsel %vm452_vm0, %v6583_v39, %v6587_v16  ;;  %v5866_v3 = vsel %vm452_vm0, %v5861_v40, %v11607_v17 }
 0x35e   : > { %v5437_v61 = vmax.f32 %v5389_v15, 0.0  ;;  %7571 = vmatmul.bf16.gmra.mxu2 %v6556_v27  ;;  %v5677_v15 = vunpack.c.l.b16 %v8955_v7  ;;  %v9724_v62 = vor.u32 %v9723_v14, %v9722_v19  ;;  %v6596_v53 = vsel %vm452_vm0, %v11613_v49, %v11575_v35  ;;  %v9851_v19 = vld [vmem:[%s9970_s20 + $0x6c] sm:$0xf0]  ;;  %v9852_v14 = vld [vmem:[%s9970_s20 + $0x6c] sm:$0xe] }
 0x35f   : > { %7660 = vmatmul.bf16.gmra.mxu3 %v6568_v50  ;;  %v6608_v30 = vsel %vm452_vm0, %v6603_v42, %v6607_v37  ;;  %v6620_v44 = vshll.u32 %v5866_v3, 16  ;;  %v6618_v11 = vshrl.u32 %v5866_v3, 16  ;;  %v6630_v41 = vshrl.u32 %v11562_v54, 16  ;;  %v11645_v37 = vld [vmem:[%s9970_s20 + $0x6c] sm:$0xff]   ;;  %v9698_v3 = vld [vmem:[%s9970_s20 + $0x60] sm:$0xf0] }
 0x360   : > { %8924 = vst [vmem:[%s10175_s12 + $0x2a8] sm:$0xff] %v5437_v61  ;;  %v6266_v61 = vsel %vm452_vm0, %v6261_v5, %v11609_v13  ;;  %v11633_v10 = vpack.c.b16 %v5677_v15, %v5677_v15  ;;  %v6272_v8 = vshll.u32 %v9724_v62, 16  ;;  %v6634_v31 = vrot.slane %v6632_v24, 1 }
 0x361   : > { %v5302_v20 = vpop.f32.mrf.mxu2  ;;  %v5126_v48 = vpop.f32.mrf.mxu0  ;;  %v6640_v59 = vshll.u32 %v6266_v61, 16  ;;  %v6270_v43 = vshrl.u32 %v9724_v62, 16  ;;  %v6627_v16 = vrot.slane %v6625_v46, 1 }
 0x362   : > { %v5391_v25 = vpop.f32.mrf.mxu3  ;;  %v5303_v47 = vadd.f32 %v5302_v20, %v5214_v6  ;;  %v5215_v18 = vpop.f32.mrf.mxu1  ;;  %v5127_v29 = vadd.f32 %v11481_v51, %v5126_v48  ;;  %v9850_v6 = vor.u32 %v9849_v0, %v9848_v34  ;;  %v11635_v20 = vpack.c.b16 %v6077_v28, %v6077_v28  ;;  %v9699_v28 = vld [vmem:[%s9970_s20 + $0x60] sm:$0xe] }
 0x363   : > { %v6638_v48 = vshrl.u32 %v6266_v61, 16  ;;  %v6642_v38 = vrot.slane %v6640_v59, 1  ;;  %v5877_v52 = vshll.u32 %v11633_v10, 16  ;;  %v6616_v61 = vsel %vm452_vm0, %v11613_v49, %v11607_v17 }
 0x364   : > { %v5392_v58 = vadd.f32 %v5391_v25, %v5303_v47  ;;  %v5216_v2 = vadd.f32 %v5215_v18, %v5127_v29  ;;  %v5872_v63 = vshll.u32 %v9850_v6, 16  ;;  %v6622_v47 = vrot.slane %v6620_v44, 1  ;;  %v9684_v44 = vld [vmem:[%s9970_s20 + $0x60] sm:$0xff]  }
 0x365   : > { %v6645_v18 = vshll.u32 %v6267_v32, 16  ;;  %v5870_v1 = vshrl.u32 %v9850_v6, 16  ;;  %v6277_v54 = vshll.u32 %v11635_v20, 16  ;;  %v6274_v29 = vrot.slane %v6272_v8, 1 }
 0x366   : > { %v5438_v45 = vmax.f32 %v5392_v58, 0.0  ;;  %v5874_v58 = vrot.slane %v5872_v63, 1  ;;  %v6623_v5 = vor.u32 %v6622_v47, %v6618_v11  ;;  %v6643_v7 = vor.u32 %v6642_v38, %v6638_v48 }
 0x367   : > { %v6647_v26 = vrot.slane %v6645_v18, 1  ;;  %v11642_v42 = vrot.slane %v5877_v52, 1  ;;  %v9700_v49 = vor.u32 %v9699_v28, %v9698_v3  ;;  %v9853_v63 = vor.u32 %v9852_v14, %v9851_v19 }
 0x368   : > { %8925 = vst [vmem:[%s10175_s12 + $0x2b0] sm:$0xff] %v5438_v45  ;;  %v6635_v45 = vor.u32 %v6634_v31, %v6630_v41  ;;  %v6628_v6 = vsel %vm452_vm0, %v6623_v5, %v6627_v16  ;;  %v6672_v8 = vshll.u32 %v9684_v44, 16  ;;  %v6281_v11 = vshrl.u32 %v11635_v20, 16  ;;  %v9855_v5 = vld [vmem:[%s9970_s20 + $0x6c] sm:$0xe] }
 0x369   : > { %v5304_v27 = vpop.f32.mrf.mxu2  ;;  %v5129_v57 = vpop.f32.mrf.mxu0  ;;  %v6648_v9 = vsel %vm452_vm0, %v6643_v7, %v6647_v26  ;;  %v5886_v18 = vshll.u32 %v9700_v49, 16  ;;  %v6286_v20 = vshll.u32 %v9853_v63, 16  ;;  %v5884_v26 = vshrl.u32 %v9700_v49, 16  ;;  %v9725_v49 = vld [vmem:[%s9970_s20 + $0x78] sm:$0xf0] }
 0x36a   : > { %v5393_v50 = vpop.f32.mrf.mxu3  ;;  %v5305_v12 = vadd.f32 %v5304_v27, %v5216_v2  ;;  %v5218_v23 = vpop.f32.mrf.mxu1  ;;  %v5130_v36 = vadd.f32 %v11481_v51, %v5129_v57  ;;  %v11649_v27 = vrot.slane %v6277_v54, 1  ;;  %v6636_v62 = vsel %vm452_vm0, %v6635_v45, %v11609_v13  ;;  %v11679_v45 = vld [vmem:[%s9970_s20 + $0x6c] sm:$0xff]  }
 0x36b   : > { %v6652_v13 = vshll.u32 %v11602_v56, 16  ;;  %v5888_v19 = vrot.slane %v5886_v18, 1 }
 0x36c   : > { %v5394_v21 = vadd.f32 %v5393_v50, %v5305_v12  ;;  %7398 = vmatmul.bf16.gmra.mxu0 %v6576_v22  ;;  %v5219_v35 = vadd.f32 %v5218_v23, %v5130_v36  ;;  %v5875_v22 = vor.u32 %v5874_v58, %v5870_v1  ;;  %v6275_v50 = vor.u32 %v6274_v29, %v6270_v43  ;;  %v9022_v12 = vld [vmem:[%s9970_s20 + $0x74] sm:$0x1] }
 0x36d   : > { %7487 = vmatmul.bf16.gmra.mxu1 %v6588_v4  ;;  %v8958_v4 = vld [vmem:[%s9970_s20 + $0x68] sm:$0x1]  ;;  %v6080_v59 = vunpack.c.l.b16 %v9022_v12 }
 0x36e   : > { %v5439_v25 = vmax.f32 %v5394_v21, 0.0  ;;  %7576 = vmatmul.bf16.gmra.mxu2 %v6596_v53  ;;  %v5880_v21 = vsel %vm452_vm0, %v5875_v22, %v11642_v42  ;;  %v6280_v24 = vsel %vm452_vm0, %v6275_v50, %v11649_v27  ;;  %v5680_v17 = vunpack.c.l.b16 %v8958_v4 }
 0x36f   : > { %7665 = vmatmul.bf16.gmra.mxu3 %v6608_v30  ;;  %v6660_v47 = vshll.u32 %v5880_v21, 16  ;;  %v6680_v31 = vshll.u32 %v6280_v24, 16  ;;  %v6658_v43 = vshrl.u32 %v5880_v21, 16  ;;  %v6284_v50 = vshrl.u32 %v9853_v63, 16 }
 0x370   : > { %8926 = vst [vmem:[%s10175_s12 + $0x2b8] sm:$0xff] %v5439_v25  ;;  %v11672_v48 = vpack.c.b16 %v5680_v17, %v5680_v17  ;;  %v6288_v4 = vrot.slane %v6286_v20, 1  ;;  %v9025_v17 = vld [vmem:[%s9970_s20 + $0x80] sm:$0x1] }
 0x371   : > { %v5307_v55 = vpop.f32.mrf.mxu2  ;;  %v5131_v34 = vpop.f32.mrf.mxu0  ;;  %v6662_v16 = vrot.slane %v6660_v47, 1 }
 0x372   : > { %v5396_v60 = vpop.f32.mrf.mxu3  ;;  %v5308_v33 = vadd.f32 %v5307_v55, %v5219_v35  ;;  %v5220_v0 = vpop.f32.mrf.mxu1  ;;  %v5132_v40 = vadd.f32 %v11481_v51, %v5131_v34  ;;  %v5881_v35 = vshrl.u32 %v11633_v10, 16  ;;  %v11674_v55 = vpack.c.b16 %v6080_v59, %v6080_v59  ;;  %v9726_v59 = vld [vmem:[%s9970_s20 + $0x78] sm:$0xe] }
 0x373   : > { %v6650_v10 = vshrl.u32 %v11602_v56, 16  ;;  %v6674_v34 = vrot.slane %v6672_v8, 1  ;;  %v9854_v56 = vld [vmem:[%s9970_s20 + $0x6c] sm:$0xf0]  ;;  %v5891_v7 = vshll.u32 %v11672_v48, 16  ;;  %v6663_v28 = vor.u32 %v6662_v16, %v6658_v43 }
 0x374   : > { %v5397_v39 = vadd.f32 %v5396_v60, %v5308_v33  ;;  %v5221_v15 = vadd.f32 %v5220_v0, %v5132_v40  ;;  %v6654_v60 = vrot.slane %v6652_v13, 1  ;;  %v6665_v38 = vshll.u32 %v5881_v35, 16 }
 0x375   : > { %v6670_v33 = vshrl.u32 %v9684_v44, 16  ;;  %v6678_v0 = vshrl.u32 %v6280_v24, 16  ;;  %v6685_v40 = vshll.u32 %v6281_v11, 16  ;;  %v6291_v14 = vshll.u32 %v11674_v55, 16 }
 0x376   : > { %v5440_v2 = vmax.f32 %v5397_v39, 0.0  ;;  %v6682_v39 = vrot.slane %v6680_v31, 1  ;;  %v6655_v3 = vor.u32 %v6654_v60, %v6650_v10  ;;  %v6667_v12 = vrot.slane %v6665_v38, 1 }
 0x377   : > { %v5895_v31 = vshrl.u32 %v11672_v48, 16  ;;  %v6083_v10 = vunpack.c.l.b16 %v9025_v17  ;;  %v9727_v60 = vor.u32 %v9726_v59, %v9725_v49  ;;  %v6295_v48 = vshrl.u32 %v11674_v55, 16  ;;  %v9028_v17 = vld [vmem:[%s9970_s20 + $0x8c] sm:$0x1] }
 0x378   : > { %8927 = vst [vmem:[%s10175_s12 + $0x2c0] sm:$0xff] %v5440_v2  ;;  %v6656_v63 = vsel %vm452_vm0, %v6655_v3, %v11642_v42  ;;  %v6668_v8 = vsel %vm452_vm0, %v6663_v28, %v6667_v12  ;;  %v11720_v3 = vld [vmem:[%s9970_s20 + $0x84] sm:$0xff]  }
 0x379   : > { %v5309_v57 = vpop.f32.mrf.mxu2  ;;  %v5134_v53 = vpop.f32.mrf.mxu0 }
 0x37a   : > { %v5398_v23 = vpop.f32.mrf.mxu3  ;;  %v5310_v36 = vadd.f32 %v5309_v57, %v5221_v15  ;;  %v5223_v30 = vpop.f32.mrf.mxu1  ;;  %v5135_v32 = vadd.f32 %v11481_v51, %v5134_v53  ;;  %v11686_v57 = vor.u32 %v6674_v34, %v6670_v33 }
 0x37c   : > { %v5399_v25 = vadd.f32 %v5398_v23, %v5310_v36  ;;  %7403 = vmatmul.bf16.gmra.mxu0 %v6616_v61  ;;  %v5224_v41 = vadd.f32 %v5223_v30, %v5135_v32  ;;  %v8961_v23 = vld [vmem:[%s9970_s20 + $0x74] sm:$0x1]  ;;  %v6683_v61 = vor.u32 %v6682_v39, %v6678_v0  ;;  %v5889_v36 = vor.u32 %v5888_v19, %v5884_v26 }
 0x37d   : > { %7492 = vmatmul.bf16.gmra.mxu1 %v6628_v6  ;;  %v6687_v6 = vrot.slane %v6685_v40, 1  ;;  %v11692_v30 = vrot.slane %v6291_v14, 1  ;;  %v5683_v24 = vunpack.c.l.b16 %v8961_v23  ;;  %v9856_v32 = vor.u32 %v9855_v5, %v9854_v56 }
 0x37e   : > { %v5441_v46 = vmax.f32 %v5399_v25, 0.0  ;;  %7581 = vmatmul.bf16.gmra.mxu2 %v6636_v62  ;;  %v11689_v62 = vrot.slane %v5891_v7, 1  ;;  %v6676_v11 = vsel %vm452_vm0, %v11686_v57, %v11649_v27  ;;  %v6712_v27 = vshll.u32 %v11645_v37, 16 }
 0x37f   : > { %7670 = vmatmul.bf16.gmra.mxu3 %v6648_v9  ;;  %v6289_v9 = vor.u32 %v6288_v4, %v6284_v50  ;;  %v11711_v38 = vpack.c.b16 %v5683_v24, %v5683_v24  ;;  %v5900_v20 = vshll.u32 %v9856_v32, 16  ;;  %v6705_v0 = vshll.u32 %v5895_v31, 16 }
 0x380   : > { %8928 = vst [vmem:[%s10175_s12 + $0x2c8] sm:$0xff] %v5441_v46  ;;  %v5894_v47 = vsel %vm452_vm0, %v5889_v36, %v11689_v62  ;;  %v6710_v39 = vshrl.u32 %v11645_v37, 16  ;;  %v5898_v56 = vshrl.u32 %v9856_v32, 16  ;;  %v6714_v14 = vrot.slane %v6712_v27, 1  ;;  %v9857_v37 = vld [vmem:[%s9970_s20 + $0x84] sm:$0xf0] }
 0x381   : > { %v5312_v52 = vpop.f32.mrf.mxu2  ;;  %v5136_v54 = vpop.f32.mrf.mxu0  ;;  %v6294_v42 = vsel %vm452_vm0, %v6289_v9, %v11692_v30  ;;  %v6700_v43 = vshll.u32 %v5894_v47, 16  ;;  %v6698_v34 = vshrl.u32 %v5894_v47, 16  ;;  %v5905_v40 = vshll.u32 %v11711_v38, 16  ;;  %v8964_v9 = vld [vmem:[%s9970_s20 + $0x80] sm:$0x1] }
 0x382   : > { %v5401_v1 = vpop.f32.mrf.mxu3  ;;  %v5313_v58 = vadd.f32 %v5312_v52, %v5224_v41  ;;  %v5225_v29 = vpop.f32.mrf.mxu1  ;;  %v5137_v22 = vadd.f32 %v11481_v51, %v5136_v54  ;;  %v6688_v41 = vsel %vm452_vm0, %v6683_v61, %v6687_v6  ;;  %v6720_v33 = vshll.u32 %v6294_v42, 16  ;;  %v9702_v32 = vld [vmem:[%s9970_s20 + $0x78] sm:$0xe] }
 0x383   : > { %v6300_v54 = vshll.u32 %v9727_v60, 16  ;;  %v5902_v5 = vrot.slane %v5900_v20, 1  ;;  %v6702_v19 = vrot.slane %v6700_v43, 1  ;;  %v6298_v4 = vshrl.u32 %v9727_v60, 16 }
 0x384   : > { %v5402_v2 = vadd.f32 %v5401_v1, %v5313_v58  ;;  %v5226_v53 = vadd.f32 %v5225_v29, %v5137_v22  ;;  %v11715_v58 = vpack.c.b16 %v6083_v10, %v6083_v10  ;;  %v6718_v22 = vshrl.u32 %v6294_v42, 16 }
 0x385   : > { %v6722_v50 = vrot.slane %v6720_v33, 1  ;;  %v6302_v61 = vrot.slane %v6300_v54, 1  ;;  %v6707_v6 = vrot.slane %v6705_v0, 1  ;;  %v11726_v36 = vrot.slane %v5905_v40, 1  ;;  %v9685_v33 = vld [vmem:[%s9970_s20 + $0x78] sm:$0xff]  }
 0x386   : > { %v5442_v15 = vmax.f32 %v5402_v2, 0.0  ;;  %v6725_v2 = vshll.u32 %v6295_v48, 16  ;;  %v6305_v23 = vshll.u32 %v11715_v58, 16  ;;  %v6703_v24 = vor.u32 %v6702_v19, %v6698_v34 }
 0x387   : > { %v6715_v49 = vor.u32 %v6714_v14, %v6710_v39  ;;  %v6723_v59 = vor.u32 %v6722_v50, %v6718_v22  ;;  %v6086_v31 = vunpack.c.l.b16 %v9028_v17  ;;  %v6696_v60 = vsel %vm452_vm0, %v11686_v57, %v11689_v62 }
 0x388   : > { %8929 = vst [vmem:[%s10175_s12 + $0x2d0] sm:$0xff] %v5442_v15  ;;  %v9858_v15 = vld [vmem:[%s9970_s20 + $0x84] sm:$0xe]  ;;  %v6708_v27 = vsel %vm452_vm0, %v6703_v24, %v6707_v6  ;;  %v6732_v48 = vshll.u32 %v11679_v45, 16  ;;  %v5909_v0 = vshrl.u32 %v11711_v38, 16  ;;  %v6752_v39 = vshll.u32 %v9685_v33, 16 }
 0x389   : > { %v5314_v21 = vpop.f32.mrf.mxu2  ;;  %v5139_v13 = vpop.f32.mrf.mxu0  ;;  %v9859_v20 = vor.u32 %v9858_v15, %v9857_v37  ;;  %v6730_v40 = vshrl.u32 %v11679_v45, 16  ;;  %v6750_v14 = vshrl.u32 %v9685_v33, 16  ;;  %v9860_v24 = vld [vmem:[%s9970_s20 + $0x84] sm:$0xf0] }
 0x38a   : > { %v5403_v44 = vpop.f32.mrf.mxu3  ;;  %v5315_v25 = vadd.f32 %v5314_v21, %v5226_v53  ;;  %v5228_v35 = vpop.f32.mrf.mxu1  ;;  %v5140_v46 = vadd.f32 %v11481_v51, %v5139_v13  ;;  %v5903_v53 = vor.u32 %v5902_v5, %v5898_v56  ;;  %v9701_v21 = vld [vmem:[%s9970_s20 + $0x78] sm:$0xf0]  ;;  %v6734_v56 = vrot.slane %v6732_v48, 1 }
 0x38b   : > { %v11739_v47 = vor.u32 %v9702_v32, %v9701_v21  ;;  %v6314_v38 = vshll.u32 %v9859_v20, 16  ;;  %v6309_v5 = vshrl.u32 %v11715_v58, 16  ;;  %v6745_v19 = vshll.u32 %v5909_v0, 16  ;;  %v9861_v32 = vld [vmem:[%s9970_s20 + $0x84] sm:$0xe] }
 0x38c   : > { %v5404_v18 = vadd.f32 %v5403_v44, %v5315_v25  ;;  %7408 = vmatmul.bf16.gmra.mxu0 %v6656_v63  ;;  %v5229_v1 = vadd.f32 %v5228_v35, %v5140_v46  ;;  %v6727_v25 = vrot.slane %v6725_v2, 1  ;;  %v11733_v35 = vrot.slane %v6305_v23, 1 }
 0x38d   : > { %7497 = vmatmul.bf16.gmra.mxu1 %v6668_v8  ;;  %v6303_v63 = vor.u32 %v6302_v61, %v6298_v4  ;;  %v11737_v46 = vsel %vm452_vm0, %v5903_v53, %v11726_v36  ;;  %v5914_v62 = vshll.u32 %v11739_v47, 16  ;;  %v5912_v4 = vshrl.u32 %v11739_v47, 16  ;;  %v8967_v47 = vld [vmem:[%s9970_s20 + $0x8c] sm:$0x1] }
 0x38e   : > { %v5443_v52 = vmax.f32 %v5404_v18, 0.0  ;;  %7586 = vmatmul.bf16.gmra.mxu2 %v6676_v11  ;;  %v6728_v43 = vsel %vm452_vm0, %v6723_v59, %v6727_v25  ;;  %v6740_v54 = vshll.u32 %v11737_v46, 16  ;;  %v6312_v23 = vshrl.u32 %v9859_v20, 16 }
 0x38f   : > { %7675 = vmatmul.bf16.gmra.mxu3 %v6688_v41  ;;  %v5686_v41 = vunpack.c.l.b16 %v8964_v9  ;;  %v6308_v57 = vsel %vm452_vm0, %v6303_v63, %v11733_v35  ;;  %v5916_v45 = vrot.slane %v5914_v62, 1  ;;  %v6316_v61 = vrot.slane %v6314_v38, 1 }
 0x390   : > { %8930 = vst [vmem:[%s10175_s12 + $0x2d8] sm:$0xff] %v5443_v52  ;;  %v6735_v6 = vor.u32 %v6734_v56, %v6730_v40  ;;  %v6758_v53 = vshrl.u32 %v6308_v57, 16  ;;  %v6765_v21 = vshll.u32 %v6309_v5, 16  ;;  %v6747_v25 = vrot.slane %v6745_v19, 1 }
 0x391   : > { %v5317_v29 = vpop.f32.mrf.mxu2  ;;  %v5141_v55 = vpop.f32.mrf.mxu0 }
 0x392   : > { %v5406_v16 = vpop.f32.mrf.mxu3  ;;  %v5318_v7 = vadd.f32 %v5317_v29, %v5229_v1  ;;  %v5230_v26 = vpop.f32.mrf.mxu1  ;;  %v5142_v12 = vadd.f32 %v11481_v51, %v5141_v55  ;;  %v6716_v1 = vsel %vm452_vm0, %v6715_v49, %v11692_v30  ;;  %v11758_v30 = vpack.c.b16 %v6086_v31, %v6086_v31  ;;  %v11775_v49 = vld [vmem:[%s12088_s2] ss:$0 sm:$0xff]  ;;  %v9031_v31 = vld [vmem:[%s9970_s20 + $0x98] sm:$0x1] }
 0x393   : > { %v6738_v55 = vshrl.u32 %v11737_v46, 16  ;;  %v6089_v0 = vunpack.c.l.b16 %v9031_v31 }
 0x394   : > { %v5407_v28 = vadd.f32 %v5406_v16, %v5318_v7  ;;  %v5231_v13 = vadd.f32 %v5230_v26, %v5142_v12  ;;  %v6760_v7 = vshll.u32 %v6308_v57, 16  ;;  %v6742_v26 = vrot.slane %v6740_v54, 1 }
 0x395   : > { %v6319_v37 = vshll.u32 %v11758_v30, 16  ;;  %v6754_v12 = vrot.slane %v6752_v39, 1 }
 0x396   : > { %v5444_v44 = vmax.f32 %v5407_v28, 0.0  ;;  %v6762_v9 = vrot.slane %v6760_v7, 1 }
 0x398   : > { %8931 = vst [vmem:[%s10175_s12 + $0x2e0] sm:$0xff] %v5444_v44  ;;  %v11768_v44 = vld [vmem:[%s9970_s20 + $0x84] sm:$0xff]  }
 0x399   : > { %v5319_v8 = vpop.f32.mrf.mxu2  ;;  %v5144_v42 = vpop.f32.mrf.mxu0 }
 0x39a   : > { %v5408_v11 = vpop.f32.mrf.mxu3  ;;  %v5320_v18 = vadd.f32 %v5319_v8, %v5231_v13  ;;  %v5233_v10 = vpop.f32.mrf.mxu1  ;;  %v5145_v52 = vadd.f32 %v11481_v51, %v5144_v42  ;;  %v11755_v51 = vpack.c.b16 %v5686_v41, %v5686_v41  ;;  %v6743_v13 = vor.u32 %v6742_v26, %v6738_v55 }
 0x39b   : > { %v5917_v8 = vor.u32 %v5916_v45, %v5912_v4  ;;  %v6317_v41 = vor.u32 %v6316_v61, %v6312_v23  ;;  %v6763_v42 = vor.u32 %v6762_v9, %v6758_v53  ;;  %v6792_v55 = vshll.u32 %v11720_v3, 16 }
 0x39c   : > { %v5409_v34 = vadd.f32 %v5408_v11, %v5320_v18  ;;  %7413 = vmatmul.bf16.gmra.mxu0 %v6696_v60  ;;  %v5234_v16 = vadd.f32 %v5233_v10, %v5145_v52  ;;  %v5919_v50 = vshll.u32 %v11755_v51, 16  ;;  %v11780_v11 = vrot.slane %v6319_v37, 1  ;;  %v9728_v60 = vld [vmem:[%s9970_s20 + $0x90] sm:$0xf0] }
 0x39d   : > { %7502 = vmatmul.bf16.gmra.mxu1 %v6708_v27  ;;  %v11784_v18 = vor.u32 %v6754_v12, %v6750_v14  ;;  %v6767_v10 = vrot.slane %v6765_v21, 1  ;;  %v9729_v27 = vld [vmem:[%s9970_s20 + $0x90] sm:$0xe]  ;;  %v6736_v52 = vsel %vm452_vm0, %v6735_v6, %v11726_v36  ;;  %v6748_v48 = vsel %vm452_vm0, %v6743_v13, %v6747_v25 }
 0x39e   : > { %v5445_v29 = vmax.f32 %v5409_v34, 0.0  ;;  %7591 = vmatmul.bf16.gmra.mxu2 %v6716_v1  ;;  %v11778_v63 = vrot.slane %v5919_v50, 1  ;;  %v5689_v34 = vunpack.c.l.b16 %v8967_v47  ;;  %v9730_v39 = vor.u32 %v9729_v27, %v9728_v60  ;;  %v9863_v60 = vld [vmem:[%s9970_s20 + $0x9c] sm:$0xf0]  ;;  %v9864_v27 = vld [vmem:[%s9970_s20 + $0x9c] sm:$0xe] }
 0x39f   : > { %7680 = vmatmul.bf16.gmra.mxu3 %v6728_v43  ;;  %v6756_v36 = vsel %vm452_vm0, %v11784_v18, %v11733_v35  ;;  %v6768_v40 = vsel %vm452_vm0, %v6763_v42, %v6767_v10  ;;  %v5923_v56 = vshrl.u32 %v11755_v51, 16  ;;  %v6323_v26 = vshrl.u32 %v11758_v30, 16  ;;  %v11816_v10 = vld [vmem:[%s9970_s20 + $0x9c] sm:$0xff]  }
 0x3a0   : > { %8932 = vst [vmem:[%s10175_s12 + $0x2e8] sm:$0xff] %v5445_v29  ;;  %v5922_v33 = vsel %vm452_vm0, %v5917_v8, %v11778_v63  ;;  %v6322_v29 = vsel %vm452_vm0, %v6317_v41, %v11780_v11  ;;  %v11804_v14 = vpack.c.b16 %v5689_v34, %v5689_v34  ;;  %v6328_v51 = vshll.u32 %v9730_v39, 16 }
 0x3a1   : > { %v5322_v2 = vpop.f32.mrf.mxu2  ;;  %v5146_v15 = vpop.f32.mrf.mxu0  ;;  %v6780_v7 = vshll.u32 %v5922_v33, 16  ;;  %v6800_v19 = vshll.u32 %v6322_v29, 16  ;;  %v6778_v4 = vshrl.u32 %v5922_v33, 16  ;;  %v6785_v45 = vshll.u32 %v5923_v56, 16  ;;  %v9704_v33 = vld [vmem:[%s9970_s20 + $0x90] sm:$0xf0] }
 0x3a2   : > { %v5411_v22 = vpop.f32.mrf.mxu3  ;;  %v5323_v58 = vadd.f32 %v5322_v2, %v5234_v16  ;;  %v5235_v28 = vpop.f32.mrf.mxu1  ;;  %v5147_v59 = vadd.f32 %v11775_v49, %v5146_v15  ;;  %v9862_v16 = vor.u32 %v9861_v32, %v9860_v24  ;;  %v11806_v2 = vpack.c.b16 %v6089_v0, %v6089_v0  ;;  %v9705_v0 = vld [vmem:[%s9970_s20 + $0x90] sm:$0xe] }
 0x3a3   : > { %v6790_v37 = vshrl.u32 %v11720_v3, 16  ;;  %v6794_v30 = vrot.slane %v6792_v55, 1  ;;  %v6798_v15 = vshrl.u32 %v6322_v29, 16  ;;  %v6802_v61 = vrot.slane %v6800_v19, 1 }
 0x3a4   : > { %v5412_v17 = vadd.f32 %v5411_v22, %v5323_v58  ;;  %v5236_v20 = vadd.f32 %v5235_v28, %v5147_v59  ;;  %v5928_v50 = vshll.u32 %v9862_v16, 16  ;;  %v6782_v58 = vrot.slane %v6780_v7, 1  ;;  %v9686_v7 = vld [vmem:[%s9970_s20 + $0x90] sm:$0xff]  }
 0x3a5   : > { %v6805_v28 = vshll.u32 %v6323_v26, 16  ;;  %v5933_v6 = vshll.u32 %v11804_v14, 16  ;;  %v5926_v53 = vshrl.u32 %v9862_v16, 16  ;;  %v6326_v9 = vshrl.u32 %v9730_v39, 16 }
 0x3a6   : > { %v5446_v46 = vmax.f32 %v5412_v17, 0.0  ;;  %v5930_v17 = vrot.slane %v5928_v50, 1  ;;  %v6333_v3 = vshll.u32 %v11806_v2, 16  ;;  %v6330_v59 = vrot.slane %v6328_v51, 1 }
 0x3a7   : > { %v6787_v25 = vrot.slane %v6785_v45, 1  ;;  %v6783_v41 = vor.u32 %v6782_v58, %v6778_v4  ;;  %v6803_v47 = vor.u32 %v6802_v61, %v6798_v15  ;;  %v6807_v31 = vrot.slane %v6805_v28, 1 }
 0x3a8   : > { %8933 = vst [vmem:[%s10175_s12 + $0x2f0] sm:$0xff] %v5446_v46  ;;  %v6795_v46 = vor.u32 %v6794_v30, %v6790_v37  ;;  %v11813_v42 = vrot.slane %v5933_v6, 1  ;;  %v6776_v29 = vsel %vm452_vm0, %v11784_v18, %v11778_v63  ;;  %v9706_v18 = vor.u32 %v9705_v0, %v9704_v33 }
 0x3a9   : > { %v5324_v1 = vpop.f32.mrf.mxu2  ;;  %v7379_v57 = vpop.f32.mrf.mxu0  ;;  %v6788_v16 = vsel %vm452_vm0, %v6783_v41, %v6787_v25  ;;  %v6808_v56 = vsel %vm452_vm0, %v6803_v47, %v6807_v31  ;;  %v9865_v50 = vor.u32 %v9864_v27, %v9863_v60  ;;  %v6832_v51 = vshll.u32 %v9686_v7, 16  ;;  %v9867_v41 = vld [vmem:[%s9970_s20 + $0x9c] sm:$0xe] }
 0x3aa   : > { %v5413_v43 = vpop.f32.mrf.mxu3  ;;  %v5325_v54 = vadd.f32 %v5324_v1, %v5236_v20  ;;  %v7468_v62 = vpop.f32.mrf.mxu1  ;;  %v7380_v38 = vadd.f32 %v11775_v49, %v7379_v57  ;;  %v11820_v1 = vrot.slane %v6333_v3, 1  ;;  %v6796_v39 = vsel %vm452_vm0, %v6795_v46, %v11780_v11  ;;  %v11850_v46 = vld [vmem:[%s9970_s20 + $0x9c] sm:$0xff]  }
 0x3ab   : > { %v6812_v11 = vshll.u32 %v11768_v44, 16  ;;  %v6337_v4 = vshrl.u32 %v11806_v2, 16  ;;  %v5942_v28 = vshll.u32 %v9706_v18, 16  ;;  %v6342_v2 = vshll.u32 %v9865_v50, 16 }
 0x3ac   : > { %v5414_v5 = vadd.f32 %v5413_v43, %v5325_v54  ;;  %7418 = vmatmul.bf16.gmra.mxu0 %v6736_v52  ;;  %v7469_v35 = vadd.f32 %v7468_v62, %v7380_v38  ;;  %v5931_v52 = vor.u32 %v5930_v17, %v5926_v53  ;;  %v6331_v43 = vor.u32 %v6330_v59, %v6326_v9  ;;  %v9034_v54 = vld [vmem:[%s9970_s20 + $0xa4] sm:$0x1] }
 0x3ad   : > { %7507 = vmatmul.bf16.gmra.mxu1 %v6748_v48  ;;  %v8970_v48 = vld [vmem:[%s9970_s20 + $0x98] sm:$0x1]  ;;  %v6092_v19 = vunpack.c.l.b16 %v9034_v54  ;;  %v5940_v31 = vshrl.u32 %v9706_v18, 16  ;;  %v5944_v60 = vrot.slane %v5942_v28, 1  ;;  %v9731_v18 = vld [vmem:[%s9970_s20 + $0xa8] sm:$0xf0] }
 0x3ae   : > { %v5447_v22 = vmax.f32 %v5414_v5, 0.0  ;;  %7596 = vmatmul.bf16.gmra.mxu2 %v6756_v36  ;;  %v5936_v5 = vsel %vm452_vm0, %v5931_v52, %v11813_v42  ;;  %v6336_v55 = vsel %vm452_vm0, %v6331_v43, %v11820_v1  ;;  %v5692_v63 = vunpack.c.l.b16 %v8970_v48 }
 0x3af   : > { %7685 = vmatmul.bf16.gmra.mxu3 %v6768_v40  ;;  %v6820_v58 = vshll.u32 %v5936_v5, 16  ;;  %v6840_v30 = vshll.u32 %v6336_v55, 16  ;;  %v6818_v9 = vshrl.u32 %v5936_v5, 16  ;;  %v6340_v43 = vshrl.u32 %v9865_v50, 16 }
 0x3b0   : > { %8934 = vst [vmem:[%s10175_s12 + $0x2f8] sm:$0xff] %v5447_v22  ;;  %v11843_v15 = vpack.c.b16 %v5692_v63, %v5692_v63  ;;  %v6344_v48 = vrot.slane %v6342_v2, 1  ;;  %v9037_v63 = vld [vmem:[%s9970_s20 + $0xb0] sm:$0x1] }
 0x3b1   : > { %v7557_v12 = vpop.f32.mrf.mxu2  ;;  %v7381_v24 = vpop.f32.mrf.mxu0  ;;  %v6822_v25 = vrot.slane %v6820_v58, 1 }
 0x3b2   : > { %v7646_v23 = vpop.f32.mrf.mxu3  ;;  %v7558_v21 = vadd.f32 %v7557_v12, %v7469_v35  ;;  %v7470_v32 = vpop.f32.mrf.mxu1  ;;  %v7382_v8 = vadd.f32 %v11775_v49, %v7381_v24  ;;  %v5937_v35 = vshrl.u32 %v11804_v14, 16  ;;  %v11845_v12 = vpack.c.b16 %v6092_v19, %v6092_v19  ;;  %v9732_v19 = vld [vmem:[%s9970_s20 + $0xa8] sm:$0xe] }
 0x3b3   : > { %v6810_v14 = vshrl.u32 %v11768_v44, 16  ;;  %v6834_v24 = vrot.slane %v6832_v51, 1  ;;  %v9866_v44 = vld [vmem:[%s9970_s20 + $0x9c] sm:$0xf0]  ;;  %v5947_v47 = vshll.u32 %v11843_v15, 16  ;;  %v6823_v0 = vor.u32 %v6822_v25, %v6818_v9 }
 0x3b4   : > { %v7647_v13 = vadd.f32 %v7646_v23, %v7558_v21  ;;  %v7471_v34 = vadd.f32 %v7470_v32, %v7382_v8  ;;  %v6814_v23 = vrot.slane %v6812_v11, 1  ;;  %v6825_v61 = vshll.u32 %v5937_v35, 16 }
 0x3b5   : > { %v6830_v21 = vshrl.u32 %v9686_v7, 16  ;;  %v6838_v32 = vshrl.u32 %v6336_v55, 16  ;;  %v6845_v8 = vshll.u32 %v6337_v4, 16  ;;  %v6347_v27 = vshll.u32 %v11845_v12, 16 }
 0x3b6   : > { %v7726_v20 = vmax.f32 %v7647_v13, 0.0  ;;  %v6842_v13 = vrot.slane %v6840_v30, 1  ;;  %v6815_v33 = vor.u32 %v6814_v23, %v6810_v14  ;;  %v6827_v54 = vrot.slane %v6825_v61, 1 }
 0x3b7   : > { %v5951_v30 = vshrl.u32 %v11843_v15, 16  ;;  %v6095_v14 = vunpack.c.l.b16 %v9037_v63  ;;  %v9733_v23 = vor.u32 %v9732_v19, %v9731_v18  ;;  %v6351_v15 = vshrl.u32 %v11845_v12, 16  ;;  %v9040_v63 = vld [vmem:[%s9970_s20 + $0xbc] sm:$0x1] }
 0x3b8   : > { %9255 = vst [vmem:[%s10175_s12 + $0x300] sm:$0xff] %v7726_v20  ;;  %v6816_v50 = vsel %vm452_vm0, %v6815_v33, %v11813_v42  ;;  %v6828_v51 = vsel %vm452_vm0, %v6823_v0, %v6827_v54  ;;  %v11891_v33 = vld [vmem:[%s9970_s20 + $0xb4] sm:$0xff]  }
 0x3b9   : > { %v7559_v57 = vpop.f32.mrf.mxu2  ;;  %v7384_v36 = vpop.f32.mrf.mxu0 }
 0x3ba   : > { %v7648_v62 = vpop.f32.mrf.mxu3  ;;  %v7560_v38 = vadd.f32 %v7559_v57, %v7471_v34  ;;  %v7473_v40 = vpop.f32.mrf.mxu1  ;;  %v7385_v26 = vadd.f32 %v11775_v49, %v7384_v36  ;;  %v11857_v57 = vor.u32 %v6834_v24, %v6830_v21 }
 0x3bc   : > { %v7649_v22 = vadd.f32 %v7648_v62, %v7560_v38  ;;  %7423 = vmatmul.bf16.gmra.mxu0 %v6776_v29  ;;  %v7474_v37 = vadd.f32 %v7473_v40, %v7385_v26  ;;  %v8973_v62 = vld [vmem:[%s9970_s20 + $0xa4] sm:$0x1]  ;;  %v6843_v29 = vor.u32 %v6842_v13, %v6838_v32  ;;  %v5945_v38 = vor.u32 %v5944_v60, %v5940_v31 }
 0x3bd   : > { %7512 = vmatmul.bf16.gmra.mxu1 %v6788_v16  ;;  %v6847_v16 = vrot.slane %v6845_v8, 1  ;;  %v11863_v40 = vrot.slane %v6347_v27, 1  ;;  %v5695_v55 = vunpack.c.l.b16 %v8973_v62  ;;  %v9868_v26 = vor.u32 %v9867_v41, %v9866_v44 }
 0x3be   : > { %v7727_v45 = vmax.f32 %v7649_v22, 0.0  ;;  %7601 = vmatmul.bf16.gmra.mxu2 %v6796_v39  ;;  %v11860_v39 = vrot.slane %v5947_v47, 1  ;;  %v6836_v4 = vsel %vm452_vm0, %v11857_v57, %v11820_v1  ;;  %v6872_v1 = vshll.u32 %v11816_v10, 16 }
 0x3bf   : > { %7690 = vmatmul.bf16.gmra.mxu3 %v6808_v56  ;;  %v6345_v56 = vor.u32 %v6344_v48, %v6340_v43  ;;  %v11882_v61 = vpack.c.b16 %v5695_v55, %v5695_v55  ;;  %v5956_v2 = vshll.u32 %v9868_v26, 16  ;;  %v6865_v32 = vshll.u32 %v5951_v30, 16 }
 0x3c0   : > { %9256 = vst [vmem:[%s10175_s12 + $0x308] sm:$0xff] %v7727_v45  ;;  %v5950_v58 = vsel %vm452_vm0, %v5945_v38, %v11860_v39  ;;  %v6870_v13 = vshrl.u32 %v11816_v10, 16  ;;  %v5954_v44 = vshrl.u32 %v9868_v26, 16  ;;  %v6874_v27 = vrot.slane %v6872_v1, 1  ;;  %v9869_v10 = vld [vmem:[%s9970_s20 + $0xb4] sm:$0xf0] }
 0x3c1   : > { %v7562_v6 = vpop.f32.mrf.mxu2  ;;  %v7386_v3 = vpop.f32.mrf.mxu0  ;;  %v6350_v42 = vsel %vm452_vm0, %v6345_v56, %v11863_v40  ;;  %v6860_v9 = vshll.u32 %v5950_v58, 16  ;;  %v6858_v24 = vshrl.u32 %v5950_v58, 16  ;;  %v5961_v8 = vshll.u32 %v11882_v61, 16  ;;  %v8976_v56 = vld [vmem:[%s9970_s20 + $0xb0] sm:$0x1] }
 0x3c2   : > { %v7651_v53 = vpop.f32.mrf.mxu3  ;;  %v7563_v17 = vadd.f32 %v7562_v6, %v7474_v37  ;;  %v7475_v59 = vpop.f32.mrf.mxu1  ;;  %v7387_v52 = vadd.f32 %v11775_v49, %v7386_v3  ;;  %v6848_v37 = vsel %vm452_vm0, %v6843_v29, %v6847_v16  ;;  %v6880_v21 = vshll.u32 %v6350_v42, 16  ;;  %v9708_v26 = vld [vmem:[%s9970_s20 + $0xa8] sm:$0xe] }
 0x3c3   : > { %v6356_v3 = vshll.u32 %v9733_v23, 16  ;;  %v5958_v41 = vrot.slane %v5956_v2, 1  ;;  %v6862_v60 = vrot.slane %v6860_v9, 1  ;;  %v6354_v48 = vshrl.u32 %v9733_v23, 16 }
 0x3c4   : > { %v7652_v20 = vadd.f32 %v7651_v53, %v7563_v17  ;;  %v7476_v36 = vadd.f32 %v7475_v59, %v7387_v52  ;;  %v11886_v17 = vpack.c.b16 %v6095_v14, %v6095_v14  ;;  %v6878_v52 = vshrl.u32 %v6350_v42, 16 }
 0x3c5   : > { %v6882_v43 = vrot.slane %v6880_v21, 1  ;;  %v6358_v29 = vrot.slane %v6356_v3, 1  ;;  %v6867_v16 = vrot.slane %v6865_v32, 1  ;;  %v11897_v38 = vrot.slane %v5961_v8, 1  ;;  %v9687_v21 = vld [vmem:[%s9970_s20 + $0xa8] sm:$0xff]  }
 0x3c6   : > { %v7728_v34 = vmax.f32 %v7652_v20, 0.0  ;;  %v6885_v20 = vshll.u32 %v6351_v15, 16  ;;  %v6361_v62 = vshll.u32 %v11886_v17, 16  ;;  %v6863_v55 = vor.u32 %v6862_v60, %v6858_v24 }
 0x3c7   : > { %v6875_v18 = vor.u32 %v6874_v27, %v6870_v13  ;;  %v6883_v19 = vor.u32 %v6882_v43, %v6878_v52  ;;  %v6098_v30 = vunpack.c.l.b16 %v9040_v63  ;;  %v6856_v23 = vsel %vm452_vm0, %v11857_v57, %v11860_v39  ;;  %v9873_v63 = vld [vmem:[%s9970_s20 + $0xb4] sm:$0xe] }
 0x3c8   : > { %9257 = vst [vmem:[%s10175_s12 + $0x310] sm:$0xff] %v7728_v34  ;;  %v9870_v34 = vld [vmem:[%s9970_s20 + $0xb4] sm:$0xe]  ;;  %v6868_v1 = vsel %vm452_vm0, %v6863_v55, %v6867_v16  ;;  %v6892_v15 = vshll.u32 %v11850_v46, 16  ;;  %v5965_v32 = vshrl.u32 %v11882_v61, 16  ;;  %v6912_v8 = vshll.u32 %v9687_v21, 16 }
 0x3c9   : > { %v7564_v5 = vpop.f32.mrf.mxu2  ;;  %v7389_v11 = vpop.f32.mrf.mxu0  ;;  %v9871_v2 = vor.u32 %v9870_v34, %v9869_v10  ;;  %v6890_v61 = vshrl.u32 %v11850_v46, 16  ;;  %v11931_v55 = vld [vmem:[%s9970_s20 + $0xb4] sm:$0xff]  }
 0x3ca   : > { %v7653_v7 = vpop.f32.mrf.mxu3  ;;  %v7565_v22 = vadd.f32 %v7564_v5, %v7476_v36  ;;  %v7478_v35 = vpop.f32.mrf.mxu1  ;;  %v7390_v45 = vadd.f32 %v11775_v49, %v7389_v11  ;;  %v5959_v36 = vor.u32 %v5958_v41, %v5954_v44  ;;  %v9707_v5 = vld [vmem:[%s9970_s20 + $0xa8] sm:$0xf0]  ;;  %v6894_v41 = vrot.slane %v6892_v15, 1 }
 0x3cb   : > { %v9709_v58 = vor.u32 %v9708_v26, %v9707_v5  ;;  %v6370_v44 = vshll.u32 %v9871_v2, 16  ;;  %v6905_v27 = vshll.u32 %v5965_v32, 16  ;;  %v9872_v26 = vld [vmem:[%s9970_s20 + $0xb4] sm:$0xf0] }
 0x3cc   : > { %v7654_v28 = vadd.f32 %v7653_v7, %v7565_v22  ;;  %7428 = vmatmul.bf16.gmra.mxu0 %v6816_v50  ;;  %v7479_v53 = vadd.f32 %v7478_v35, %v7390_v45  ;;  %v6887_v22 = vrot.slane %v6885_v20, 1  ;;  %v11904_v35 = vrot.slane %v6361_v62, 1 }
 0x3cd   : > { %7517 = vmatmul.bf16.gmra.mxu1 %v6828_v51  ;;  %v6359_v50 = vor.u32 %v6358_v29, %v6354_v48  ;;  %v5964_v45 = vsel %vm452_vm0, %v5959_v36, %v11897_v38  ;;  %v6910_v20 = vshrl.u32 %v9687_v21, 16  ;;  %v5968_v10 = vshrl.u32 %v9709_v58, 16 }
 0x3ce   : > { %v7729_v6 = vmax.f32 %v7654_v28, 0.0  ;;  %7606 = vmatmul.bf16.gmra.mxu2 %v6836_v4  ;;  %v6888_v9 = vsel %vm452_vm0, %v6883_v19, %v6887_v22  ;;  %v6900_v3 = vshll.u32 %v5964_v45, 16  ;;  %v6914_v62 = vrot.slane %v6912_v8, 1 }
 0x3cf   : > { %7695 = vmatmul.bf16.gmra.mxu3 %v6848_v37  ;;  %v5698_v37 = vunpack.c.l.b16 %v8976_v56  ;;  %v6364_v57 = vsel %vm452_vm0, %v6359_v50, %v11904_v35  ;;  %v6368_v29 = vshrl.u32 %v9871_v2, 16  ;;  %v6372_v16 = vrot.slane %v6370_v44, 1 }
 0x3d0   : > { %9258 = vst [vmem:[%s10175_s12 + $0x318] sm:$0xff] %v7729_v6  ;;  %v6902_v60 = vrot.slane %v6900_v3, 1  ;;  %v6895_v36 = vor.u32 %v6894_v41, %v6890_v61  ;;  %v6918_v56 = vshrl.u32 %v6364_v57, 16  ;;  %v6907_v22 = vrot.slane %v6905_v27, 1 }
 0x3d1   : > { %v7567_v59 = vpop.f32.mrf.mxu2  ;;  %v7391_v12 = vpop.f32.mrf.mxu0  ;;  %v11921_v39 = vpack.c.b16 %v5698_v37, %v5698_v37  ;;  %v6373_v37 = vor.u32 %v6372_v16, %v6368_v29 }
 0x3d2   : > { %v7656_v25 = vpop.f32.mrf.mxu3  ;;  %v7568_v47 = vadd.f32 %v7567_v59, %v7479_v53  ;;  %v7480_v31 = vpop.f32.mrf.mxu1  ;;  %v7392_v54 = vadd.f32 %v11775_v49, %v7391_v12  ;;  %v6876_v53 = vsel %vm452_vm0, %v6875_v18, %v11863_v40  ;;  %v5970_v59 = vshll.u32 %v9709_v58, 16  ;;  %v8979_v58 = vld [vmem:[%s9970_s20 + $0xbc] sm:$0x1] }
 0x3d3   : > { %v6920_v12 = vshll.u32 %v6364_v57, 16  ;;  %v5975_v48 = vshll.u32 %v11921_v39, 16  ;;  %v5979_v41 = vshrl.u32 %v11921_v39, 16 }
 0x3d4   : > { %v7657_v0 = vadd.f32 %v7656_v25, %v7568_v47  ;;  %v7481_v11 = vadd.f32 %v7480_v31, %v7392_v54  ;;  %v11923_v25 = vpack.c.b16 %v6098_v30, %v6098_v30  ;;  %v6365_v47 = vshrl.u32 %v11886_v17, 16  ;;  %v9043_v30 = vld [vmem:[%s9970_s20 + $0xc8] sm:$0x1] }
 0x3d5   : > { %v6898_v31 = vshrl.u32 %v5964_v45, 16  ;;  %v5972_v34 = vrot.slane %v5970_v59, 1  ;;  %v6922_v5 = vrot.slane %v6920_v12, 1  ;;  %v11936_v50 = vrot.slane %v5975_v48, 1 }
 0x3d6   : > { %v7730_v7 = vmax.f32 %v7657_v0, 0.0  ;;  %v6375_v46 = vshll.u32 %v11923_v25, 16  ;;  %v6101_v32 = vunpack.c.l.b16 %v9043_v30 }
 0x3d8   : > { %9259 = vst [vmem:[%s10175_s12 + $0x320] sm:$0xff] %v7730_v7  ;;  %v6925_v7 = vshll.u32 %v6365_v47, 16 }
 0x3d9   : > { %v7569_v51 = vpop.f32.mrf.mxu2  ;;  %v7394_v42 = vpop.f32.mrf.mxu0 }
 0x3da   : > { %v7658_v4 = vpop.f32.mrf.mxu3  ;;  %v7570_v28 = vadd.f32 %v7569_v51, %v7481_v11  ;;  %v7483_v14 = vpop.f32.mrf.mxu1  ;;  %v7395_v6 = vadd.f32 %v11775_v49, %v7394_v42  ;;  %v6903_v11 = vor.u32 %v6902_v60, %v6898_v31  ;;  %v5973_v51 = vor.u32 %v5972_v34, %v5968_v10 }
 0x3db   : > { %v6923_v42 = vor.u32 %v6922_v5, %v6918_v56  ;;  %v6952_v31 = vshll.u32 %v11891_v33, 16  ;;  %v6379_v60 = vshrl.u32 %v11923_v25, 16  ;;  %v6945_v34 = vshll.u32 %v5979_v41, 16 }
 0x3dc   : > { %v7659_v24 = vadd.f32 %v7658_v4, %v7570_v28  ;;  %7433 = vmatmul.bf16.gmra.mxu0 %v6856_v23  ;;  %v7484_v13 = vadd.f32 %v7483_v14, %v7395_v6  ;;  %v11938_v4 = vrot.slane %v6375_v46, 1  ;;  %v11942_v28 = vor.u32 %v6914_v62, %v6910_v20  ;;  %v9734_v23 = vld [vmem:[%s9970_s20 + $0xc0] sm:$0xf0] }
 0x3dd   : > { %7522 = vmatmul.bf16.gmra.mxu1 %v6868_v1  ;;  %v6927_v14 = vrot.slane %v6925_v7, 1  ;;  %v9735_v1 = vld [vmem:[%s9970_s20 + $0xc0] sm:$0xe]  ;;  %v6896_v6 = vsel %vm452_vm0, %v6895_v36, %v11897_v38  ;;  %v6908_v15 = vsel %vm452_vm0, %v6903_v11, %v6907_v22  ;;  %v5978_v21 = vsel %vm452_vm0, %v5973_v51, %v11936_v50 }
 0x3de   : > { %v7731_v40 = vmax.f32 %v7659_v24, 0.0  ;;  %7611 = vmatmul.bf16.gmra.mxu2 %v6876_v53  ;;  %v5701_v24 = vunpack.c.l.b16 %v8979_v58  ;;  %v9736_v8 = vor.u32 %v9735_v1, %v9734_v23  ;;  %v6916_v38 = vsel %vm452_vm0, %v11942_v28, %v11904_v35  ;;  %v9875_v23 = vld [vmem:[%s9970_s20 + $0xcc] sm:$0xf0]  ;;  %v9876_v1 = vld [vmem:[%s9970_s20 + $0xcc] sm:$0xe] }
 0x3df   : > { %7700 = vmatmul.bf16.gmra.mxu3 %v6888_v9  ;;  %v6928_v61 = vsel %vm452_vm0, %v6923_v42, %v6927_v14  ;;  %v6940_v12 = vshll.u32 %v5978_v21, 16  ;;  %v6938_v10 = vshrl.u32 %v5978_v21, 16  ;;  %v6950_v46 = vshrl.u32 %v11891_v33, 16  ;;  %v11974_v14 = vld [vmem:[%s9970_s20 + $0xcc] sm:$0xff]   ;;  %v9710_v21 = vld [vmem:[%s9970_s20 + $0xc0] sm:$0xf0] }
 0x3e0   : > { %9260 = vst [vmem:[%s10175_s12 + $0x328] sm:$0xff] %v7731_v40  ;;  %v6378_v40 = vsel %vm452_vm0, %v6373_v37, %v11938_v4  ;;  %v11962_v20 = vpack.c.b16 %v5701_v24, %v5701_v24  ;;  %v6384_v39 = vshll.u32 %v9736_v8, 16  ;;  %v6954_v25 = vrot.slane %v6952_v31, 1 }
 0x3e1   : > { %v7572_v52 = vpop.f32.mrf.mxu2  ;;  %v7396_v54 = vpop.f32.mrf.mxu0  ;;  %v6960_v27 = vshll.u32 %v6378_v40, 16  ;;  %v6382_v5 = vshrl.u32 %v9736_v8, 16  ;;  %v6947_v22 = vrot.slane %v6945_v34, 1 }
 0x3e2   : > { %v7661_v43 = vpop.f32.mrf.mxu3  ;;  %v7573_v0 = vadd.f32 %v7572_v52, %v7484_v13  ;;  %v7485_v17 = vpop.f32.mrf.mxu1  ;;  %v7397_v19 = vadd.f32 %v11775_v49, %v7396_v54  ;;  %v9874_v13 = vor.u32 %v9873_v63, %v9872_v26  ;;  %v11964_v52 = vpack.c.b16 %v6101_v32, %v6101_v32  ;;  %v9711_v32 = vld [vmem:[%s9970_s20 + $0xc0] sm:$0xe] }
 0x3e3   : > { %v6958_v54 = vshrl.u32 %v6378_v40, 16  ;;  %v6962_v16 = vrot.slane %v6960_v27, 1  ;;  %v5989_v36 = vshll.u32 %v11962_v20, 16  ;;  %v6936_v40 = vsel %vm452_vm0, %v11942_v28, %v11936_v50 }
 0x3e4   : > { %v7662_v18 = vadd.f32 %v7661_v43, %v7573_v0  ;;  %v7486_v2 = vadd.f32 %v7485_v17, %v7397_v19  ;;  %v5984_v48 = vshll.u32 %v9874_v13, 16  ;;  %v6942_v0 = vrot.slane %v6940_v12, 1  ;;  %v9688_v12 = vld [vmem:[%s9970_s20 + $0xc0] sm:$0xff]  }
 0x3e5   : > { %v6965_v17 = vshll.u32 %v6379_v60, 16  ;;  %v5982_v56 = vshrl.u32 %v9874_v13, 16  ;;  %v6389_v33 = vshll.u32 %v11964_v52, 16  ;;  %v6386_v19 = vrot.slane %v6384_v39, 1 }
 0x3e6   : > { %v7732_v45 = vmax.f32 %v7662_v18, 0.0  ;;  %v5986_v18 = vrot.slane %v5984_v48, 1  ;;  %v6943_v37 = vor.u32 %v6942_v0, %v6938_v10  ;;  %v6963_v58 = vor.u32 %v6962_v16, %v6958_v54 }
 0x3e7   : > { %v6967_v30 = vrot.slane %v6965_v17, 1  ;;  %v11971_v42 = vrot.slane %v5989_v36, 1  ;;  %v9712_v28 = vor.u32 %v9711_v32, %v9710_v21  ;;  %v9877_v48 = vor.u32 %v9876_v1, %v9875_v23 }
 0x3e8   : > { %9261 = vst [vmem:[%s10175_s12 + $0x330] sm:$0xff] %v7732_v45  ;;  %v6955_v45 = vor.u32 %v6954_v25, %v6950_v46  ;;  %v6948_v13 = vsel %vm452_vm0, %v6943_v37, %v6947_v22  ;;  %v6992_v39 = vshll.u32 %v9688_v12, 16  ;;  %v6393_v10 = vshrl.u32 %v11964_v52, 16 }
 0x3e9   : > { %v7574_v53 = vpop.f32.mrf.mxu2  ;;  %v7399_v57 = vpop.f32.mrf.mxu0  ;;  %v6968_v41 = vsel %vm452_vm0, %v6963_v58, %v6967_v30  ;;  %v5998_v17 = vshll.u32 %v9712_v28, 16  ;;  %v6398_v36 = vshll.u32 %v9877_v48, 16  ;;  %v5996_v37 = vshrl.u32 %v9712_v28, 16 }
 0x3ea   : > { %v7663_v9 = vpop.f32.mrf.mxu3  ;;  %v7575_v3 = vadd.f32 %v7574_v53, %v7486_v2  ;;  %v7488_v59 = vpop.f32.mrf.mxu1  ;;  %v7400_v44 = vadd.f32 %v11775_v49, %v7399_v57  ;;  %v11978_v53 = vrot.slane %v6389_v33, 1  ;;  %v6956_v8 = vsel %vm452_vm0, %v6955_v45, %v11938_v4 }
 0x3eb   : > { %v6972_v4 = vshll.u32 %v11931_v55, 16  ;;  %v6396_v1 = vshrl.u32 %v9877_v48, 16 }
 0x3ec   : > { %v7664_v47 = vadd.f32 %v7663_v9, %v7575_v3  ;;  %7438 = vmatmul.bf16.gmra.mxu0 %v6896_v6  ;;  %v7489_v35 = vadd.f32 %v7488_v59, %v7400_v44  ;;  %v5987_v6 = vor.u32 %v5986_v18, %v5982_v56  ;;  %v6387_v9 = vor.u32 %v6386_v19, %v6382_v5  ;;  %v9046_v3 = vld [vmem:[%s9970_s20 + $0xd4] sm:$0x1] }
 0x3ed   : > { %7527 = vmatmul.bf16.gmra.mxu1 %v6908_v15  ;;  %v8982_v15 = vld [vmem:[%s9970_s20 + $0xc8] sm:$0x1]  ;;  %v6104_v27 = vunpack.c.l.b16 %v9046_v3 }
 0x3ee   : > { %v7733_v43 = vmax.f32 %v7664_v47, 0.0  ;;  %7616 = vmatmul.bf16.gmra.mxu2 %v6916_v38  ;;  %v5992_v47 = vsel %vm452_vm0, %v5987_v6, %v11971_v42  ;;  %v6392_v31 = vsel %vm452_vm0, %v6387_v9, %v11978_v53  ;;  %v5704_v50 = vunpack.c.l.b16 %v8982_v15 }
 0x3ef   : > { %7705 = vmatmul.bf16.gmra.mxu3 %v6928_v61  ;;  %v6980_v0 = vshll.u32 %v5992_v47, 16  ;;  %v7000_v25 = vshll.u32 %v6392_v31, 16  ;;  %v6978_v52 = vshrl.u32 %v5992_v47, 16 }
 0x3f0   : > { %9262 = vst [vmem:[%s10175_s12 + $0x338] sm:$0xff] %v7733_v43  ;;  %v12001_v54 = vpack.c.b16 %v5704_v50, %v5704_v50 }
 0x3f1   : > { %v7577_v62 = vpop.f32.mrf.mxu2  ;;  %v7401_v26 = vpop.f32.mrf.mxu0  ;;  %v6982_v22 = vrot.slane %v6980_v0, 1 }
 0x3f2   : > { %v7666_v29 = vpop.f32.mrf.mxu3  ;;  %v7578_v7 = vadd.f32 %v7577_v62, %v7489_v35  ;;  %v7490_v63 = vpop.f32.mrf.mxu1  ;;  %v7402_v51 = vadd.f32 %v11775_v49, %v7401_v26  ;;  %v5993_v35 = vshrl.u32 %v11962_v20, 16  ;;  %v12003_v62 = vpack.c.b16 %v6104_v27, %v6104_v27 }
 0x3f3   : > { %v6970_v20 = vshrl.u32 %v11931_v55, 16  ;;  %v6994_v26 = vrot.slane %v6992_v39, 1  ;;  %v6003_v45 = vshll.u32 %v12001_v54, 16  ;;  %v6000_v55 = vrot.slane %v5998_v17, 1 }
 0x3f4   : > { %v7667_v11 = vadd.f32 %v7666_v29, %v7578_v7  ;;  %v7491_v24 = vadd.f32 %v7490_v63, %v7402_v51  ;;  %v6974_v29 = vrot.slane %v6972_v4, 1  ;;  %v6985_v16 = vshll.u32 %v5993_v35, 16 }
 0x3f5   : > { %v6990_v7 = vshrl.u32 %v9688_v12, 16  ;;  %v6998_v63 = vshrl.u32 %v6392_v31, 16  ;;  %v7005_v51 = vshll.u32 %v6393_v10, 16  ;;  %v6403_v58 = vshll.u32 %v12003_v62, 16 }
 0x3f6   : > { %v7734_v2 = vmax.f32 %v7667_v11, 0.0  ;;  %v7002_v11 = vrot.slane %v7000_v25, 1  ;;  %v6975_v6 = vor.u32 %v6974_v29, %v6970_v20  ;;  %v6987_v9 = vrot.slane %v6985_v16, 1 }
 0x3f7   : > { %v6983_v21 = vor.u32 %v6982_v22, %v6978_v52  ;;  %v7007_v32 = vrot.slane %v7005_v51, 1  ;;  %v6007_v48 = vshrl.u32 %v12001_v54, 16 }
 0x3f8   : > { %9263 = vst [vmem:[%s10175_s12 + $0x340] sm:$0xff] %v7734_v2  ;;  %v6400_v2 = vrot.slane %v6398_v36, 1  ;;  %v7003_v3 = vor.u32 %v7002_v11, %v6998_v63  ;;  %v6976_v12 = vsel %vm452_vm0, %v6975_v6, %v11971_v42  ;;  %v7030_v36 = vshrl.u32 %v11974_v14, 16 }
 0x3f9   : > { %v7579_v57 = vpop.f32.mrf.mxu2  ;;  %v7404_v38 = vpop.f32.mrf.mxu0  ;;  %v6988_v31 = vsel %vm452_vm0, %v6983_v21, %v6987_v9  ;;  %v7025_v16 = vshll.u32 %v6007_v48, 16 }
 0x3fa   : > { %v7668_v59 = vpop.f32.mrf.mxu3  ;;  %v7580_v44 = vadd.f32 %v7579_v57, %v7491_v24  ;;  %v7493_v61 = vpop.f32.mrf.mxu1  ;;  %v7405_v60 = vadd.f32 %v11775_v49, %v7404_v38  ;;  %v12010_v24 = vor.u32 %v6994_v26, %v6990_v7  ;;  %v6005_v57 = vrot.slane %v6003_v45, 1 }
 0x3fb   : > { %v7008_v28 = vsel %vm452_vm0, %v7003_v3, %v7007_v32 }
 0x3fc   : > { %v7669_v43 = vadd.f32 %v7668_v59, %v7580_v44  ;;  %7443 = vmatmul.bf16.gmra.mxu0 %v6936_v40  ;;  %v7494_v46 = vadd.f32 %v7493_v61, %v7405_v60  ;;  %v6001_v59 = vor.u32 %v6000_v55, %v5996_v37  ;;  %v6996_v60 = vsel %vm452_vm0, %v12010_v24, %v11978_v53 }
 0x3fd   : > { %7532 = vmatmul.bf16.gmra.mxu1 %v6948_v13  ;;  %v6405_v13 = vrot.slane %v6403_v58, 1  ;;  %v7032_v53 = vshll.u32 %v11974_v14, 16 }
 0x3fe   : > { %v7735_v34 = vmax.f32 %v7669_v43, 0.0  ;;  %7621 = vmatmul.bf16.gmra.mxu2 %v6956_v8  ;;  %v6401_v8 = vor.u32 %v6400_v2, %v6396_v1  ;;  %v6006_v27 = vsel %vm452_vm0, %v6001_v59, %v6005_v57 }
 0x3ff   : > { %7710 = vmatmul.bf16.gmra.mxu3 %v6968_v41  ;;  %v7020_v39 = vshll.u32 %v6006_v27, 16  ;;  %v7018_v0 = vshrl.u32 %v6006_v27, 16 }
 0x400   : > { %9264 = vst [vmem:[%s10175_s12 + $0x348] sm:$0xff] %v7735_v34  ;;  %v6406_v4 = vsel %vm452_vm0, %v6401_v8, %v6405_v13 }
 0x401   : > { %v7582_v56 = vpop.f32.mrf.mxu2  ;;  %v7406_v33 = vpop.f32.mrf.mxu0  ;;  %v7040_v10 = vshll.u32 %v6406_v4, 16  ;;  %v7022_v29 = vrot.slane %v7020_v39, 1  ;;  %v7038_v54 = vshrl.u32 %v6406_v4, 16 }
 0x402   : > { %v7671_v5 = vpop.f32.mrf.mxu3  ;;  %v7583_v18 = vadd.f32 %v7582_v56, %v7494_v46  ;;  %v7495_v19 = vpop.f32.mrf.mxu1  ;;  %v7407_v23 = vadd.f32 %v11775_v49, %v7406_v33  ;;  %v7034_v56 = vrot.slane %v7032_v53, 1  ;;  %v7027_v33 = vrot.slane %v7025_v16, 1 }
 0x404   : > { %v7672_v30 = vadd.f32 %v7671_v5, %v7583_v18  ;;  %v7496_v40 = vadd.f32 %v7495_v19, %v7407_v23  ;;  %v7042_v5 = vrot.slane %v7040_v10, 1  ;;  %v7023_v18 = vor.u32 %v7022_v29, %v7018_v0 }
 0x405   : > { %v7035_v19 = vor.u32 %v7034_v56, %v7030_v36 }
 0x406   : > { %v7736_v15 = vmax.f32 %v7672_v30, 0.0  ;;  %v7043_v22 = vor.u32 %v7042_v5, %v7038_v54  ;;  %v7016_v30 = vsel %vm452_vm0, %v12010_v24, %v6005_v57  ;;  %v7028_v23 = vsel %vm452_vm0, %v7023_v18, %v7027_v33 }
 0x407   : > { %v7036_v2 = vsel %vm452_vm0, %v7035_v19, %v6405_v13 }
 0x408   : > { %9265 = vst [vmem:[%s10175_s12 + $0x350] sm:$0xff] %v7736_v15 }
 0x409   : > { %v7584_v44 = vpop.f32.mrf.mxu2  ;;  %v7409_v41 = vpop.f32.mrf.mxu0 }
 0x40a   : > { %v7673_v38 = vpop.f32.mrf.mxu3  ;;  %v7585_v61 = vadd.f32 %v7584_v44, %v7496_v40  ;;  %v7498_v47 = vpop.f32.mrf.mxu1  ;;  %v7410_v50 = vadd.f32 %v11775_v49, %v7409_v41  ;;  %v6407_v49 = vshrl.u32 %v12003_v62, 16  ;;  %v12031_v62 = vld [vmem:[%s12088_s2] ss:$0 sm:$0xff] }
 0x40c   : > { %v7674_v43 = vadd.f32 %v7673_v38, %v7585_v61  ;;  %7448 = vmatmul.bf16.gmra.mxu0 %v6976_v12  ;;  %v7499_v42 = vadd.f32 %v7498_v47, %v7410_v50  ;;  %v7045_v52 = vshll.u32 %v6407_v49, 16 }
 0x40d   : > { %7537 = vmatmul.bf16.gmra.mxu1 %v6988_v31 }
 0x40e   : > { %v7737_v35 = vmax.f32 %v7674_v43, 0.0  ;;  %7626 = vmatmul.bf16.gmra.mxu2 %v6996_v60  ;;  %v7047_v11 = vrot.slane %v7045_v52, 1 }
 0x40f   : > { %7715 = vmatmul.bf16.gmra.mxu3 %v7008_v28 }
 0x410   : > { %9266 = vst [vmem:[%s10175_s12 + $0x358] sm:$0xff] %v7737_v35  ;;  %v7048_v6 = vsel %vm452_vm0, %v7043_v22, %v7047_v11 }
 0x411   : > { %v7587_v34 = vpop.f32.mrf.mxu2  ;;  %v7411_v17 = vpop.f32.mrf.mxu0 }
 0x412   : > { %v7676_v46 = vpop.f32.mrf.mxu3  ;;  %v7588_v25 = vadd.f32 %v7587_v34, %v7499_v42  ;;  %v7500_v20 = vpop.f32.mrf.mxu1  ;;  %v7412_v26 = vadd.f32 %v12031_v62, %v7411_v17 }
 0x414   : > { %v7677_v7 = vadd.f32 %v7676_v46, %v7588_v25  ;;  %v7501_v14 = vadd.f32 %v7500_v20, %v7412_v26 }
 0x416   : > { %v7738_v63 = vmax.f32 %v7677_v7, 0.0 }
 0x418   : > { %9267 = vst [vmem:[%s10175_s12 + $0x360] sm:$0xff] %v7738_v63 }
 0x419   : > { %v7589_v51 = vpop.f32.mrf.mxu2  ;;  %v7414_v55 = vpop.f32.mrf.mxu0 }
 0x41a   : > { %v7678_v45 = vpop.f32.mrf.mxu3  ;;  %v7590_v37 = vadd.f32 %v7589_v51, %v7501_v14  ;;  %v7503_v58 = vpop.f32.mrf.mxu1  ;;  %v7415_v1 = vadd.f32 %v12031_v62, %v7414_v55 }
 0x41c   : > { %v7679_v9 = vadd.f32 %v7678_v45, %v7590_v37  ;;  %7453 = vmatmul.bf16.gmra.mxu0 %v7016_v30  ;;  %v7504_v21 = vadd.f32 %v7503_v58, %v7415_v1 }
 0x41d   : > { %7542 = vmatmul.bf16.gmra.mxu1 %v7028_v23 }
 0x41e   : > { %v7739_v15 = vmax.f32 %v7679_v9, 0.0  ;;  %7631 = vmatmul.bf16.gmra.mxu2 %v7036_v2 }
 0x41f   : > { %7720 = vmatmul.bf16.gmra.mxu3 %v7048_v6 }
 0x420   : > { %9268 = vst [vmem:[%s10175_s12 + $0x368] sm:$0xff] %v7739_v15 }
 0x421   : > { %v7592_v32 = vpop.f32.mrf.mxu2  ;;  %v7416_v57 = vpop.f32.mrf.mxu0 }
 0x422   : > { %v7681_v3 = vpop.f32.mrf.mxu3  ;;  %v7593_v24 = vadd.f32 %v7592_v32, %v7504_v21  ;;  %v7505_v59 = vpop.f32.mrf.mxu1  ;;  %v7417_v13 = vadd.f32 %v12031_v62, %v7416_v57 }
 0x424   : > { %v7682_v40 = vadd.f32 %v7681_v3, %v7593_v24  ;;  %v7506_v44 = vadd.f32 %v7505_v59, %v7417_v13 }
 0x426   : > { %v7740_v8 = vmax.f32 %v7682_v40, 0.0 }
 0x428   : > { %9269 = vst [vmem:[%s10175_s12 + $0x370] sm:$0xff] %v7740_v8 }
 0x429   : > { %v7594_v38 = vpop.f32.mrf.mxu2  ;;  %v7419_v47 = vpop.f32.mrf.mxu0 }
 0x42a   : > { %v7683_v61 = vpop.f32.mrf.mxu3  ;;  %v7595_v41 = vadd.f32 %v7594_v38, %v7506_v44  ;;  %v7508_v12 = vpop.f32.mrf.mxu1  ;;  %v7420_v31 = vadd.f32 %v12031_v62, %v7419_v47 }
 0x42c   : > { %v7684_v60 = vadd.f32 %v7683_v61, %v7595_v41  ;;  %v7509_v28 = vadd.f32 %v7508_v12, %v7420_v31 }
 0x42e   : > { %v7741_v50 = vmax.f32 %v7684_v60, 0.0 }
 0x430   : > { %9270 = vst [vmem:[%s10175_s12 + $0x378] sm:$0xff] %v7741_v50 }
 0x431   : > { %v7597_v27 = vpop.f32.mrf.mxu2  ;;  %v7421_v35 = vpop.f32.mrf.mxu0 }
 0x432   : > { %v7686_v43 = vpop.f32.mrf.mxu3  ;;  %v7598_v4 = vadd.f32 %v7597_v27, %v7509_v28  ;;  %v7510_v42 = vpop.f32.mrf.mxu1  ;;  %v7422_v39 = vadd.f32 %v12031_v62, %v7421_v35 }
 0x434   : > { %v7687_v48 = vadd.f32 %v7686_v43, %v7598_v4  ;;  %v7511_v49 = vadd.f32 %v7510_v42, %v7422_v39 }
 0x436   : > { %v7742_v53 = vmax.f32 %v7687_v48, 0.0 }
 0x438   : > { %9271 = vst [vmem:[%s10175_s12 + $0x380] sm:$0xff] %v7742_v53 }
 0x439   : > { %v7599_v10 = vpop.f32.mrf.mxu2  ;;  %v7424_v0 = vpop.f32.mrf.mxu0 }
 0x43a   : > { %v7688_v34 = vpop.f32.mrf.mxu3  ;;  %v7600_v46 = vadd.f32 %v7599_v10, %v7511_v49  ;;  %v7513_v25 = vpop.f32.mrf.mxu1  ;;  %v7425_v17 = vadd.f32 %v12031_v62, %v7424_v0 }
 0x43c   : > { %v7689_v20 = vadd.f32 %v7688_v34, %v7600_v46  ;;  %v7514_v16 = vadd.f32 %v7513_v25, %v7425_v17 }
 0x43e   : > { %v7743_v29 = vmax.f32 %v7689_v20, 0.0 }
 0x440   : > { %9272 = vst [vmem:[%s10175_s12 + $0x388] sm:$0xff] %v7743_v29 }
 0x441   : > { %v7602_v36 = vpop.f32.mrf.mxu2  ;;  %v7426_v5 = vpop.f32.mrf.mxu0 }
 0x442   : > { %v7691_v56 = vpop.f32.mrf.mxu3  ;;  %v7603_v54 = vadd.f32 %v7602_v36, %v7514_v16  ;;  %v7515_v52 = vpop.f32.mrf.mxu1  ;;  %v7427_v26 = vadd.f32 %v12031_v62, %v7426_v5 }
 0x444   : > { %v7692_v7 = vadd.f32 %v7691_v56, %v7603_v54  ;;  %v7516_v18 = vadd.f32 %v7515_v52, %v7427_v26 }
 0x446   : > { %v7744_v63 = vmax.f32 %v7692_v7, 0.0 }
 0x448   : > { %9273 = vst [vmem:[%s10175_s12 + $0x390] sm:$0xff] %v7744_v63 }
 0x449   : > { %v7604_v33 = vpop.f32.mrf.mxu2  ;;  %v7429_v11 = vpop.f32.mrf.mxu0 }
 0x44a   : > { %v7693_v19 = vpop.f32.mrf.mxu3  ;;  %v7605_v22 = vadd.f32 %v7604_v33, %v7516_v18  ;;  %v7518_v14 = vpop.f32.mrf.mxu1  ;;  %v7430_v51 = vadd.f32 %v12031_v62, %v7429_v11 }
 0x44c   : > { %v7694_v45 = vadd.f32 %v7693_v19, %v7605_v22  ;;  %v7519_v55 = vadd.f32 %v7518_v14, %v7430_v51 }
 0x44e   : > { %v7745_v37 = vmax.f32 %v7694_v45, 0.0 }
 0x450   : > { %9274 = vst [vmem:[%s10175_s12 + $0x398] sm:$0xff] %v7745_v37 }
 0x451   : > { %v7607_v58 = vpop.f32.mrf.mxu2  ;;  %v7431_v1 = vpop.f32.mrf.mxu0 }
 0x452   : > { %v7696_v30 = vpop.f32.mrf.mxu3  ;;  %v7608_v23 = vadd.f32 %v7607_v58, %v7519_v55  ;;  %v7520_v2 = vpop.f32.mrf.mxu1  ;;  %v7432_v9 = vadd.f32 %v12031_v62, %v7431_v1 }
 0x454   : > { %v7697_v6 = vadd.f32 %v7696_v30, %v7608_v23  ;;  %v7521_v21 = vadd.f32 %v7520_v2, %v7432_v9 }
 0x456   : > { %v7746_v15 = vmax.f32 %v7697_v6, 0.0 }
 0x458   : > { %9275 = vst [vmem:[%s10175_s12 + $0x3a0] sm:$0xff] %v7746_v15 }
 0x459   : > { %v7609_v32 = vpop.f32.mrf.mxu2  ;;  %v7434_v57 = vpop.f32.mrf.mxu0 }
 0x45a   : > { %v7698_v3 = vpop.f32.mrf.mxu3  ;;  %v7610_v24 = vadd.f32 %v7609_v32, %v7521_v21  ;;  %v7523_v59 = vpop.f32.mrf.mxu1  ;;  %v7435_v40 = vadd.f32 %v12031_v62, %v7434_v57 }
 0x45c   : > { %v7699_v13 = vadd.f32 %v7698_v3, %v7610_v24  ;;  %v7524_v44 = vadd.f32 %v7523_v59, %v7435_v40 }
 0x45e   : > { %v7747_v8 = vmax.f32 %v7699_v13, 0.0 }
 0x460   : > { %9276 = vst [vmem:[%s10175_s12 + $0x3a8] sm:$0xff] %v7747_v8 }
 0x461   : > { %v7612_v38 = vpop.f32.mrf.mxu2  ;;  %v7436_v47 = vpop.f32.mrf.mxu0 }
 0x462   : > { %v7701_v61 = vpop.f32.mrf.mxu3  ;;  %v7613_v41 = vadd.f32 %v7612_v38, %v7524_v44  ;;  %v7525_v12 = vpop.f32.mrf.mxu1  ;;  %v7437_v60 = vadd.f32 %v12031_v62, %v7436_v47 }
 0x464   : > { %v7702_v31 = vadd.f32 %v7701_v61, %v7613_v41  ;;  %v7526_v28 = vadd.f32 %v7525_v12, %v7437_v60 }
 0x466   : > { %v7748_v50 = vmax.f32 %v7702_v31, 0.0 }
 0x468   : > { %9277 = vst [vmem:[%s10175_s12 + $0x3b0] sm:$0xff] %v7748_v50 }
 0x469   : > { %v7614_v27 = vpop.f32.mrf.mxu2  ;;  %v7439_v35 = vpop.f32.mrf.mxu0 }
 0x46a   : > { %v7703_v43 = vpop.f32.mrf.mxu3  ;;  %v7615_v4 = vadd.f32 %v7614_v27, %v7526_v28  ;;  %v7528_v42 = vpop.f32.mrf.mxu1  ;;  %v7440_v48 = vadd.f32 %v12031_v62, %v7439_v35 }
 0x46c   : > { %v7704_v39 = vadd.f32 %v7703_v43, %v7615_v4  ;;  %v7529_v49 = vadd.f32 %v7528_v42, %v7440_v48 }
 0x46e   : > { %v7749_v53 = vmax.f32 %v7704_v39, 0.0 }
 0x470   : > { %9278 = vst [vmem:[%s10175_s12 + $0x3b8] sm:$0xff] %v7749_v53 }
 0x471   : > { %v7617_v10 = vpop.f32.mrf.mxu2  ;;  %v7441_v0 = vpop.f32.mrf.mxu0 }
 0x472   : > { %v7706_v34 = vpop.f32.mrf.mxu3  ;;  %v7618_v46 = vadd.f32 %v7617_v10, %v7529_v49  ;;  %v7530_v25 = vpop.f32.mrf.mxu1  ;;  %v7442_v20 = vadd.f32 %v12031_v62, %v7441_v0 }
 0x474   : > { %v7707_v17 = vadd.f32 %v7706_v34, %v7618_v46  ;;  %v7531_v16 = vadd.f32 %v7530_v25, %v7442_v20 }
 0x476   : > { %v7750_v29 = vmax.f32 %v7707_v17, 0.0 }
 0x478   : > { %9279 = vst [vmem:[%s10175_s12 + $0x3c0] sm:$0xff] %v7750_v29 }
 0x479   : > { %v7619_v36 = vpop.f32.mrf.mxu2  ;;  %v7444_v5 = vpop.f32.mrf.mxu0 }
 0x47a   : > { %v7708_v56 = vpop.f32.mrf.mxu3  ;;  %v7620_v54 = vadd.f32 %v7619_v36, %v7531_v16  ;;  %v7533_v52 = vpop.f32.mrf.mxu1  ;;  %v7445_v7 = vadd.f32 %v12031_v62, %v7444_v5 }
 0x47c   : > { %v7709_v26 = vadd.f32 %v7708_v56, %v7620_v54  ;;  %v7534_v18 = vadd.f32 %v7533_v52, %v7445_v7 }
 0x47e   : > { %v7751_v63 = vmax.f32 %v7709_v26, 0.0 }
 0x480   : > { %9280 = vst [vmem:[%s10175_s12 + $0x3c8] sm:$0xff] %v7751_v63 }
 0x481   : > { %v7622_v33 = vpop.f32.mrf.mxu2  ;;  %v7446_v11 = vpop.f32.mrf.mxu0 }
 0x482   : > { %v7711_v19 = vpop.f32.mrf.mxu3  ;;  %v7623_v22 = vadd.f32 %v7622_v33, %v7534_v18  ;;  %v7535_v14 = vpop.f32.mrf.mxu1  ;;  %v7447_v45 = vadd.f32 %v12031_v62, %v7446_v11 }
 0x484   : > { %v7712_v51 = vadd.f32 %v7711_v19, %v7623_v22  ;;  %v7536_v55 = vadd.f32 %v7535_v14, %v7447_v45 }
 0x486   : > { %v7752_v37 = vmax.f32 %v7712_v51, 0.0 }
 0x488   : > { %9281 = vst [vmem:[%s10175_s12 + $0x3d0] sm:$0xff] %v7752_v37 }
 0x489   : > { %v7624_v58 = vpop.f32.mrf.mxu2  ;;  %v7449_v1 = vpop.f32.mrf.mxu0 }
 0x48a   : > { %v7713_v30 = vpop.f32.mrf.mxu3  ;;  %v7625_v23 = vadd.f32 %v7624_v58, %v7536_v55  ;;  %v7538_v2 = vpop.f32.mrf.mxu1  ;;  %v7450_v6 = vadd.f32 %v12031_v62, %v7449_v1 }
 0x48c   : > { %v7714_v9 = vadd.f32 %v7713_v30, %v7625_v23  ;;  %v7539_v21 = vadd.f32 %v7538_v2, %v7450_v6 }
 0x48e   : > { %v7753_v15 = vmax.f32 %v7714_v9, 0.0 }
 0x490   : > { %9282 = vst [vmem:[%s10175_s12 + $0x3d8] sm:$0xff] %v7753_v15 }
 0x491   : > { %v7627_v32 = vpop.f32.mrf.mxu2  ;;  %v7451_v57 = vpop.f32.mrf.mxu0 }
 0x492   : > { %v7716_v3 = vpop.f32.mrf.mxu3  ;;  %v7628_v24 = vadd.f32 %v7627_v32, %v7539_v21  ;;  %v7540_v59 = vpop.f32.mrf.mxu1  ;;  %v7452_v13 = vadd.f32 %v12031_v62, %v7451_v57 }
 0x494   : > { %v7717_v40 = vadd.f32 %v7716_v3, %v7628_v24  ;;  %v7541_v44 = vadd.f32 %v7540_v59, %v7452_v13 }
 0x496   : > { %v7754_v8 = vmax.f32 %v7717_v40, 0.0 }
 0x498   : > { %9283 = vst [vmem:[%s10175_s12 + $0x3e0] sm:$0xff] %v7754_v8 }
 0x499   : > { %v7629_v38 = vpop.f32.mrf.mxu2  ;;  %v7454_v47 = vpop.f32.mrf.mxu0 }
 0x49a   : > { %v7718_v61 = vpop.f32.mrf.mxu3  ;;  %v7630_v41 = vadd.f32 %v7629_v38, %v7541_v44  ;;  %v7455_v12 = vadd.f32 %v12031_v62, %v7454_v47  ;;  %v7543_v60 = vpop.f32.mrf.mxu1 }
 0x49c   : > { %v7719_v31 = vadd.f32 %v7718_v61, %v7630_v41  ;;  %v7544_v28 = vadd.f32 %v7543_v60, %v7455_v12 }
 0x49e   : > { %v7755_v50 = vmax.f32 %v7719_v31, 0.0 }
 0x4a0   : > { %9284 = vst [vmem:[%s10175_s12 + $0x3e8] sm:$0xff] %v7755_v50 }
 0x4a1   : > { %v7632_v27 = vpop.f32.mrf.mxu2  ;;  %v7456_v35 = vpop.f32.mrf.mxu0 }
 0x4a2   : > { %v7721_v43 = vpop.f32.mrf.mxu3  ;;  %v7633_v4 = vadd.f32 %v7632_v27, %v7544_v28  ;;  %v7457_v48 = vadd.f32 %v12031_v62, %v7456_v35  ;;  %v7545_v53 = vpop.f32.mrf.mxu1 }
 0x4a4   : > { %v7722_v42 = vadd.f32 %v7721_v43, %v7633_v4  ;;  %v7546_v49 = vadd.f32 %v7545_v53, %v7457_v48 }
 0x4a6   : > { %v7756_v39 = vmax.f32 %v7722_v42, 0.0 }
 0x4a8   : > { %9285 = vst [vmem:[%s10175_s12 + $0x3f0] sm:$0xff] %v7756_v39 }
 0x4a9   : > { %v7634_v10 = vpop.f32.mrf.mxu2 }
 0x4aa   : > { %v7635_v34 = vadd.f32 %v7634_v10, %v7546_v49  ;;  %v7723_v46 = vpop.f32.mrf.mxu3 }
 0x4ac   : > { %v7724_v0 = vadd.f32 %v7723_v46, %v7635_v34 }
 0x4ae   : > { %v7757_v25 = vmax.f32 %v7724_v0, 0.0 }
 0x4b0   : > { %9286 = vst [vmem:[%s10175_s12 + $0x3f8] sm:$0xff] %v7757_v25 }
 0x4b1 PF: > { %s13_s14 = sadd.s32 1, %s9888_s14   ;;  %s12090_s12 = smov %s9884_s13 }
 0x4b2   : > { %p10_p5 = scmp.ge.s32.totalorder %s13_s14, 4   ;;  %s12091_s13 = smov %s12093_s15 }
 0x4b4   :  { %12 = sbr.rel (!%p10_p5) target bundleno = 2 (0x2), region = 70 }

</bundles_post_ra>
